<compile_context>
chip_gen: v5e
topology: v5e:2x2
jax: 0.10.0
libtpu: 0.0.40
codegen_flags: <defaults>
</compile_context>

<pallas_src>
import functools

import jax
import jax.numpy as jnp
from jax.experimental import pallas as pl
from jax.experimental.pallas import tpu as pltpu


LANE = 128                       # padded channel width (lane-dense everywhere)
STEM_C, EXP_C, SE_C, FEAT_C = 16, 32, 8, 64      # logical (scaled-down) widths
NUM_CLASSES = 5
STEM_K = 32                      # 3*3*3 = 27 contraction taps, padded to 32
VMEM_LIMIT = 48 * 1024 * 1024    # v7x-safe; raise toward 64-96 MiB on v5e/v6e


def _cparams(n_parallel_axes):
    return pltpu.CompilerParams(
        dimension_semantics=("parallel",) * n_parallel_axes,
        vmem_limit_bytes=VMEM_LIMIT,
    )


def _resident(shape):
    """BlockSpec for a weight that stays VMEM-resident across the grid."""
    return pl.BlockSpec(shape, lambda *_: (0,) * len(shape))


# ---------------------------------------------------------------------------
# Kernels
# ---------------------------------------------------------------------------
def _stem_kernel(p00_ref, p01_ref, p10_ref, p11_ref, w_ref, b_ref, o_ref,
                 *, Ho, Wo):
    """3x3 stride-2 conv (+folded BN bias) + SiLU as ONE MXU matmul.

    The four stride-2 phase views of the 1-padded image are sliced into the
    nine conv taps, concatenated along the contraction axis (27 -> padded 32)
    and contracted against the resident (32, 128) weight in a single bf16 dot.
    """
    phases = ((p00_ref[0], p01_ref[0]), (p10_ref[0], p11_ref[0]))
    cin = p00_ref.shape[-1]
    cout = o_ref.shape[-1]
    taps = []
    for dy in range(3):
        for dx in range(3):
            ph = phases[dy % 2][dx % 2]                       # (Ho+1, Wo+1, Cin)
            tap = ph[dy // 2:dy // 2 + Ho, dx // 2:dx // 2 + Wo, :]
            taps.append(tap.reshape(Ho * Wo, cin))
    kpad = STEM_K - 9 * cin
    if kpad:
        taps.append(jnp.zeros((Ho * Wo, kpad), jnp.float32))
    patch = jnp.concatenate(taps, axis=-1)                    # (Ho*Wo, 32)
    acc = jnp.dot(patch.astype(jnp.bfloat16), w_ref[...],
                  preferred_element_type=jnp.float32) + b_ref[...]
    acc = acc * jax.nn.sigmoid(acc)                           # SiLU
    o_ref[...] = acc.reshape(1, Ho, Wo, cout).astype(o_ref.dtype)


def _fused_kernel(x_ref, wexp_ref, bexp_ref, wdw_ref, bdw_ref,
                  wse1_ref, bse1_ref, wse2_ref, bse2_ref,
                  wproj_ref, bproj_ref, whead_ref, bhead_ref,
                  wcls_ref, bcls_ref, o_ref, *, H, W):
    """Fused MBConv + head 1x1 conv + global-average-pool + classifier Linear.

    One grid step = one batch image; the expanded / projected / head feature
    maps never leave VMEM, the only HBM write is the (1, 128) logits row.
    """
    C = x_ref.shape[-1]
    x_bf = x_ref[0].reshape(H * W, C)                         # bf16 (HW, C)

    # ---- expand 1x1 + SiLU (bf16 MXU, f32 accumulate / elementwise) ----
    h = jnp.dot(x_bf, wexp_ref[...],
                preferred_element_type=jnp.float32) + bexp_ref[...]
    h = h * jax.nn.sigmoid(h)
    h = h.reshape(H, W, C)

    # ---- depthwise 3x3 (stride 1, pad 1) + SiLU; W taps via XLU rolls ----
    # TODO(synk): ~75% of these VPU lanes are zero padding (EXP_C=32 of 128);
    # packing W*C_logical onto lanes would cut the dead-lane elementwise work.
    zrow = jnp.zeros((1, W, C), jnp.float32)
    hp = jnp.concatenate([zrow, h, zrow], axis=0)             # (H+2, W, C)
    col = jax.lax.broadcasted_iota(jnp.int32, hp.shape, 1)
    h_l = jnp.where(col == W - 1, 0.0, pltpu.roll(hp, shift=W - 1, axis=1))  # x+1
    h_r = jnp.where(col == 0, 0.0, pltpu.roll(hp, shift=1, axis=1))          # x-1
    wdw = wdw_ref[...]                                        # (3, 3, C)
    acc = jnp.zeros((H, W, C), jnp.float32)
    for dy in range(3):
        acc = acc + h_r[dy:dy + H] * wdw[dy, 0:1, :]
        acc = acc + hp[dy:dy + H] * wdw[dy, 1:2, :]
        acc = acc + h_l[dy:dy + H] * wdw[dy, 2:3, :]
    acc = acc + bdw_ref[...]
    acc = acc * jax.nn.sigmoid(acc)                           # (H, W, C)

    # ---- squeeze-excite (pool -> FC+SiLU -> FC+sigmoid -> scale) ----
    acc2d = acc.reshape(H * W, C)
    se_pool = jnp.mean(acc2d, axis=0, keepdims=True)          # (1, C)
    s = jnp.dot(se_pool, wse1_ref[...],
                preferred_element_type=jnp.float32) + bse1_ref[...]
    s = s * jax.nn.sigmoid(s)
    s = jnp.dot(s, wse2_ref[...],
                preferred_element_type=jnp.float32) + bse2_ref[...]
    gated = acc2d * jax.nn.sigmoid(s)                         # (HW, C)

    # ---- project 1x1 (no activation) + residual ----
    y = jnp.dot(gated.astype(jnp.bfloat16), wproj_ref[...],
                preferred_element_type=jnp.float32) + bproj_ref[...]
    y = y + x_bf.astype(jnp.float32)

    # ---- head 1x1 conv + SiLU ----
    f = jnp.dot(y.astype(jnp.bfloat16), whead_ref[...],
                preferred_element_type=jnp.float32) + bhead_ref[...]
    f = f * jax.nn.sigmoid(f)                                 # (HW, C)

    # ---- global average pool + classifier Linear ----
    # TODO(synk): nn.Dropout(0.2) is the identity in eval/inference, omitted.
    pooled = jnp.mean(f, axis=0, keepdims=True)               # (1, C)
    logits = jnp.dot(pooled, wcls_ref[...],
                     preferred_element_type=jnp.float32) + bcls_ref[...]
    o_ref[...] = logits.reshape(1, 1, C).astype(o_ref.dtype)


# ---------------------------------------------------------------------------
# Wrappers (glue: transpose / pad / phase views / reshapes only)
# ---------------------------------------------------------------------------
def stem_conv(x_nhwc, w, b):
    B, H, W, cin = x_nhwc.shape
    assert H % 2 == 0 and W % 2 == 0
    Ho, Wo = H // 2, W // 2
    xp = jnp.pad(x_nhwc, ((0, 0), (1, 1), (1, 1), (0, 0)))
    # four stride-2 phase views, each (B, Ho+1, Wo+1, Cin): ~1.1x the input,
    # instead of a 9x im2col patch tensor in HBM.
    phases = [xp[:, py::2, px::2, :] for py in range(2) for px in range(2)]
    cout = w.shape[-1]
    cost = pl.CostEstimate(
        flops=2 * B * Ho * Wo * STEM_K * cout,
        transcendentals=B * Ho * Wo * cout,
        bytes_accessed=(4 * B * (Ho + 1) * (Wo + 1) * cin * 4
                        + int(w.size) * 2 + int(b.size) * 4
                        + B * Ho * Wo * cout * 2),
    )
    return pl.pallas_call(
        functools.partial(_stem_kernel, Ho=Ho, Wo=Wo),
        out_shape=jax.ShapeDtypeStruct((B, Ho, Wo, cout), jnp.bfloat16),
        grid=(B,),
        in_specs=[pl.BlockSpec((1, Ho + 1, Wo + 1, cin),
                               lambda bb: (bb, 0, 0, 0)) for _ in range(4)]
                 + [_resident(w.shape), _resident(b.shape)],
        out_specs=pl.BlockSpec((1, Ho, Wo, cout), lambda bb: (bb, 0, 0, 0)),
        compiler_params=_cparams(1),
        cost_estimate=cost,
    )(*phases, w, b)


def fused_mbconv_head_classifier(x, p):
    B, H, W, C = x.shape
    weights = (p["exp_w"], p["exp_b"], p["dw_w"], p["dw_b"],
               p["se_w1"], p["se_b1"], p["se_w2"], p["se_b2"],
               p["proj_w"], p["proj_b"], p["head_w"], p["head_b"],
               p["cls_w"], p["cls_b"])
    w_bytes = sum(int(a.size) * a.dtype.itemsize for a in weights)
    hw = H * W
    cost = pl.CostEstimate(
        flops=B * (3 * 2 * hw * C * C       # expand / project / head 1x1
                   + 2 * 9 * hw * C         # depthwise 3x3
                   + 3 * 2 * C * C),        # SE FCs + classifier
        transcendentals=B * (3 * hw * C + 3 * C),
        bytes_accessed=B * hw * C * 2 + w_bytes + B * LANE * 4,
    )
    in_specs = [pl.BlockSpec((1, H, W, C), lambda bb: (bb, 0, 0, 0))]
    in_specs += [_resident(a.shape) for a in weights]
    out = pl.pallas_call(
        functools.partial(_fused_kernel, H=H, W=W),
        out_shape=jax.ShapeDtypeStruct((B, 1, LANE), jnp.float32),
        grid=(B,),
        in_specs=in_specs,
        out_specs=pl.BlockSpec((1, 1, LANE), lambda bb: (bb, 0, 0)),
        compiler_params=_cparams(1),
        cost_estimate=cost,
    )(x, *weights)
    return out.reshape(B, LANE)


# ---------------------------------------------------------------------------
# Model: parameters + forward
# ---------------------------------------------------------------------------
def _randn_padded(key, logical_shape, padded_shape, scale=0.1, dtype=jnp.float32):
    w = jax.random.normal(key, logical_shape, jnp.float32) * scale
    full = jnp.zeros(padded_shape, jnp.float32)
    full = full.at[tuple(slice(0, s) for s in logical_shape)].set(w)
    return full.astype(dtype)


def init_params(key, num_classes=NUM_CLASSES):
    ks = jax.random.split(key, 13)
    C = LANE
    return {
        # stem 3x3/s2 conv: K index = (dy*3+dx)*3 + cin, padded 27 -> 32; BN folded
        "stem_w": _randn_padded(ks[0], (27, STEM_C), (STEM_K, C), dtype=jnp.bfloat16),
        "stem_b": _randn_padded(ks[1], (1, STEM_C), (1, C)),
        # MBConv expand 1x1 (bf16 storage: halves weight DMA, feeds MXU bf16)
        "exp_w": _randn_padded(ks[2], (STEM_C, EXP_C), (C, C), dtype=jnp.bfloat16),
        "exp_b": _randn_padded(ks[3], (1, EXP_C), (1, C)),
        # depthwise 3x3 (elementwise -> keep f32)
        "dw_w": _randn_padded(ks[4], (3, 3, EXP_C), (3, 3, C)),
        "dw_b": _randn_padded(ks[5], (1, EXP_C), (1, C)),
        # squeeze-excite
        "se_w1": _randn_padded(ks[6], (EXP_C, SE_C), (C, C)),
        "se_b1": _randn_padded(ks[7], (1, SE_C), (1, C)),
        "se_w2": _randn_padded(ks[8], (SE_C, EXP_C), (C, C)),
        "se_b2": _randn_padded(ks[9], (1, EXP_C), (1, C)),
        # MBConv project 1x1 (no activation)
        "proj_w": _randn_padded(ks[10], (EXP_C, STEM_C), (C, C), dtype=jnp.bfloat16),
        "proj_b": jnp.zeros((1, C), jnp.float32),
        # head 1x1 conv -> feature dim
        "head_w": _randn_padded(ks[11], (STEM_C, FEAT_C), (C, C), dtype=jnp.bfloat16),
        "head_b": jnp.zeros((1, C), jnp.float32),
        # classifier Linear(feature_dim, num_classes); tiny -> keep f32
        "cls_w": _randn_padded(ks[12], (FEAT_C, num_classes), (C, C)),
        "cls_b": jnp.zeros((1, C), jnp.float32),
    }


def efficientnet_forward(params, x_nchw):
    """Equivalent of EfficientNetModel.forward (inference)."""
    # NCHW (PyTorch convention) -> NHWC so channels sit on the 128-lane axis.
    x = jnp.transpose(x_nchw, (0, 2, 3, 1)).astype(jnp.float32)
    # stem 3x3/s2 conv + SiLU -> bf16 activation (only HBM activation traffic)
    x = stem_conv(x, params["stem_w"], params["stem_b"])       # (B, H/2, W/2, 128)
    # fused MBConv + head 1x1 + global pool + classifier -> padded logits
    logits = fused_mbconv_head_classifier(x, params)           # (B, 128)
    return logits[:, :NUM_CLASSES]                             # strip lane padding


if __name__ == "__main__":
    key = jax.random.PRNGKey(0)
    kx, kp = jax.random.split(key)
    x = jax.random.normal(kx, (2, 3, 16, 16), jnp.float32)     # NCHW like PyTorch
    params = init_params(kp, num_classes=NUM_CLASSES)

    fwd = jax.jit(lambda inp: efficientnet_forward(params, inp))
    logits = jax.block_until_ready(fwd(x))

    assert logits.shape == (2, NUM_CLASSES), logits.shape
    assert bool(jnp.all(jnp.isfinite(logits)))
    print("KERNEL_OK")
</pallas_src>

<mosaic_0001>
module attributes {stable_mosaic.version = 11 : i64} {
  func.func @_stem_kernel(%arg0: i32, %arg1: memref<1x9x9x3xf32, #tpu.memory_space<vmem>>, %arg2: memref<1x9x9x3xf32, #tpu.memory_space<vmem>>, %arg3: memref<1x9x9x3xf32, #tpu.memory_space<vmem>>, %arg4: memref<1x9x9x3xf32, #tpu.memory_space<vmem>>, %arg5: memref<32x128xbf16, #tpu.memory_space<vmem>>, %arg6: memref<1x128xf32, #tpu.memory_space<vmem>>, %arg7: memref<1x8x8x128xbf16, #tpu.memory_space<vmem>>) attributes {dimension_semantics = [#tpu.dimension_semantics<parallel>], iteration_bounds = array<i64: 2>, scalar_prefetch = 0 : i64, scratch_operands = 0 : i64, tpu.core_type = #tpu.core_type<tc>, window_params = [{transform_indices = @transform_0, window_bounds = array<i64: 1, 9, 9, 3>}, {transform_indices = @transform_1, window_bounds = array<i64: 1, 9, 9, 3>}, {transform_indices = @transform_2, window_bounds = array<i64: 1, 9, 9, 3>}, {transform_indices = @transform_3, window_bounds = array<i64: 1, 9, 9, 3>}, {pipeline_mode = #tpu.pipeline_mode<synchronous>, transform_indices = @transform_4, window_bounds = array<i64: 32, 128>}, {pipeline_mode = #tpu.pipeline_mode<synchronous>, transform_indices = @transform_5, window_bounds = array<i64: 1, 128>}, {transform_indices = @transform_6, window_bounds = array<i64: 1, 8, 8, 128>}]} {
    %c0 = arith.constant 0 : index
    %c0_0 = arith.constant 0 : index
    %c0_1 = arith.constant 0 : index
    %c0_2 = arith.constant 0 : index
    %0 = vector.load %arg1[%c0, %c0_0, %c0_1, %c0_2] : memref<1x9x9x3xf32, #tpu.memory_space<vmem>>, vector<1x9x9x3xf32>
    %1 = vector.shape_cast %0 : vector<1x9x9x3xf32> to vector<9x9x3xf32>
    %c0_3 = arith.constant 0 : index
    %c0_4 = arith.constant 0 : index
    %c0_5 = arith.constant 0 : index
    %c0_6 = arith.constant 0 : index
    %2 = vector.load %arg2[%c0_3, %c0_4, %c0_5, %c0_6] : memref<1x9x9x3xf32, #tpu.memory_space<vmem>>, vector<1x9x9x3xf32>
    %3 = vector.shape_cast %2 : vector<1x9x9x3xf32> to vector<9x9x3xf32>
    %c0_7 = arith.constant 0 : index
    %c0_8 = arith.constant 0 : index
    %c0_9 = arith.constant 0 : index
    %c0_10 = arith.constant 0 : index
    %4 = vector.load %arg3[%c0_7, %c0_8, %c0_9, %c0_10] : memref<1x9x9x3xf32, #tpu.memory_space<vmem>>, vector<1x9x9x3xf32>
    %5 = vector.shape_cast %4 : vector<1x9x9x3xf32> to vector<9x9x3xf32>
    %c0_11 = arith.constant 0 : index
    %c0_12 = arith.constant 0 : index
    %c0_13 = arith.constant 0 : index
    %c0_14 = arith.constant 0 : index
    %6 = vector.load %arg4[%c0_11, %c0_12, %c0_13, %c0_14] : memref<1x9x9x3xf32, #tpu.memory_space<vmem>>, vector<1x9x9x3xf32>
    %7 = vector.shape_cast %6 : vector<1x9x9x3xf32> to vector<9x9x3xf32>
    %8 = vector.extract_strided_slice %1 {offsets = [0, 0, 0], sizes = [8, 8, 3], strides = [1, 1, 1]} : vector<9x9x3xf32> to vector<8x8x3xf32>
    %9 = vector.shape_cast %8 : vector<8x8x3xf32> to vector<64x3xf32>
    %10 = vector.extract_strided_slice %3 {offsets = [0, 0, 0], sizes = [8, 8, 3], strides = [1, 1, 1]} : vector<9x9x3xf32> to vector<8x8x3xf32>
    %11 = vector.shape_cast %10 : vector<8x8x3xf32> to vector<64x3xf32>
    %12 = vector.extract_strided_slice %1 {offsets = [0, 1, 0], sizes = [8, 8, 3], strides = [1, 1, 1]} : vector<9x9x3xf32> to vector<8x8x3xf32>
    %13 = vector.shape_cast %12 : vector<8x8x3xf32> to vector<64x3xf32>
    %14 = vector.extract_strided_slice %5 {offsets = [0, 0, 0], sizes = [8, 8, 3], strides = [1, 1, 1]} : vector<9x9x3xf32> to vector<8x8x3xf32>
    %15 = vector.shape_cast %14 : vector<8x8x3xf32> to vector<64x3xf32>
    %16 = vector.extract_strided_slice %7 {offsets = [0, 0, 0], sizes = [8, 8, 3], strides = [1, 1, 1]} : vector<9x9x3xf32> to vector<8x8x3xf32>
    %17 = vector.shape_cast %16 : vector<8x8x3xf32> to vector<64x3xf32>
    %18 = vector.extract_strided_slice %5 {offsets = [0, 1, 0], sizes = [8, 8, 3], strides = [1, 1, 1]} : vector<9x9x3xf32> to vector<8x8x3xf32>
    %19 = vector.shape_cast %18 : vector<8x8x3xf32> to vector<64x3xf32>
    %20 = vector.extract_strided_slice %1 {offsets = [1, 0, 0], sizes = [8, 8, 3], strides = [1, 1, 1]} : vector<9x9x3xf32> to vector<8x8x3xf32>
    %21 = vector.shape_cast %20 : vector<8x8x3xf32> to vector<64x3xf32>
    %22 = vector.extract_strided_slice %3 {offsets = [1, 0, 0], sizes = [8, 8, 3], strides = [1, 1, 1]} : vector<9x9x3xf32> to vector<8x8x3xf32>
    %23 = vector.shape_cast %22 : vector<8x8x3xf32> to vector<64x3xf32>
    %24 = vector.extract_strided_slice %1 {offsets = [1, 1, 0], sizes = [8, 8, 3], strides = [1, 1, 1]} : vector<9x9x3xf32> to vector<8x8x3xf32>
    %25 = vector.shape_cast %24 : vector<8x8x3xf32> to vector<64x3xf32>
    %cst = arith.constant 0.000000e+00 : f32
    %26 = vector.broadcast %cst : f32 to vector<64x5xf32>
    %27 = tpu.concatenate %9, %11, %13, %15, %17, %19, %21, %23, %25, %26 in 1 : vector<64x3xf32>, vector<64x3xf32>, vector<64x3xf32>, vector<64x3xf32>, vector<64x3xf32>, vector<64x3xf32>, vector<64x3xf32>, vector<64x3xf32>, vector<64x3xf32>, vector<64x5xf32> -> vector<64x32xf32>
    %28 = arith.truncf %27 : vector<64x32xf32> to vector<64x32xbf16>
    %c0_15 = arith.constant 0 : index
    %c0_16 = arith.constant 0 : index
    %29 = vector.load %arg5[%c0_15, %c0_16] : memref<32x128xbf16, #tpu.memory_space<vmem>>, vector<32x128xbf16>
    %cst_17 = arith.constant dense<0.000000e+00> : vector<64x128xf32>
    %30 = tpu.matmul %28, %29, %cst_17 {dimension_numbers = #tpu.dot_dimension_numbers<[1], [0], [0], [1], [0, 0, 1, 1], [], []>} : vector<64x32xbf16>, vector<32x128xbf16>, vector<64x128xf32> -> vector<64x128xf32>
    %c0_18 = arith.constant 0 : index
    %c0_19 = arith.constant 0 : index
    %31 = vector.load %arg6[%c0_18, %c0_19] : memref<1x128xf32, #tpu.memory_space<vmem>>, vector<1x128xf32>
    %32 = vector.broadcast %31 : vector<1x128xf32> to vector<64x128xf32>
    %33 = arith.addf %30, %32 : vector<64x128xf32>
    %34 = arith.negf %33 : vector<64x128xf32>
    %35 = math.exp %34 : vector<64x128xf32>
    %cst_20 = arith.constant 1.000000e+00 : f32
    %36 = vector.broadcast %cst_20 : f32 to vector<64x128xf32>
    %37 = arith.addf %36, %35 : vector<64x128xf32>
    %38 = arith.divf %36, %37 : vector<64x128xf32>
    %39 = arith.mulf %33, %38 : vector<64x128xf32>
    %40 = vector.shape_cast %39 : vector<64x128xf32> to vector<1x8x8x128xf32>
    %41 = arith.truncf %40 : vector<1x8x8x128xf32> to vector<1x8x8x128xbf16>
    %c0_21 = arith.constant 0 : index
    %c0_22 = arith.constant 0 : index
    %c0_23 = arith.constant 0 : index
    %c0_24 = arith.constant 0 : index
    %42 = vector.load %arg7[%c0_21, %c0_22, %c0_23, %c0_24] : memref<1x8x8x128xbf16, #tpu.memory_space<vmem>>, vector<1x8x8x128xbf16>
    tpu.vector_store %arg7[%c0_21, %c0_22, %c0_23, %c0_24], %41 {strides = array<i32>} : memref<1x8x8x128xbf16, #tpu.memory_space<vmem>>, vector<1x8x8x128xbf16>,
    return
  }
  func.func @transform_0(%arg0: i32) -> (i32, i32, i32, i32) {
    %c0_i32 = arith.constant 0 : i32
    %c0_i32_0 = arith.constant 0 : i32
    %c0_i32_1 = arith.constant 0 : i32
    %c0_i32_2 = arith.constant 0 : i32
    return %arg0, %c0_i32, %c0_i32_0, %c0_i32_1 : i32, i32, i32, i32
  }
  func.func @transform_1(%arg0: i32) -> (i32, i32, i32, i32) {
    %c0_i32 = arith.constant 0 : i32
    %c0_i32_0 = arith.constant 0 : i32
    %c0_i32_1 = arith.constant 0 : i32
    %c0_i32_2 = arith.constant 0 : i32
    return %arg0, %c0_i32, %c0_i32_0, %c0_i32_1 : i32, i32, i32, i32
  }
  func.func @transform_2(%arg0: i32) -> (i32, i32, i32, i32) {
    %c0_i32 = arith.constant 0 : i32
    %c0_i32_0 = arith.constant 0 : i32
    %c0_i32_1 = arith.constant 0 : i32
    %c0_i32_2 = arith.constant 0 : i32
    return %arg0, %c0_i32, %c0_i32_0, %c0_i32_1 : i32, i32, i32, i32
  }
  func.func @transform_3(%arg0: i32) -> (i32, i32, i32, i32) {
    %c0_i32 = arith.constant 0 : i32
    %c0_i32_0 = arith.constant 0 : i32
    %c0_i32_1 = arith.constant 0 : i32
    %c0_i32_2 = arith.constant 0 : i32
    return %arg0, %c0_i32, %c0_i32_0, %c0_i32_1 : i32, i32, i32, i32
  }
  func.func @transform_4(%arg0: i32) -> (i32, i32) {
    %c0_i32 = arith.constant 0 : i32
    %c0_i32_0 = arith.constant 0 : i32
    %c0_i32_1 = arith.constant 0 : i32
    return %c0_i32, %c0_i32_0 : i32, i32
  }
  func.func @transform_5(%arg0: i32) -> (i32, i32) {
    %c0_i32 = arith.constant 0 : i32
    %c0_i32_0 = arith.constant 0 : i32
    %c0_i32_1 = arith.constant 0 : i32
    return %c0_i32, %c0_i32_0 : i32, i32
  }
  func.func @transform_6(%arg0: i32) -> (i32, i32, i32, i32) {
    %c0_i32 = arith.constant 0 : i32
    %c0_i32_0 = arith.constant 0 : i32
    %c0_i32_1 = arith.constant 0 : i32
    %c0_i32_2 = arith.constant 0 : i32
    return %arg0, %c0_i32, %c0_i32_0, %c0_i32_1 : i32, i32, i32, i32
  }
}

module attributes {stable_mosaic.version = 11 : i64} {
  func.func @_fused_kernel(%arg0: i32, %arg1: memref<1x8x8x128xbf16, #tpu.memory_space<vmem>>, %arg2: memref<128x128xbf16, #tpu.memory_space<vmem>>, %arg3: memref<1x128xf32, #tpu.memory_space<vmem>>, %arg4: memref<3x3x128xf32, #tpu.memory_space<vmem>>, %arg5: memref<1x128xf32, #tpu.memory_space<vmem>>, %arg6: memref<128x128xf32, #tpu.memory_space<vmem>>, %arg7: memref<1x128xf32, #tpu.memory_space<vmem>>, %arg8: memref<128x128xf32, #tpu.memory_space<vmem>>, %arg9: memref<1x128xf32, #tpu.memory_space<vmem>>, %arg10: memref<128x128xbf16, #tpu.memory_space<vmem>>, %arg11: memref<1x128xf32, #tpu.memory_space<vmem>>, %arg12: memref<128x128xbf16, #tpu.memory_space<vmem>>, %arg13: memref<1x128xf32, #tpu.memory_space<vmem>>, %arg14: memref<128x128xf32, #tpu.memory_space<vmem>>, %arg15: memref<1x128xf32, #tpu.memory_space<vmem>>, %arg16: memref<1x1x128xf32, #tpu.memory_space<vmem>>) attributes {dimension_semantics = [#tpu.dimension_semantics<parallel>], iteration_bounds = array<i64: 2>, scalar_prefetch = 0 : i64, scratch_operands = 0 : i64, tpu.core_type = #tpu.core_type<tc>, window_params = [{transform_indices = @transform_0, window_bounds = array<i64: 1, 8, 8, 128>}, {pipeline_mode = #tpu.pipeline_mode<synchronous>, transform_indices = @transform_1, window_bounds = array<i64: 128, 128>}, {pipeline_mode = #tpu.pipeline_mode<synchronous>, transform_indices = @transform_2, window_bounds = array<i64: 1, 128>}, {pipeline_mode = #tpu.pipeline_mode<synchronous>, transform_indices = @transform_3, window_bounds = array<i64: 3, 3, 128>}, {pipeline_mode = #tpu.pipeline_mode<synchronous>, transform_indices = @transform_4, window_bounds = array<i64: 1, 128>}, {pipeline_mode = #tpu.pipeline_mode<synchronous>, transform_indices = @transform_5, window_bounds = array<i64: 128, 128>}, {pipeline_mode = #tpu.pipeline_mode<synchronous>, transform_indices = @transform_6, window_bounds = array<i64: 1, 128>}, {pipeline_mode = #tpu.pipeline_mode<synchronous>, transform_indices = @transform_7, window_bounds = array<i64: 128, 128>}, {pipeline_mode = #tpu.pipeline_mode<synchronous>, transform_indices = @transform_8, window_bounds = array<i64: 1, 128>}, {pipeline_mode = #tpu.pipeline_mode<synchronous>, transform_indices = @transform_9, window_bounds = array<i64: 128, 128>}, {pipeline_mode = #tpu.pipeline_mode<synchronous>, transform_indices = @transform_10, window_bounds = array<i64: 1, 128>}, {pipeline_mode = #tpu.pipeline_mode<synchronous>, transform_indices = @transform_11, window_bounds = array<i64: 128, 128>}, {pipeline_mode = #tpu.pipeline_mode<synchronous>, transform_indices = @transform_12, window_bounds = array<i64: 1, 128>}, {pipeline_mode = #tpu.pipeline_mode<synchronous>, transform_indices = @transform_13, window_bounds = array<i64: 128, 128>}, {pipeline_mode = #tpu.pipeline_mode<synchronous>, transform_indices = @transform_14, window_bounds = array<i64: 1, 128>}, {transform_indices = @transform_15, window_bounds = array<i64: 1, 1, 128>}]} {
    %c0 = arith.constant 0 : index
    %c0_0 = arith.constant 0 : index
    %c0_1 = arith.constant 0 : index
    %c0_2 = arith.constant 0 : index
    %0 = vector.load %arg1[%c0, %c0_0, %c0_1, %c0_2] : memref<1x8x8x128xbf16, #tpu.memory_space<vmem>>, vector<1x8x8x128xbf16>
    %1 = vector.shape_cast %0 : vector<1x8x8x128xbf16> to vector<8x8x128xbf16>
    %2 = vector.shape_cast %1 : vector<8x8x128xbf16> to vector<64x128xbf16>
    %c0_3 = arith.constant 0 : index
    %c0_4 = arith.constant 0 : index
    %3 = vector.load %arg2[%c0_3, %c0_4] : memref<128x128xbf16, #tpu.memory_space<vmem>>, vector<128x128xbf16>
    %cst = arith.constant dense<0.000000e+00> : vector<64x128xf32>
    %4 = tpu.matmul %2, %3, %cst {dimension_numbers = #tpu.dot_dimension_numbers<[1], [0], [0], [1], [0, 0, 1, 1], [], []>} : vector<64x128xbf16>, vector<128x128xbf16>, vector<64x128xf32> -> vector<64x128xf32>
    %c0_5 = arith.constant 0 : index
    %c0_6 = arith.constant 0 : index
    %5 = vector.load %arg3[%c0_5, %c0_6] : memref<1x128xf32, #tpu.memory_space<vmem>>, vector<1x128xf32>
    %6 = vector.broadcast %5 : vector<1x128xf32> to vector<64x128xf32>
    %7 = arith.addf %4, %6 : vector<64x128xf32>
    %8 = arith.negf %7 : vector<64x128xf32>
    %9 = math.exp %8 : vector<64x128xf32>
    %cst_7 = arith.constant 1.000000e+00 : f32
    %10 = vector.broadcast %cst_7 : f32 to vector<64x128xf32>
    %11 = arith.addf %10, %9 : vector<64x128xf32>
    %12 = arith.divf %10, %11 : vector<64x128xf32>
    %13 = arith.mulf %7, %12 : vector<64x128xf32>
    %14 = vector.shape_cast %13 : vector<64x128xf32> to vector<8x8x128xf32>
    %cst_8 = arith.constant 0.000000e+00 : f32
    %15 = vector.broadcast %cst_8 : f32 to vector<1x8x128xf32>
    %16 = tpu.concatenate %15, %14, %15 in 0 : vector<1x8x128xf32>, vector<8x8x128xf32>, vector<1x8x128xf32> -> vector<10x8x128xf32>
    %17 = tpu.iota {dimensions = array<i32: 1>} : vector<10x8x128xi32>
    %c7_i32 = arith.constant 7 : i32
    %18 = vector.broadcast %c7_i32 : i32 to vector<10x8x128xi32>
    %19 = arith.cmpi eq, %17, %18 : vector<10x8x128xi32>
    %c7_i32_9 = arith.constant 7 : i32
    %20 = tpu.dynamic_rotate %16 by %c7_i32_9 dim 1 : vector<10x8x128xf32>, i32 -> vector<10x8x128xf32>
    %cst_10 = arith.constant 0.000000e+00 : f32
    %21 = vector.broadcast %cst_10 : f32 to vector<10x8x128xf32>
    %22 = arith.select %19, %21, %20 : vector<10x8x128xi1>, vector<10x8x128xf32>
    %c0_i32 = arith.constant 0 : i32
    %23 = vector.broadcast %c0_i32 : i32 to vector<10x8x128xi32>
    %24 = arith.cmpi eq, %17, %23 : vector<10x8x128xi32>
    %c1_i32 = arith.constant 1 : i32
    %25 = tpu.dynamic_rotate %16 by %c1_i32 dim 1 : vector<10x8x128xf32>, i32 -> vector<10x8x128xf32>
    %cst_11 = arith.constant 0.000000e+00 : f32
    %26 = vector.broadcast %cst_11 : f32 to vector<10x8x128xf32>
    %27 = arith.select %24, %26, %25 : vector<10x8x128xi1>, vector<10x8x128xf32>
    %c0_12 = arith.constant 0 : index
    %c0_13 = arith.constant 0 : index
    %c0_14 = arith.constant 0 : index
    %28 = vector.load %arg4[%c0_12, %c0_13, %c0_14] : memref<3x3x128xf32, #tpu.memory_space<vmem>>, vector<3x3x128xf32>
    %cst_15 = arith.constant 0.000000e+00 : f32
    %29 = vector.broadcast %cst_15 : f32 to vector<8x8x128xf32>
    %30 = vector.extract_strided_slice %27 {offsets = [0, 0, 0], sizes = [8, 8, 128], strides = [1, 1, 1]} : vector<10x8x128xf32> to vector<8x8x128xf32>
    %31 = vector.extract_strided_slice %28 {offsets = [0, 0, 0], sizes = [1, 1, 128], strides = [1, 1, 1]} : vector<3x3x128xf32> to vector<1x1x128xf32>
    %32 = vector.shape_cast %31 : vector<1x1x128xf32> to vector<1x128xf32>
    %33 = vector.shape_cast %32 : vector<1x128xf32> to vector<1x1x128xf32>
    %34 = vector.broadcast %33 : vector<1x1x128xf32> to vector<8x8x128xf32>
    %35 = arith.mulf %30, %34 : vector<8x8x128xf32>
    %36 = arith.addf %29, %35 : vector<8x8x128xf32>
    %37 = vector.extract_strided_slice %16 {offsets = [0, 0, 0], sizes = [8, 8, 128], strides = [1, 1, 1]} : vector<10x8x128xf32> to vector<8x8x128xf32>
    %38 = vector.extract_strided_slice %28 {offsets = [0, 1, 0], sizes = [1, 1, 128], strides = [1, 1, 1]} : vector<3x3x128xf32> to vector<1x1x128xf32>
    %39 = vector.shape_cast %38 : vector<1x1x128xf32> to vector<1x128xf32>
    %40 = vector.shape_cast %39 : vector<1x128xf32> to vector<1x1x128xf32>
    %41 = vector.broadcast %40 : vector<1x1x128xf32> to vector<8x8x128xf32>
    %42 = arith.mulf %37, %41 : vector<8x8x128xf32>
    %43 = arith.addf %36, %42 : vector<8x8x128xf32>
    %44 = vector.extract_strided_slice %22 {offsets = [0, 0, 0], sizes = [8, 8, 128], strides = [1, 1, 1]} : vector<10x8x128xf32> to vector<8x8x128xf32>
    %45 = vector.extract_strided_slice %28 {offsets = [0, 2, 0], sizes = [1, 1, 128], strides = [1, 1, 1]} : vector<3x3x128xf32> to vector<1x1x128xf32>
    %46 = vector.shape_cast %45 : vector<1x1x128xf32> to vector<1x128xf32>
    %47 = vector.shape_cast %46 : vector<1x128xf32> to vector<1x1x128xf32>
    %48 = vector.broadcast %47 : vector<1x1x128xf32> to vector<8x8x128xf32>
    %49 = arith.mulf %44, %48 : vector<8x8x128xf32>
    %50 = arith.addf %43, %49 : vector<8x8x128xf32>
    %51 = vector.extract_strided_slice %27 {offsets = [1, 0, 0], sizes = [8, 8, 128], strides = [1, 1, 1]} : vector<10x8x128xf32> to vector<8x8x128xf32>
    %52 = vector.extract_strided_slice %28 {offsets = [1, 0, 0], sizes = [1, 1, 128], strides = [1, 1, 1]} : vector<3x3x128xf32> to vector<1x1x128xf32>
    %53 = vector.shape_cast %52 : vector<1x1x128xf32> to vector<1x128xf32>
    %54 = vector.shape_cast %53 : vector<1x128xf32> to vector<1x1x128xf32>
    %55 = vector.broadcast %54 : vector<1x1x128xf32> to vector<8x8x128xf32>
    %56 = arith.mulf %51, %55 : vector<8x8x128xf32>
    %57 = arith.addf %50, %56 : vector<8x8x128xf32>
    %58 = vector.extract_strided_slice %16 {offsets = [1, 0, 0], sizes = [8, 8, 128], strides = [1, 1, 1]} : vector<10x8x128xf32> to vector<8x8x128xf32>
    %59 = vector.extract_strided_slice %28 {offsets = [1, 1, 0], sizes = [1, 1, 128], strides = [1, 1, 1]} : vector<3x3x128xf32> to vector<1x1x128xf32>
    %60 = vector.shape_cast %59 : vector<1x1x128xf32> to vector<1x128xf32>
    %61 = vector.shape_cast %60 : vector<1x128xf32> to vector<1x1x128xf32>
    %62 = vector.broadcast %61 : vector<1x1x128xf32> to vector<8x8x128xf32>
    %63 = arith.mulf %58, %62 : vector<8x8x128xf32>
    %64 = arith.addf %57, %63 : vector<8x8x128xf32>
    %65 = vector.extract_strided_slice %22 {offsets = [1, 0, 0], sizes = [8, 8, 128], strides = [1, 1, 1]} : vector<10x8x128xf32> to vector<8x8x128xf32>
    %66 = vector.extract_strided_slice %28 {offsets = [1, 2, 0], sizes = [1, 1, 128], strides = [1, 1, 1]} : vector<3x3x128xf32> to vector<1x1x128xf32>
    %67 = vector.shape_cast %66 : vector<1x1x128xf32> to vector<1x128xf32>
    %68 = vector.shape_cast %67 : vector<1x128xf32> to vector<1x1x128xf32>
    %69 = vector.broadcast %68 : vector<1x1x128xf32> to vector<8x8x128xf32>
    %70 = arith.mulf %65, %69 : vector<8x8x128xf32>
    %71 = arith.addf %64, %70 : vector<8x8x128xf32>
    %72 = vector.extract_strided_slice %27 {offsets = [2, 0, 0], sizes = [8, 8, 128], strides = [1, 1, 1]} : vector<10x8x128xf32> to vector<8x8x128xf32>
    %73 = vector.extract_strided_slice %28 {offsets = [2, 0, 0], sizes = [1, 1, 128], strides = [1, 1, 1]} : vector<3x3x128xf32> to vector<1x1x128xf32>
    %74 = vector.shape_cast %73 : vector<1x1x128xf32> to vector<1x128xf32>
    %75 = vector.shape_cast %74 : vector<1x128xf32> to vector<1x1x128xf32>
    %76 = vector.broadcast %75 : vector<1x1x128xf32> to vector<8x8x128xf32>
    %77 = arith.mulf %72, %76 : vector<8x8x128xf32>
    %78 = arith.addf %71, %77 : vector<8x8x128xf32>
    %79 = vector.extract_strided_slice %16 {offsets = [2, 0, 0], sizes = [8, 8, 128], strides = [1, 1, 1]} : vector<10x8x128xf32> to vector<8x8x128xf32>
    %80 = vector.extract_strided_slice %28 {offsets = [2, 1, 0], sizes = [1, 1, 128], strides = [1, 1, 1]} : vector<3x3x128xf32> to vector<1x1x128xf32>
    %81 = vector.shape_cast %80 : vector<1x1x128xf32> to vector<1x128xf32>
    %82 = vector.shape_cast %81 : vector<1x128xf32> to vector<1x1x128xf32>
    %83 = vector.broadcast %82 : vector<1x1x128xf32> to vector<8x8x128xf32>
    %84 = arith.mulf %79, %83 : vector<8x8x128xf32>
    %85 = arith.addf %78, %84 : vector<8x8x128xf32>
    %86 = vector.extract_strided_slice %22 {offsets = [2, 0, 0], sizes = [8, 8, 128], strides = [1, 1, 1]} : vector<10x8x128xf32> to vector<8x8x128xf32>
    %87 = vector.extract_strided_slice %28 {offsets = [2, 2, 0], sizes = [1, 1, 128], strides = [1, 1, 1]} : vector<3x3x128xf32> to vector<1x1x128xf32>
    %88 = vector.shape_cast %87 : vector<1x1x128xf32> to vector<1x128xf32>
    %89 = vector.shape_cast %88 : vector<1x128xf32> to vector<1x1x128xf32>
    %90 = vector.broadcast %89 : vector<1x1x128xf32> to vector<8x8x128xf32>
    %91 = arith.mulf %86, %90 : vector<8x8x128xf32>
    %92 = arith.addf %85, %91 : vector<8x8x128xf32>
    %c0_16 = arith.constant 0 : index
    %c0_17 = arith.constant 0 : index
    %93 = vector.load %arg5[%c0_16, %c0_17] : memref<1x128xf32, #tpu.memory_space<vmem>>, vector<1x128xf32>
    %94 = vector.shape_cast %93 : vector<1x128xf32> to vector<1x1x128xf32>
    %95 = vector.broadcast %94 : vector<1x1x128xf32> to vector<8x8x128xf32>
    %96 = arith.addf %92, %95 : vector<8x8x128xf32>
    %97 = arith.negf %96 : vector<8x8x128xf32>
    %98 = math.exp %97 : vector<8x8x128xf32>
    %cst_18 = arith.constant 1.000000e+00 : f32
    %99 = vector.broadcast %cst_18 : f32 to vector<8x8x128xf32>
    %100 = arith.addf %99, %98 : vector<8x8x128xf32>
    %101 = arith.divf %99, %100 : vector<8x8x128xf32>
    %102 = arith.mulf %96, %101 : vector<8x8x128xf32>
    %103 = vector.shape_cast %102 : vector<8x8x128xf32> to vector<64x128xf32>
    %cst_19 = arith.constant dense<0.000000e+00> : vector<128xf32>
    %104 = vector.multi_reduction <add>, %103, %cst_19 [0] : vector<64x128xf32> to vector<128xf32>
    %105 = vector.shape_cast %104 : vector<128xf32> to vector<1x128xf32>
    %cst_20 = arith.constant 6.400000e+01 : f32
    %106 = vector.broadcast %cst_20 : f32 to vector<1x128xf32>
    %107 = arith.divf %105, %106 : vector<1x128xf32>
    %c0_21 = arith.constant 0 : index
    %c0_22 = arith.constant 0 : index
    %108 = vector.load %arg6[%c0_21, %c0_22] : memref<128x128xf32, #tpu.memory_space<vmem>>, vector<128x128xf32>
    %cst_23 = arith.constant dense<0.000000e+00> : vector<1x128xf32>
    %109 = tpu.matmul %107, %108, %cst_23 {dimension_numbers = #tpu.dot_dimension_numbers<[1], [0], [0], [1], [0, 0, 1, 1], [], []>} : vector<1x128xf32>, vector<128x128xf32>, vector<1x128xf32> -> vector<1x128xf32>
    %c0_24 = arith.constant 0 : index
    %c0_25 = arith.constant 0 : index
    %110 = vector.load %arg7[%c0_24, %c0_25] : memref<1x128xf32, #tpu.memory_space<vmem>>, vector<1x128xf32>
    %111 = arith.addf %109, %110 : vector<1x128xf32>
    %112 = arith.negf %111 : vector<1x128xf32>
    %113 = math.exp %112 : vector<1x128xf32>
    %cst_26 = arith.constant 1.000000e+00 : f32
    %114 = vector.broadcast %cst_26 : f32 to vector<1x128xf32>
    %115 = arith.addf %114, %113 : vector<1x128xf32>
    %116 = arith.divf %114, %115 : vector<1x128xf32>
    %117 = arith.mulf %111, %116 : vector<1x128xf32>
    %c0_27 = arith.constant 0 : index
    %c0_28 = arith.constant 0 : index
    %118 = vector.load %arg8[%c0_27, %c0_28] : memref<128x128xf32, #tpu.memory_space<vmem>>, vector<128x128xf32>
    %cst_29 = arith.constant dense<0.000000e+00> : vector<1x128xf32>
    %119 = tpu.matmul %117, %118, %cst_29 {dimension_numbers = #tpu.dot_dimension_numbers<[1], [0], [0], [1], [0, 0, 1, 1], [], []>} : vector<1x128xf32>, vector<128x128xf32>, vector<1x128xf32> -> vector<1x128xf32>
    %c0_30 = arith.constant 0 : index
    %c0_31 = arith.constant 0 : index
    %120 = vector.load %arg9[%c0_30, %c0_31] : memref<1x128xf32, #tpu.memory_space<vmem>>, vector<1x128xf32>
    %121 = arith.addf %119, %120 : vector<1x128xf32>
    %122 = arith.negf %121 : vector<1x128xf32>
    %123 = math.exp %122 : vector<1x128xf32>
    %cst_32 = arith.constant 1.000000e+00 : f32
    %124 = vector.broadcast %cst_32 : f32 to vector<1x128xf32>
    %125 = arith.addf %124, %123 : vector<1x128xf32>
    %126 = arith.divf %124, %125 : vector<1x128xf32>
    %127 = vector.broadcast %126 : vector<1x128xf32> to vector<64x128xf32>
    %128 = arith.mulf %103, %127 : vector<64x128xf32>
    %129 = arith.truncf %128 : vector<64x128xf32> to vector<64x128xbf16>
    %c0_33 = arith.constant 0 : index
    %c0_34 = arith.constant 0 : index
    %130 = vector.load %arg10[%c0_33, %c0_34] : memref<128x128xbf16, #tpu.memory_space<vmem>>, vector<128x128xbf16>
    %cst_35 = arith.constant dense<0.000000e+00> : vector<64x128xf32>
    %131 = tpu.matmul %129, %130, %cst_35 {dimension_numbers = #tpu.dot_dimension_numbers<[1], [0], [0], [1], [0, 0, 1, 1], [], []>} : vector<64x128xbf16>, vector<128x128xbf16>, vector<64x128xf32> -> vector<64x128xf32>
    %c0_36 = arith.constant 0 : index
    %c0_37 = arith.constant 0 : index
    %132 = vector.load %arg11[%c0_36, %c0_37] : memref<1x128xf32, #tpu.memory_space<vmem>>, vector<1x128xf32>
    %133 = vector.broadcast %132 : vector<1x128xf32> to vector<64x128xf32>
    %134 = arith.addf %131, %133 : vector<64x128xf32>
    %135 = arith.extf %2 : vector<64x128xbf16> to vector<64x128xf32>
    %136 = arith.addf %134, %135 : vector<64x128xf32>
    %137 = arith.truncf %136 : vector<64x128xf32> to vector<64x128xbf16>
    %c0_38 = arith.constant 0 : index
    %c0_39 = arith.constant 0 : index
    %138 = vector.load %arg12[%c0_38, %c0_39] : memref<128x128xbf16, #tpu.memory_space<vmem>>, vector<128x128xbf16>
    %cst_40 = arith.constant dense<0.000000e+00> : vector<64x128xf32>
    %139 = tpu.matmul %137, %138, %cst_40 {dimension_numbers = #tpu.dot_dimension_numbers<[1], [0], [0], [1], [0, 0, 1, 1], [], []>} : vector<64x128xbf16>, vector<128x128xbf16>, vector<64x128xf32> -> vector<64x128xf32>
    %c0_41 = arith.constant 0 : index
    %c0_42 = arith.constant 0 : index
    %140 = vector.load %arg13[%c0_41, %c0_42] : memref<1x128xf32, #tpu.memory_space<vmem>>, vector<1x128xf32>
    %141 = vector.broadcast %140 : vector<1x128xf32> to vector<64x128xf32>
    %142 = arith.addf %139, %141 : vector<64x128xf32>
    %143 = arith.negf %142 : vector<64x128xf32>
    %144 = math.exp %143 : vector<64x128xf32>
    %cst_43 = arith.constant 1.000000e+00 : f32
    %145 = vector.broadcast %cst_43 : f32 to vector<64x128xf32>
    %146 = arith.addf %145, %144 : vector<64x128xf32>
    %147 = arith.divf %145, %146 : vector<64x128xf32>
    %148 = arith.mulf %142, %147 : vector<64x128xf32>
    %cst_44 = arith.constant dense<0.000000e+00> : vector<128xf32>
    %149 = vector.multi_reduction <add>, %148, %cst_44 [0] : vector<64x128xf32> to vector<128xf32>
    %150 = vector.shape_cast %149 : vector<128xf32> to vector<1x128xf32>
    %cst_45 = arith.constant 6.400000e+01 : f32
    %151 = vector.broadcast %cst_45 : f32 to vector<1x128xf32>
    %152 = arith.divf %150, %151 : vector<1x128xf32>
    %c0_46 = arith.constant 0 : index
    %c0_47 = arith.constant 0 : index
    %153 = vector.load %arg14[%c0_46, %c0_47] : memref<128x128xf32, #tpu.memory_space<vmem>>, vector<128x128xf32>
    %cst_48 = arith.constant dense<0.000000e+00> : vector<1x128xf32>
    %154 = tpu.matmul %152, %153, %cst_48 {dimension_numbers = #tpu.dot_dimension_numbers<[1], [0], [0], [1], [0, 0, 1, 1], [], []>} : vector<1x128xf32>, vector<128x128xf32>, vector<1x128xf32> -> vector<1x128xf32>
    %c0_49 = arith.constant 0 : index
    %c0_50 = arith.constant 0 : index
    %155 = vector.load %arg15[%c0_49, %c0_50] : memref<1x128xf32, #tpu.memory_space<vmem>>, vector<1x128xf32>
    %156 = arith.addf %154, %155 : vector<1x128xf32>
    %157 = vector.shape_cast %156 : vector<1x128xf32> to vector<1x1x128xf32>
    %c0_51 = arith.constant 0 : index
    %c0_52 = arith.constant 0 : index
    %c0_53 = arith.constant 0 : index
    %158 = vector.load %arg16[%c0_51, %c0_52, %c0_53] : memref<1x1x128xf32, #tpu.memory_space<vmem>>, vector<1x1x128xf32>
    tpu.vector_store %arg16[%c0_51, %c0_52, %c0_53], %157 {strides = array<i32>} : memref<1x1x128xf32, #tpu.memory_space<vmem>>, vector<1x1x128xf32>,
    return
  }
  func.func @transform_0(%arg0: i32) -> (i32, i32, i32, i32) {
    %c0_i32 = arith.constant 0 : i32
    %c0_i32_0 = arith.constant 0 : i32
    %c0_i32_1 = arith.constant 0 : i32
    %c0_i32_2 = arith.constant 0 : i32
    return %arg0, %c0_i32, %c0_i32_0, %c0_i32_1 : i32, i32, i32, i32
  }
  func.func @transform_1(%arg0: i32) -> (i32, i32) {
    %c0_i32 = arith.constant 0 : i32
    %c0_i32_0 = arith.constant 0 : i32
    %c0_i32_1 = arith.constant 0 : i32
    return %c0_i32, %c0_i32_0 : i32, i32
  }
  func.func @transform_2(%arg0: i32) -> (i32, i32) {
    %c0_i32 = arith.constant 0 : i32
    %c0_i32_0 = arith.constant 0 : i32
    %c0_i32_1 = arith.constant 0 : i32
    return %c0_i32, %c0_i32_0 : i32, i32
  }
  func.func @transform_3(%arg0: i32) -> (i32, i32, i32) {
    %c0_i32 = arith.constant 0 : i32
    %c0_i32_0 = arith.constant 0 : i32
    %c0_i32_1 = arith.constant 0 : i32
    %c0_i32_2 = arith.constant 0 : i32
    return %c0_i32, %c0_i32_0, %c0_i32_1 : i32, i32, i32
  }
  func.func @transform_4(%arg0: i32) -> (i32, i32) {
    %c0_i32 = arith.constant 0 : i32
    %c0_i32_0 = arith.constant 0 : i32
    %c0_i32_1 = arith.constant 0 : i32
    return %c0_i32, %c0_i32_0 : i32, i32
  }
  func.func @transform_5(%arg0: i32) -> (i32, i32) {
    %c0_i32 = arith.constant 0 : i32
    %c0_i32_0 = arith.constant 0 : i32
    %c0_i32_1 = arith.constant 0 : i32
    return %c0_i32, %c0_i32_0 : i32, i32
  }
  func.func @transform_6(%arg0: i32) -> (i32, i32) {
    %c0_i32 = arith.constant 0 : i32
    %c0_i32_0 = arith.constant 0 : i32
    %c0_i32_1 = arith.constant 0 : i32
    return %c0_i32, %c0_i32_0 : i32, i32
  }
  func.func @transform_7(%arg0: i32) -> (i32, i32) {
    %c0_i32 = arith.constant 0 : i32
    %c0_i32_0 = arith.constant 0 : i32
    %c0_i32_1 = arith.constant 0 : i32
    return %c0_i32, %c0_i32_0 : i32, i32
  }
  func.func @transform_8(%arg0: i32) -> (i32, i32) {
    %c0_i32 = arith.constant 0 : i32
    %c0_i32_0 = arith.constant 0 : i32
    %c0_i32_1 = arith.constant 0 : i32
    return %c0_i32, %c0_i32_0 : i32, i32
  }
  func.func @transform_9(%arg0: i32) -> (i32, i32) {
    %c0_i32 = arith.constant 0 : i32
    %c0_i32_0 = arith.constant 0 : i32
    %c0_i32_1 = arith.constant 0 : i32
    return %c0_i32, %c0_i32_0 : i32, i32
  }
  func.func @transform_10(%arg0: i32) -> (i32, i32) {
    %c0_i32 = arith.constant 0 : i32
    %c0_i32_0 = arith.constant 0 : i32
    %c0_i32_1 = arith.constant 0 : i32
    return %c0_i32, %c0_i32_0 : i32, i32
  }
  func.func @transform_11(%arg0: i32) -> (i32, i32) {
    %c0_i32 = arith.constant 0 : i32
    %c0_i32_0 = arith.constant 0 : i32
    %c0_i32_1 = arith.constant 0 : i32
    return %c0_i32, %c0_i32_0 : i32, i32
  }
  func.func @transform_12(%arg0: i32) -> (i32, i32) {
    %c0_i32 = arith.constant 0 : i32
    %c0_i32_0 = arith.constant 0 : i32
    %c0_i32_1 = arith.constant 0 : i32
    return %c0_i32, %c0_i32_0 : i32, i32
  }
  func.func @transform_13(%arg0: i32) -> (i32, i32) {
    %c0_i32 = arith.constant 0 : i32
    %c0_i32_0 = arith.constant 0 : i32
    %c0_i32_1 = arith.constant 0 : i32
    return %c0_i32, %c0_i32_0 : i32, i32
  }
  func.func @transform_14(%arg0: i32) -> (i32, i32) {
    %c0_i32 = arith.constant 0 : i32
    %c0_i32_0 = arith.constant 0 : i32
    %c0_i32_1 = arith.constant 0 : i32
    return %c0_i32, %c0_i32_0 : i32, i32
  }
  func.func @transform_15(%arg0: i32) -> (i32, i32, i32) {
    %c0_i32 = arith.constant 0 : i32
    %c0_i32_0 = arith.constant 0 : i32
    %c0_i32_1 = arith.constant 0 : i32
    return %arg0, %c0_i32, %c0_i32_0 : i32, i32, i32
  }
}

</mosaic_0001>

<bundles_post_ra>
// kernel: _lambda_.2
= control target key start
LH: loop header
LB: loop body
LE: loop exit
PB: predicated region body
PF: predicated region fallthrough
CT: control target
= control target key end

     0   :  { %s1399_s21 = smov 0   ;;  %s1889_s0 = inlined_call_operand.vmem [shape: f32[2,9,9,3], index: 0, kind: input, shape index: {}]   ;;  %s1890_s1 = inlined_call_operand.vmem [shape: f32[2,9,9,3], index: 1, kind: input, shape index: {}]   ;;  %s1891_s2 = inlined_call_operand.vmem [shape: f32[2,9,9,3], index: 2, kind: input, shape index: {}]   ;;  %s1892_s3 = inlined_call_operand.vmem [shape: f32[2,9,9,3], index: 3, kind: input, shape index: {}]   ;;  %s1893_s4 = inlined_call_operand.vmem [shape: bf16[32,128], index: 4, kind: input, shape index: {}]   ;;  %s1894_s5 = inlined_call_operand.vmem [shape: f32[1,128], index: 5, kind: input, shape index: {}]   ;;  %s1895_s6 = inlined_call_operand.vmem [shape: bf16[2,8,8,128], index: 6, kind: output, shape index: {}]  }
   0x1 LB: > { %s1073_s22 = sadd.s32 4294967295, %s1354_s21   ;;  %p1077_p0 = scmp.ge.s32.totalorder %s1354_s21, 1  ;;  %s1354_s21 = sphi %s1399_s21, %s16_s21  }
   0x2   : > { %p242_p1 = scmp.lt.s32.totalorder %s1354_s21, 3 }
   0x4   : > { %p243_p2 = pnand %p1077_p0, %p242_p1 }
   0x5   : > { %p287_p3 = scmp.lt.s32.totalorder (!%p243_p2), %s1073_s22, 1  ;;  %s1356_s9 = smov (!%p243_p2), 3  }
   0x6   : > { %246 = sbr.rel (%p243_p2) target bundleno = 393 (0x189), region = 44  ;;  %s1357_s13 = smov (!%p243_p2), 6  }
   0x7   : > { %s1358_s14 = smov (!%p243_p2), 9   ;;  %s1359_s15 = smov (!%p243_p2), 12  }
   0x8   : > { %s1360_s16 = smov (!%p243_p2), 15   ;;  %s1361_s17 = smov (!%p243_p2), 18  }
   0x9   : > { %s1362_s18 = smov (!%p243_p2), 21   ;;  %s1363_s19 = smov (!%p243_p2), 24  }
   0xb   : > { %s1913_s22 = smov (!%p287_p3, %s1073_s22), 1  ;;  %vm380_vm0 = vcmask 1046528   ;;  %vm659_vm1 = vcmask 23552   ;;  %vm668_vm2 = vcmask 48128   ;;  %vm677_vm3 = vcmask 72704  }
   0xc   : > { %s1410_s23 = smul.u32 144, %s1913_s22  ;;  %vm686_vm4 = vcmask 97280   ;;  %vm695_vm5 = vcmask 121856   ;;  %vm704_vm6 = vcmask 146432   ;;  %vm713_vm7 = vcmask 171008   ;;  %s1106_s28 = sshll.u32 %s1913_s22, 5 }
   0xd   : > { %vm722_vm8 = vcmask 195584   ;;  %vm731_vm9 = vcmask 220160   ;;  %vm764_vm10 = vcmask 261120   ;;  %s1845_s30 = scalar_lea.vmem %s1895_s6, %s1106_s28 }
   0xe   : > { %s1416_s26 = scalar_lea.vmem %s1890_s1, %s1410_s23  ;;  %s1428_s29 = scalar_lea.vmem %s1889_s0, %s1410_s23 }
   0xf   : > { %v1419_v0 = vld [vmem:[%s1416_s26 + $0x50] sm:$0xff]  ;;  %v1422_v1 = vld [vmem:[%s1416_s26 + $0x40] sm:$0xff]  ;;  %v324_v4 = vld [vmem:[%s1428_s29 + $0x58] sm:$0x1]  ;;  %s1447_s8 = scalar_lea.vmem %s1891_s2, %s1410_s23  ;;  %s1481_s12 = scalar_lea.vmem %s1892_s3, %s1410_s23 }
  0x10   : > { %v1155_v2 = vpack.i.bf16 %v1419_v0, %v1422_v1  ;;  %v1433_v3 = vld [vmem:[%s1428_s29 + $0x50] sm:$0xff]  ;;  %v1437_v5 = vld [vmem:[%s1428_s29 + $0x60] sm:$0xff]  ;;  %v397_v7 = vrot.slane %v324_v4, 1  ;;  %v326_v9 = vld [vmem:[%s1428_s29 + $0x68] sm:$0x1] }
  0x11   : > { %v396_v6 = vrot.slane %v1433_v3, 1  ;;  %v1441_v8 = vld [vmem:[%s1428_s29 + $0x40] sm:$0xff]  ;;  %v322_v10 = vld [vmem:[%s1428_s29 + $0x48] sm:$0x1]  ;;  %v1460_v15 = vld [vmem:[%s1416_s26 + $0x70] sm:$0xff]  ;;  %v399_v17 = vrot.slane %v1437_v5, 1  ;;  %v1205_v61 = vpack.i.bf16 %v1437_v5, %v1433_v3 }
  0x12   : > { %1156 = vrot.lane.b32.xlu0 %v1155_v2, %s1356_s9  ;;  %v393_v11 = vrot.slane %v1441_v8, 1  ;;  %v1454_v12 = vld [vmem:[%s1416_s26 + $0x60] sm:$0xff]  ;;  %v394_v14 = vrot.slane %v322_v10, 1  ;;  %v1463_v16 = vld [vmem:[%s1428_s29 + $0x70] sm:$0xff]  ;;  %v328_v18 = vld [vmem:[%s1428_s29 + $0x78] sm:$0x1] }
  0x13   : > { %v1457_v13 = vsel %vm380_vm0, %v396_v6, %v397_v7  ;;  %v400_v19 = vrot.slane %v326_v9, 1  ;;  %v402_v21 = vrot.slane %v1463_v16, 1  ;;  %v403_v22 = vrot.slane %v328_v18, 1  ;;  %v348_v23 = vld [vmem:[%s1447_s8 + $0x40] sm:$0xff]  ;;  %v350_v26 = vld [vmem:[%s1447_s8 + $0x50] sm:$0xff] }
  0x14   : > { %v1468_v20 = vsel %vm380_vm0, %v393_v11, %v394_v14  ;;  %v1160_v25 = vpack.i.bf16 %v1460_v15, %v1454_v12  ;;  %v1165_v27 = vpack.i.bf16 %v350_v26, %v348_v23  ;;  %v360_v30 = vld [vmem:[%s1481_s12 + $0x40] sm:$0xff]  ;;  %v361_v31 = vld [vmem:[%s1481_s12 + $0x50] sm:$0xff]  ;;  %v349_v33 = vld [vmem:[%s1447_s8 + $0x48] sm:$0x1]  ;;  %v436_v41 = vrot.slane %v350_v26, 1 }
  0x15   : > { %v1180_v24 = vpack.i.bf16 %v1457_v13, %v1468_v20  ;;  %v1485_v28 = vsel %vm380_vm0, %v399_v17, %v400_v19  ;;  %v1488_v29 = vsel %vm380_vm0, %v402_v21, %v403_v22  ;;  %v352_v32 = vld [vmem:[%s1447_s8 + $0x60] sm:$0xff]  ;;  %v351_v34 = vld [vmem:[%s1447_s8 + $0x58] sm:$0x1]  ;;  %v353_v36 = vld [vmem:[%s1447_s8 + $0x68] sm:$0x1]  ;;  %v1175_v39 = vpack.i.bf16 %v361_v31, %v360_v30 }
  0x16   : > { %1166 = vrot.lane.b32.xlu2 %v1165_v27, %s1358_s14  ;;  %v1185_v35 = vpack.i.bf16 %v1488_v29, %v1485_v28  ;;  %v354_v37 = vld [vmem:[%s1447_s8 + $0x70] sm:$0xff]  ;;  %v355_v38 = vld [vmem:[%s1447_s8 + $0x78] sm:$0x1]  ;;  %v433_v42 = vrot.slane %v348_v23, 1  ;;  %v434_v43 = vrot.slane %v349_v33, 1  ;;  %v437_v44 = vrot.slane %v351_v34, 1 }
  0x17   : > { %1181 = vrot.lane.b32.xlu1 %v1180_v24, %s1357_s13  ;;  %v1170_v40 = vpack.i.bf16 %v354_v37, %v352_v32  ;;  %v439_v45 = vrot.slane %v352_v32, 1  ;;  %v440_v46 = vrot.slane %v353_v36, 1  ;;  %v442_v47 = vrot.slane %v354_v37, 1  ;;  %v362_v49 = vld [vmem:[%s1481_s12 + $0x60] sm:$0xff]  ;;  %v363_v50 = vld [vmem:[%s1481_s12 + $0x70] sm:$0xff] }
  0x18   : > { %v443_v48 = vrot.slane %v355_v38, 1  ;;  %v435_v51 = vsel %vm380_vm0, %v433_v42, %v434_v43  ;;  %v438_v52 = vsel %vm380_vm0, %v436_v41, %v437_v44  ;;  %v1190_v55 = vpack.i.bf16 %v363_v50, %v362_v49  ;;  %v329_v58 = vld [vmem:[%s1428_s29 + $0x80] sm:$0xff]  ;;  %v1517_v60 = vld [vmem:[%s1416_s26 + $0x10] sm:$0xff]  ;;  %v320_v6 = vld [vmem:[%s1428_s29 + $0x38] sm:$0x1] }
  0x19   : > { %v441_v53 = vsel %vm380_vm0, %v439_v45, %v440_v46  ;;  %v1195_v56 = vpack.i.bf16 %v438_v52, %v435_v51  ;;  %v331_v59 = vld [vmem:[%s1416_s26] sm:$0xff]  ;;  %v1210_v62 = vpack.i.bf16 %v329_v58, %v1463_v16  ;;  %v1524_v2 = vld [vmem:[%s1416_s26 + $0x30] sm:$0xff]  ;;  %v314_v10 = vld [vmem:[%s1428_s29 + $0x8] sm:$0x1]  ;;  %v1225_v21 = vpack.i.bf16 %v1454_v12, %v1419_v0 }
  0x1a   : > { %1161 = vrot.lane.b32.xlu0 %v1160_v25, %s1356_s9  ;;  %v444_v54 = vsel %vm380_vm0, %v442_v47, %v443_v48  ;;  %v1215_v63 = vpack.i.bf16 %v1517_v60, %v331_v59  ;;  %v1527_v4 = vld [vmem:[%s1428_s29 + $0x30] sm:$0xff]  ;;  %v1532_v7 = vld [vmem:[%s1416_s26 + $0x20] sm:$0xff]  ;;  %v316_v14 = vld [vmem:[%s1428_s29 + $0x18] sm:$0x1]  ;;  %v382_v25 = vrot.slane %v314_v10, 1  ;;  %v391_v30 = vrot.slane %v320_v6, 1 }
  0x1b   : > { %v1200_v57 = vpack.i.bf16 %v444_v54, %v441_v53  ;;  %v1535_v9 = vld [vmem:[%s1428_s29] sm:$0xff]  ;;  %v1541_v11 = vld [vmem:[%s1428_s29 + $0x10] sm:$0xff]  ;;  %v318_v19 = vld [vmem:[%s1428_s29 + $0x28] sm:$0x1]  ;;  %v390_v22 = vrot.slane %v1527_v4, 1  ;;  %v1220_v23 = vpack.i.bf16 %v1524_v2, %v1532_v7  ;;  %v385_v27 = vrot.slane %v316_v14, 1 }
  0x1c   : > { %v339_v17 = vld [vmem:[%s1416_s26 + $0x80] sm:$0xff]  ;;  %v381_v24 = vrot.slane %v1535_v9, 1  ;;  %v384_v26 = vrot.slane %v1541_v11, 1  ;;  %v388_v33 = vrot.slane %v318_v19, 1  ;;  %v447_v37 = vrot.slane %v329_v58, 1  ;;  %v346_v43 = vld [vmem:[%s1447_s8 + $0x30] sm:$0xff] }
  0x1d   : > { %v1546_v18 = vld [vmem:[%s1428_s29 + $0x20] sm:$0xff]  ;;  %v1230_v31 = vpack.i.bf16 %v339_v17, %v1460_v15  ;;  %v1565_v34 = vsel %vm380_vm0, %v390_v22, %v391_v30  ;;  %v330_v15 = vld [vmem:[%s1428_s29 + $0x88] sm:$0x1]  ;;  %v357_v54 = vld [vmem:[%s1481_s12 + $0x10] sm:$0xff] }
  0x1e   : > { %1171 = vrot.lane.b32.xlu2 %v1170_v40, %s1358_s14  ;;  %v387_v32 = vrot.slane %v1546_v18, 1  ;;  %v383_v0 = vsel %vm380_vm0, %v381_v24, %v382_v25  ;;  %v1561_v12 = vsel %vm380_vm0, %v384_v26, %v385_v27  ;;  %v448_v38 = vrot.slane %v330_v15, 1  ;;  %v344_v42 = vld [vmem:[%s1447_s8 + $0x20] sm:$0xff]  ;;  %v341_v46 = vld [vmem:[%s1447_s8 + $0x8] sm:$0x1] }
  0x1f   : > { %1186 = vrot.lane.b32.xlu1 %v1185_v35, %s1357_s13  ;;  %v1235_v36 = vpack.i.bf16 %v1561_v12, %v383_v0  ;;  %v1245_v40 = vpack.i.bf16 %v1485_v28, %v1457_v13  ;;  %v340_v44 = vld [vmem:[%s1447_s8] sm:$0xff]  ;;  %v342_v13 = vld [vmem:[%s1447_s8 + $0x10] sm:$0xff]  ;;  %v343_v28 = vld [vmem:[%s1447_s8 + $0x18] sm:$0x1]  ;;  %v1260_v48 = vpack.i.bf16 %v346_v43, %v344_v42  ;;  %v422_v50 = vrot.slane %v341_v46, 1 }
  0x20   : > { %v389_v35 = vsel %vm380_vm0, %v387_v32, %v388_v33  ;;  %v449_v41 = vsel %vm380_vm0, %v447_v37, %v448_v38  ;;  %v1255_v47 = vpack.i.bf16 %v342_v13, %v340_v44  ;;  %v421_v49 = vrot.slane %v340_v44, 1  ;;  %v356_v53 = vld [vmem:[%s1481_s12] sm:$0xff] }
  0x21   : > { %v1250_v45 = vpack.i.bf16 %v449_v41, %v1488_v29  ;;  %v424_v51 = vrot.slane %v342_v13, 1  ;;  %v425_v52 = vrot.slane %v343_v28, 1  ;;  %v347_v29 = vld [vmem:[%s1447_s8 + $0x38] sm:$0x1]  ;;  %v1290_v24 = vpack.i.bf16 %v1441_v8, %v1527_v4 }
  0x22   : > { %1176 = vrot.lane.b32.xlu0 %v1175_v39, %s1359_s15  ;;  %v1240_v39 = vpack.i.bf16 %v1565_v34, %v389_v35  ;;  %v423_v58 = vsel %vm380_vm0, %v421_v49, %v422_v50  ;;  %v431_v10 = vrot.slane %v347_v29, 1  ;;  %v1295_v25 = vpack.i.bf16 %v1532_v7, %v1517_v60 }
  0x23   : > { %v426_v59 = vsel %vm380_vm0, %v424_v51, %v425_v52  ;;  %v1300_v26 = vpack.i.bf16 %v1422_v1, %v1524_v2  ;;  %v1305_v27 = vpack.i.bf16 %v389_v35, %v1561_v12  ;;  %v1310_v30 = vpack.i.bf16 %v1468_v20, %v1565_v34  ;;  %v1108_v12 = vld [vmem:[%s1893_s4 + $0x8] sm:$0xff]  ;;  %v1107_v34 = vld [vmem:[%s1893_s4] sm:$0xff] }
  0x24   : > { %v1275_v17 = vpack.i.bf16 %v426_v59, %v423_v58  ;;  %1133 = vmatpush.bf16.msra.mxu2 %v1108_v12  ;;  %1134 = vmatpush.bf16.msra.mxu3 %v1108_v12 }
  0x25   : > { %783 = vmatpush.bf16.msra.mxu0 %v1108_v12  ;;  %1132 = vmatpush.bf16.msra.mxu1 %v1108_v12 }
  0x26   : > { %1196 = vrot.lane.b32.xlu2 %v1195_v56, %s1360_s16  ;;  %v358_v56 = vld [vmem:[%s1481_s12 + $0x20] sm:$0xff] }
  0x27   : > { %1191 = vrot.lane.b32.xlu1 %v1190_v55, %s1359_s15  ;;  %v345_v55 = vld [vmem:[%s1447_s8 + $0x28] sm:$0x1] }
  0x28   : > { %v428_v6 = vrot.slane %v345_v55, 1  ;;  %1136 = vmatpush.bf16.msra.mxu2 %v1107_v34  ;;  %1137 = vmatpush.bf16.msra.mxu3 %v1107_v34 }
  0x29   : > { %784 = vmatpush.bf16.msra.mxu0 %v1107_v34  ;;  %1135 = vmatpush.bf16.msra.mxu1 %v1107_v34 }
  0x2a   : > { %1201 = vrot.lane.b32.xlu0 %v1200_v57, %s1360_s16  ;;  %v359_v57 = vld [vmem:[%s1481_s12 + $0x30] sm:$0xff] }
  0x2b   : > { %v1270_v14 = vpack.i.bf16 %v359_v57, %v358_v56 }
  0x2e   : > { %1211 = vrot.lane.b32.xlu2 %v1210_v62, %s1361_s17  ;;  %v1265_v62 = vpack.i.bf16 %v357_v54, %v356_v53 }
  0x2f   : > { %1206 = vrot.lane.b32.xlu1 %v1205_v61, %s1361_s17  ;;  %v430_v61 = vrot.slane %v346_v43, 1 }
  0x32   : > { %1216 = vrot.lane.b32.xlu0 %v1215_v63, %s1356_s9  ;;  %v427_v63 = vrot.slane %v344_v42, 1 }
  0x34   : > { %v429_v19 = vsel %vm380_vm0, %v427_v63, %v428_v6 }
  0x36   : > { %1226 = vrot.lane.b32.xlu2 %v1225_v21, %s1362_s18  ;;  %v432_v21 = vsel %vm380_vm0, %v430_v61, %v431_v10 }
  0x37   : > { %1221 = vrot.lane.b32.xlu1 %v1220_v23, %s1356_s9  ;;  %v1280_v22 = vpack.i.bf16 %v432_v21, %v429_v19  ;;  %v1285_v23 = vpack.i.bf16 %v1546_v18, %v1541_v11 }
  0x3a   : > { %1231 = vrot.lane.b32.xlu0 %v1230_v31, %s1362_s18 }
  0x3e   : > { %1241 = vrot.lane.b32.xlu2 %v1240_v39, %s1357_s13 }
  0x3f   : > { %1236 = vrot.lane.b32.xlu1 %v1235_v36, %s1357_s13 }
  0x42   : > { %1246 = vrot.lane.b32.xlu0 %v1245_v40, %s1363_s19 }
  0x46   : > { %1256 = vrot.lane.b32.xlu2 %v1255_v47, %s1358_s14 }
  0x47   : > { %1251 = vrot.lane.b32.xlu1 %v1250_v45, %s1363_s19 }
  0x4a   : > { %1261 = vrot.lane.b32.xlu0 %v1260_v48, %s1358_s14 }
  0x4e   : > { %1271 = vrot.lane.b32.xlu2 %v1270_v14, %s1359_s15 }
  0x4f   : > { %1266 = vrot.lane.b32.xlu1 %v1265_v62, %s1359_s15 }
  0x52   : > { %1276 = vrot.lane.b32.xlu0 %v1275_v17, %s1360_s16 }
  0x56   : > { %1286 = vrot.lane.b32.xlu2 %v1285_v23, %s1361_s17 }
  0x57   : > { %1281 = vrot.lane.b32.xlu1 %v1280_v22, %s1360_s16 }
  0x5a   : > { %1291 = vrot.lane.b32.xlu0 %v1290_v24, %s1361_s17 }
  0x5e   : > { %1301 = vrot.lane.b32.xlu2 %v1300_v26, %s1362_s18 }
  0x5f   : > { %1296 = vrot.lane.b32.xlu1 %v1295_v25, %s1362_s18 }
  0x62   : > { %1306 = vrot.lane.b32.xlu0 %v1305_v27, %s1363_s19 }
  0x67   : > { %1311 = vrot.lane.b32.xlu1 %v1310_v30, %s1363_s19 }
  0x70   : > { %v1167_v31 = vpop.permute.xlu2 %1166 }
  0x71   : > { %v1169_v45 = vunpack.i.h.bf16 %v1167_v31  ;;  %v1168_v46 = vunpack.i.l.bf16 %v1167_v31 }
  0x78   : > { %v1619_v33 = vpop.permute.xlu2 %1171 }
  0x79   : > { %v1174_v52 = vunpack.i.h.bf16 %v1619_v33  ;;  %v1173_v10 = vunpack.i.l.bf16 %v1619_v33 }
  0x80   : > { %v1621_v1 = vpop.permute.xlu2 %1196 }
  0x81   : > { %v1199_v54 = vunpack.i.h.bf16 %v1621_v1  ;;  %v1198_v55 = vunpack.i.l.bf16 %v1621_v1 }
  0x84   : > { %v1157_v32 = vpop.permute.xlu0 %1156 }
  0x85   : > { %v1159_v38 = vunpack.i.h.bf16 %v1157_v32  ;;  %v1158_v39 = vunpack.i.l.bf16 %v1157_v32 }
  0x87   : > { %v664_v43 = vsel %vm659_vm1, %v1441_v8, %v1158_v39  ;;  %v665_v44 = vsel %vm659_vm1, %v1433_v3, %v1159_v38 }
  0x88   : > { %v1626_v20 = vpop.permute.xlu2 %1211 }
  0x89   : > { %v1182_v60 = vpop.permute.xlu1 %1181  ;;  %v1214_v14 = vunpack.i.h.bf16 %v1626_v20 }
  0x8a   : > { %v1184_v41 = vunpack.i.h.bf16 %v1182_v60  ;;  %v1183_v42 = vunpack.i.l.bf16 %v1182_v60  ;;  %v1213_v60 = vunpack.i.l.bf16 %v1626_v20 }
  0x8c   : > { %v1162_v7 = vpop.permute.xlu0 %1161  ;;  %v674_v48 = vsel %vm668_vm2, %v665_v44, %v1184_v41  ;;  %v673_v49 = vsel %vm668_vm2, %v664_v43, %v1183_v42 }
  0x8d   : > { %v1164_v13 = vunpack.i.h.bf16 %v1162_v7  ;;  %v1163_v28 = vunpack.i.l.bf16 %v1162_v7  ;;  %v682_v58 = vsel %vm677_vm3, %v673_v49, %v1168_v46  ;;  %v683_v59 = vsel %vm677_vm3, %v674_v48, %v1169_v45 }
  0x8f   : > { %v666_v56 = vsel %vm659_vm1, %v1437_v5, %v1163_v28  ;;  %v667_v57 = vsel %vm659_vm1, %v1463_v16, %v1164_v13 }
  0x90   : > { %v1635_v37 = vpop.permute.xlu2 %1226 }
  0x91   : > { %v1187_v2 = vpop.permute.xlu1 %1186  ;;  %v1229_v17 = vunpack.i.h.bf16 %v1635_v37  ;;  %v1228_v19 = vunpack.i.l.bf16 %v1635_v37 }
  0x92   : > { %v1189_v3 = vunpack.i.h.bf16 %v1187_v2  ;;  %v1188_v53 = vunpack.i.l.bf16 %v1187_v2 }
  0x94   : > { %v1177_v0 = vpop.permute.xlu0 %1176  ;;  %v676_v5 = vsel %vm668_vm2, %v667_v57, %v1189_v3  ;;  %v675_v16 = vsel %vm668_vm2, %v666_v56, %v1188_v53 }
  0x95   : > { %v1179_v50 = vunpack.i.h.bf16 %v1177_v0  ;;  %v1178_v51 = vunpack.i.l.bf16 %v1177_v0  ;;  %v684_v32 = vsel %vm677_vm3, %v675_v16, %v1173_v10  ;;  %v685_v33 = vsel %vm677_vm3, %v676_v5, %v1174_v52 }
  0x97   : > { %v691_v61 = vsel %vm686_vm4, %v682_v58, %v1178_v51  ;;  %v692_v62 = vsel %vm686_vm4, %v683_v59, %v1179_v50 }
  0x98   : > { %v1652_v29 = vpop.permute.xlu2 %1241  ;;  %v700_v23 = vsel %vm695_vm5, %v691_v61, %v1198_v55  ;;  %v701_v24 = vsel %vm695_vm5, %v692_v62, %v1199_v54 }
  0x99   : > { %v1631_v15 = vpop.permute.xlu1 %1191 }
  0x9a   : > { %v1194_v21 = vunpack.i.h.bf16 %v1631_v15  ;;  %v1193_v22 = vunpack.i.l.bf16 %v1631_v15 }
  0x9c   : > { %v1633_v35 = vpop.permute.xlu0 %1201  ;;  %v693_v0 = vsel %vm686_vm4, %v684_v32, %v1193_v22  ;;  %v694_v12 = vsel %vm686_vm4, %v685_v33, %v1194_v21 }
  0x9d   : > { %v1204_v26 = vunpack.i.h.bf16 %v1633_v35  ;;  %v1203_v27 = vunpack.i.l.bf16 %v1633_v35 }
  0x9f   : > { %v702_v35 = vsel %vm695_vm5, %v693_v0, %v1203_v27  ;;  %v1244_v27 = vunpack.i.h.bf16 %v1652_v29 }
  0xa0   : > { %v1257_v37 = vpop.permute.xlu2 %1256  ;;  %v711_v46 = vsel %vm704_vm6, %v702_v35, %v1213_v60 }
  0xa1   : > { %v1207_v36 = vpop.permute.xlu1 %1206 }
  0xa2   : > { %v1209_v63 = vunpack.i.h.bf16 %v1207_v36  ;;  %v1208_v6 = vunpack.i.l.bf16 %v1207_v36  ;;  %v703_v36 = vsel %vm695_vm5, %v694_v12, %v1204_v26 }
  0xa3   : > { %v712_v13 = vsel %vm704_vm6, %v703_v36, %v1214_v14 }
  0xa4   : > { %v1637_v40 = vpop.permute.xlu0 %1216  ;;  %v709_v30 = vsel %vm704_vm6, %v700_v23, %v1208_v6  ;;  %v710_v31 = vsel %vm704_vm6, %v701_v24, %v1209_v63 }
  0xa5   : > { %v718_v34 = vsel %vm713_vm7, %v709_v30, %v1228_v19  ;;  %v719_v15 = vsel %vm713_vm7, %v710_v31, %v1229_v17  ;;  %v1219_v58 = vunpack.i.h.bf16 %v1637_v40  ;;  %v1218_v59 = vunpack.i.l.bf16 %v1637_v40 }
  0xa6   : > { %v1259_v17 = vunpack.i.h.bf16 %v1257_v37  ;;  %v1258_v19 = vunpack.i.l.bf16 %v1257_v37 }
  0xa7   : > { %v660_v5 = vsel %vm659_vm1, %v1535_v9, %v1218_v59  ;;  %v661_v16 = vsel %vm659_vm1, %v1541_v11, %v1219_v58  ;;  %v1243_v11 = vunpack.i.l.bf16 %v1652_v29 }
  0xa8   : > { %v1700_v54 = vpop.permute.xlu2 %1271 }
  0xa9   : > { %v1643_v47 = vpop.permute.xlu1 %1221  ;;  %v1274_v12 = vunpack.i.h.bf16 %v1700_v54 }
  0xaa   : > { %v1224_v6 = vunpack.i.h.bf16 %v1643_v47  ;;  %v1223_v10 = vunpack.i.l.bf16 %v1643_v47 }
  0xac   : > { %v1648_v8 = vpop.permute.xlu0 %1231  ;;  %v662_v47 = vsel %vm659_vm1, %v1546_v18, %v1223_v10  ;;  %v663_v9 = vsel %vm659_vm1, %v1527_v4, %v1224_v6 }
  0xad   : > { %v1234_v39 = vunpack.i.h.bf16 %v1648_v8  ;;  %v1233_v41 = vunpack.i.l.bf16 %v1648_v8  ;;  %v672_v0 = vsel %vm668_vm2, %v663_v9, %v1244_v27  ;;  %v671_v29 = vsel %vm668_vm2, %v662_v47, %v1243_v11 }
  0xaf   : > { %v720_v49 = vsel %vm713_vm7, %v711_v46, %v1233_v41  ;;  %v721_v50 = vsel %vm713_vm7, %v712_v13, %v1234_v39 }
  0xb0   : > { %v1287_v63 = vpop.permute.xlu2 %1286 }
  0xb1   : > { %v1237_v25 = vpop.permute.xlu1 %1236 }
  0xb2   : > { %v1239_v61 = vunpack.i.h.bf16 %v1237_v25  ;;  %v1238_v62 = vunpack.i.l.bf16 %v1237_v25 }
  0xb4   : > { %v1247_v7 = vpop.permute.xlu0 %1246  ;;  %v670_v21 = vsel %vm668_vm2, %v661_v16, %v1239_v61  ;;  %v669_v40 = vsel %vm668_vm2, %v660_v5, %v1238_v62 }
  0xb5   : > { %v1249_v1 = vunpack.i.h.bf16 %v1247_v7  ;;  %v1248_v2 = vunpack.i.l.bf16 %v1247_v7  ;;  %v678_v30 = vsel %vm677_vm3, %v669_v40, %v1258_v19  ;;  %v679_v31 = vsel %vm677_vm3, %v670_v21, %v1259_v17  ;;  %v1756_v40 = vld [vmem:[%s1894_s5] ss:$0 sm:$0xff] }
  0xb7   : > { %v727_v20 = vsel %vm722_vm8, %v718_v34, %v1248_v2  ;;  %v728_v38 = vsel %vm722_vm8, %v719_v15, %v1249_v1  ;;  %v1289_v1 = vunpack.i.h.bf16 %v1287_v63  ;;  %v1288_v2 = vunpack.i.l.bf16 %v1287_v63 }
  0xb8   : > { %v736_v42 = vsel %vm731_vm9, %v727_v20, 0.0  ;;  %v737_v43 = vsel %vm731_vm9, %v728_v38, 0.0  ;;  %v1273_v34 = vunpack.i.l.bf16 %v1700_v54  ;;  %v1302_v37 = vpop.permute.xlu2 %1301 }
  0xb9   : > { %v742_v44 = vpack.c.bf16 %v737_v43, %v736_v42  ;;  %v1252_v45 = vpop.permute.xlu1 %1251 }
  0xba   : > { %v1254_v28 = vunpack.i.h.bf16 %v1252_v45  ;;  %v1253_v48 = vunpack.i.l.bf16 %v1252_v45 }
  0xbb   : > { %1094 = vmatmul.msk.bf16.vlgmr.msra.gmra.mxu2 %vm764_vm10, %v742_v44 }
  0xbc   : > { %v1262_v51 = vpop.permute.xlu0 %1261  ;;  %v729_v52 = vsel %vm722_vm8, %v720_v49, %v1253_v48  ;;  %v730_v8 = vsel %vm722_vm8, %v721_v50, %v1254_v28  ;;  %v1304_v48 = vunpack.i.h.bf16 %v1302_v37  ;;  %v1303_v49 = vunpack.i.l.bf16 %v1302_v37 }
  0xbd   : > { %v738_v3 = vsel %vm731_vm9, %v729_v52, 0.0  ;;  %v739_v53 = vsel %vm731_vm9, %v730_v8, 0.0  ;;  %v1264_v32 = vunpack.i.h.bf16 %v1262_v51  ;;  %v1263_v33 = vunpack.i.l.bf16 %v1262_v51 }
  0xbe   : > { %v743_v55 = vpack.c.bf16 %v739_v53, %v738_v3 }
  0xbf   : > { %v680_v35 = vsel %vm677_vm3, %v671_v29, %v1263_v33  ;;  %v681_v36 = vsel %vm677_vm3, %v672_v0, %v1264_v32 }
  0xc0   : > { %1095 = vmatmul.msk.bf16.vlgmr.msra.gmra.mxu3 %vm764_vm10, %v743_v55  ;;  %v689_v52 = vsel %vm686_vm4, %v680_v35, %v1273_v34  ;;  %v690_v8 = vsel %vm686_vm4, %v681_v36, %v1274_v12 }
  0xc1   : > { %v1267_v56 = vpop.permute.xlu1 %1266 }
  0xc2   : > { %v1269_v22 = vunpack.i.h.bf16 %v1267_v56  ;;  %v1268_v23 = vunpack.i.l.bf16 %v1267_v56 }
  0xc4   : > { %v1277_v57 = vpop.permute.xlu0 %1276  ;;  %v687_v60 = vsel %vm686_vm4, %v678_v30, %v1268_v23  ;;  %v688_v7 = vsel %vm686_vm4, %v679_v31, %v1269_v22 }
  0xc5   : > { %v1279_v25 = vunpack.i.h.bf16 %v1277_v57  ;;  %v1278_v26 = vunpack.i.l.bf16 %v1277_v57 }
  0xc7   : > { %v696_v18 = vsel %vm695_vm5, %v687_v60, %v1278_v26  ;;  %v697_v4 = vsel %vm695_vm5, %v688_v7, %v1279_v25 }
  0xc8   : > { %v705_v39 = vsel %vm704_vm6, %v696_v18, %v1288_v2  ;;  %v706_v41 = vsel %vm704_vm6, %v697_v4, %v1289_v1 }
  0xc9   : > { %v1282_v14 = vpop.permute.xlu1 %1281 }
  0xca   : > { %v1284_v42 = vunpack.i.h.bf16 %v1282_v14  ;;  %v1283_v43 = vunpack.i.l.bf16 %v1282_v14 }
  0xcc   : > { %v1292_v24 = vpop.permute.xlu0 %1291  ;;  %v699_v54 = vsel %vm695_vm5, %v690_v8, %v1284_v42  ;;  %v698_v55 = vsel %vm695_vm5, %v689_v52, %v1283_v43 }
  0xcd   : > { %v1294_v45 = vunpack.i.h.bf16 %v1292_v24  ;;  %v1293_v46 = vunpack.i.l.bf16 %v1292_v24 }
  0xcf   : > { %v707_v58 = vsel %vm704_vm6, %v698_v55, %v1293_v46  ;;  %v708_v59 = vsel %vm704_vm6, %v699_v54, %v1294_v45 }
  0xd0   : > { %v716_v10 = vsel %vm713_vm7, %v707_v58, %v1303_v49  ;;  %v717_v14 = vsel %vm713_vm7, %v708_v59, %v1304_v48 }
  0xd1   : > { %v1297_v15 = vpop.permute.xlu1 %1296 }
  0xd2   : > { %v1299_v20 = vunpack.i.h.bf16 %v1297_v15  ;;  %v1298_v38 = vunpack.i.l.bf16 %v1297_v15 }
  0xd4   : > { %v1307_v44 = vpop.permute.xlu0 %1306  ;;  %v714_v50 = vsel %vm713_vm7, %v705_v39, %v1298_v38  ;;  %v715_v51 = vsel %vm713_vm7, %v706_v41, %v1299_v20 }
  0xd5   : > { %v1309_v13 = vunpack.i.h.bf16 %v1307_v44  ;;  %v1308_v28 = vunpack.i.l.bf16 %v1307_v44 }
  0xd7   : > { %v723_v3 = vsel %vm722_vm8, %v714_v50, %v1308_v28  ;;  %v724_v53 = vsel %vm722_vm8, %v715_v51, %v1309_v13 }
  0xd8   : > { %v732_v56 = vsel %vm731_vm9, %v723_v3, 0.0  ;;  %v733_v57 = vsel %vm731_vm9, %v724_v53, 0.0 }
  0xd9   : > { %v740_v61 = vpack.c.bf16 %v733_v57, %v732_v56  ;;  %v1312_v62 = vpop.permute.xlu1 %1311 }
  0xda   : > { %v1314_v63 = vunpack.i.h.bf16 %v1312_v62  ;;  %v1313_v6 = vunpack.i.l.bf16 %v1312_v62 }
  0xdb   : > { %1092 = vmatmul.msk.bf16.vlgmr.msra.gmra.mxu0 %vm764_vm10, %v740_v61 }
  0xdc   : > { %v725_v5 = vsel %vm722_vm8, %v716_v10, %v1313_v6  ;;  %v726_v16 = vsel %vm722_vm8, %v717_v14, %v1314_v63 }
  0xdd   : > { %v734_v17 = vsel %vm731_vm9, %v725_v5, 0.0  ;;  %v735_v19 = vsel %vm731_vm9, %v726_v16, 0.0 }
  0xde   : > { %v741_v21 = vpack.c.bf16 %v735_v19, %v734_v17 }
  0xe0   : > { %1093 = vmatmul.msk.bf16.vlgmr.msra.gmra.mxu1 %vm764_vm10, %v741_v21 }
 0x13e   : > { %v796_v22 = vpop.f32.mrf.mxu2 }
 0x13f   : > { %v1759_v23 = vadd.f32 %v1756_v40, %v796_v22 }
 0x141   : > { %v1100_v24 = vmul.f32 -1.442695, %v1759_v23 }
 0x143   : > { %1316 = vpow2.f32 %v1100_v24  ;;  %v801_v25 = vpop.f32.mrf.mxu3 }
 0x144   : > { %v1763_v26 = vadd.f32 %v1756_v40, %v801_v25 }
 0x146   : > { %v798_v47 = vpop.f32.mrf.mxu2  ;;  %v1102_v9 = vmul.f32 -1.442695, %v1763_v26 }
 0x147   : > { %v1767_v27 = vadd.f32 %v1756_v40, %v798_v47 }
 0x148   : > { %1318 = vpow2.f32 %v1102_v9 }
 0x149   : > { %v1317_v11 = vpop.eup %1316  ;;  %v1101_v30 = vmul.f32 -1.442695, %v1767_v27 }
 0x14a   : > { %v834_v31 = vadd.f32 1.0, %v1317_v11 }
 0x14b   : > { %1320 = vpow2.f32 %v1101_v30  ;;  %v803_v32 = vpop.f32.mrf.mxu3 }
 0x14c   : > { %1322 = vrcp.f32 %v834_v31  ;;  %v1771_v33 = vadd.f32 %v1756_v40, %v803_v32  ;;  %v907_v37 = vand.u32 2147483647, %v834_v31  ;;  %v909_v39 = vand.u32 2147483648, %v834_v31 }
 0x14d   : > { %vm903_vm12 = vweird.f32 %v834_v31 }
 0x14e   : > { %v1319_v60 = vpop.eup %1318  ;;  %v1103_v7 = vmul.f32 -1.442695, %v1771_v33  ;;  %vm1789_vm13 = vcmp.eq.f32.partialorder %v907_v37, 8.507059e+37  ;;  %v910_v48 = vor.u32 1.1754944e-38, %v909_v39 }
 0x14f   : > { %v1774_v1 = vadd.f32 1.0, %v1319_v60 }
 0x150   : > { %1324 = vpow2.f32 %v1103_v7 }
 0x151   : > { %v1321_v2 = vpop.eup %1320  ;;  %1326 = vrcp.f32 %v1774_v1  ;;  %v937_v43 = vand.u32 2147483647, %v1774_v1  ;;  %vm933_vm15 = vweird.f32 %v1774_v1  ;;  %v939_v53 = vand.u32 2147483648, %v1774_v1 }
 0x152   : > { %v1323_v18 = vpop.eup %1322  ;;  %v835_v0 = vadd.f32 1.0, %v1321_v2 }
 0x153   : > { %v899_v4 = vmul.f32 %v1323_v18, %v834_v31  ;;  %vm904_vm11 = vweird.f32 %v1323_v18  ;;  %vm1799_vm0 = vcmp.eq.f32.partialorder %v937_v43, 8.507059e+37  ;;  %v940_v32 = vor.u32 1.1754944e-38, %v939_v53 }
 0x154   : > { %1328 = vrcp.f32 %v835_v0  ;;  %v922_v50 = vand.u32 2147483647, %v835_v0  ;;  %v924_v51 = vand.u32 2147483648, %v835_v0  ;;  %vm1794_vm14 = vmor %vm903_vm12, %vm904_vm11  ;;  %vm918_vm1 = vweird.f32 %v835_v0 }
 0x155   : > { %v900_v29 = vsub.f32 1.0, %v899_v4 }
 0x156   : > { %v1325_v12 = vpop.eup %1324  ;;  %vm1813_vm4 = vcmp.eq.f32.partialorder %v922_v50, 8.507059e+37  ;;  %v925_v10 = vor.u32 1.1754944e-38, %v924_v51 }
 0x157   : > { %v1777_v34 = vpop.eup %1326  ;;  %v901_v15 = vmul.f32 %v1323_v18, %v900_v29  ;;  %v1779_v35 = vadd.f32 1.0, %v1325_v12 }
 0x158   : > { %v786_v36 = vpop.f32.mrf.mxu0  ;;  %v929_v20 = vmul.f32 %v1777_v34, %v1774_v1  ;;  %vm934_vm3 = vweird.f32 %v1777_v34 }
 0x159   : > { %v1784_v38 = vadd.f32 %v1756_v40, %v786_v36  ;;  %1330 = vrcp.f32 %v1779_v35  ;;  %v902_v45 = vadd.f32 %v1323_v18, %v901_v15  ;;  %v952_v19 = vand.u32 2147483647, %v1779_v35  ;;  %vm1825_vm6 = vmor %vm933_vm15, %vm934_vm3 }
 0x15a   : > { %v1329_v41 = vpop.eup %1328  ;;  %v930_v42 = vsub.f32 1.0, %v929_v20  ;;  %v954_v24 = vand.u32 2147483648, %v1779_v35  ;;  %vm948_vm8 = vweird.f32 %v1779_v35 }
 0x15b   : > { %v1096_v44 = vmul.f32 -1.442695, %v1784_v38  ;;  %v914_v46 = vmul.f32 %v1329_v41, %v835_v0  ;;  %v906_v56 = vsel %vm1794_vm14, %v1323_v18, %v902_v45  ;;  %vm919_vm2 = vweird.f32 %v1329_v41 }
 0x15c   : > { %v931_v28 = vmul.f32 %v1777_v34, %v930_v42  ;;  %v911_v16 = vsel %vm1789_vm13, %v910_v48, %v906_v56  ;;  %vm920_vm5 = vmor %vm918_vm1, %vm919_vm2  ;;  %v955_v18 = vor.u32 1.1754944e-38, %v954_v24  ;;  %vm953_vm10 = vcmp.eq.f32.partialorder %v952_v19, 8.507059e+37 }
 0x15d   : > { %1332 = vpow2.f32 %v1096_v44  ;;  %v915_v49 = vsub.f32 1.0, %v914_v46  ;;  %v791_v52 = vpop.f32.mrf.mxu1  ;;  %v962_v31 = vmul.f32 %v911_v16, %v1759_v23 }
 0x15e   : > { %v1805_v54 = vadd.f32 %v1756_v40, %v791_v52  ;;  %v932_v59 = vadd.f32 %v1777_v34, %v931_v28 }
 0x15f   : > { %v1331_v55 = vpop.eup %1330  ;;  %v916_v57 = vmul.f32 %v1329_v41, %v915_v49 }
 0x160   : > { %v788_v58 = vpop.f32.mrf.mxu0  ;;  %v944_v61 = vmul.f32 %v1331_v55, %v1779_v35  ;;  %v1098_v62 = vmul.f32 -1.442695, %v1805_v54  ;;  %v936_v9 = vsel %vm1825_vm6, %v1777_v34, %v932_v59  ;;  %vm949_vm7 = vweird.f32 %v1331_v55 }
 0x161   : > { %v917_v63 = vadd.f32 %v1329_v41, %v916_v57  ;;  %v1818_v14 = vadd.f32 %v1756_v40, %v788_v58  ;;  %v941_v23 = vsel %vm1799_vm0, %v940_v32, %v936_v9  ;;  %vm950_vm9 = vmor %vm948_vm8, %vm949_vm7 }
 0x162   : > { %v945_v17 = vsub.f32 1.0, %v944_v61  ;;  %1334 = vpow2.f32 %v1098_v62  ;;  %v964_v15 = vmul.f32 %v941_v23, %v1763_v26 }
 0x163   : > { %v1333_v5 = vpop.eup %1332  ;;  %v921_v22 = vsel %vm920_vm5, %v1329_v41, %v917_v63  ;;  %v1097_v47 = vmul.f32 -1.442695, %v1818_v14 }
 0x164   : > { %v1831_v25 = vadd.f32 1.0, %v1333_v5  ;;  %v926_v11 = vsel %vm1813_vm4, %v925_v10, %v921_v22  ;;  %v946_v30 = vmul.f32 %v1331_v55, %v945_v17 }
 0x165   : > { %v963_v60 = vmul.f32 %v926_v11, %v1767_v27  ;;  %v793_v7 = vpop.f32.mrf.mxu1 }
 0x166   : > { %1336 = vrcp.f32 %v1831_v25  ;;  %v947_v1 = vadd.f32 %v1331_v55, %v946_v30  ;;  %v1849_v2 = vadd.f32 %v1756_v40, %v793_v7  ;;  %v847_v28 = vand.u32 2147483647, %v1831_v25 }
 0x167   : > { %1338 = vpow2.f32 %v1097_v47  ;;  %v1122_v27 = vpack.c.bf16 %v963_v60, %v962_v31  ;;  %vm843_vm12 = vweird.f32 %v1831_v25  ;;  %v849_v50 = vand.u32 2147483648, %v1831_v25 }
 0x168   : > { %v1335_v4 = vpop.eup %1334  ;;  %v951_v0 = vsel %vm950_vm9, %v1331_v55, %v947_v1  ;;  %v1099_v29 = vmul.f32 -1.442695, %v1849_v2  ;;  %vm1868_vm14 = vcmp.eq.f32.partialorder %v847_v28, 8.507059e+37 }
 0x169   : > { %1130 = vst [vmem:[%s1845_s30 + $0x10] sm:$0xff] %v1122_v27   ;;  %v956_v12 = vsel %vm953_vm10, %v955_v18, %v951_v0  ;;  %v832_v34 = vadd.f32 1.0, %v1335_v4  ;;  %v850_v61 = vor.u32 1.1754944e-38, %v849_v50 }
 0x16a   : > { %v965_v40 = vmul.f32 %v956_v12, %v1771_v33  ;;  %1340 = vpow2.f32 %v1099_v29 }
 0x16b   : > { %1342 = vrcp.f32 %v832_v34  ;;  %vm873_vm1 = vweird.f32 %v832_v34  ;;  %v877_v62 = vand.u32 2147483647, %v832_v34  ;;  %v879_v63 = vand.u32 2147483648, %v832_v34 }
 0x16c   : > { %v1337_v35 = vpop.eup %1336  ;;  %v1127_v37 = vpack.c.bf16 %v965_v40, %v964_v15 }
 0x16d   : > { %v1339_v36 = vpop.eup %1338  ;;  %v839_v20 = vmul.f32 %v1337_v35, %v1831_v25  ;;  %vm844_vm11 = vweird.f32 %v1337_v35  ;;  %vm878_vm7 = vcmp.eq.f32.partialorder %v877_v62, 8.507059e+37  ;;  %v880_v47 = vor.u32 1.1754944e-38, %v879_v63 }
 0x16e   : > { %v831_v39 = vadd.f32 1.0, %v1339_v36  ;;  %1131 = vst [vmem:[%s1845_s30 + $0x18] sm:$0xff] %v1127_v37   ;;  %vm1862_vm13 = vmor %vm843_vm12, %vm844_vm11 }
 0x16f   : > { %v840_v41 = vsub.f32 1.0, %v839_v20 }
 0x170   : > { %1344 = vrcp.f32 %v831_v39  ;;  %v1341_v42 = vpop.eup %1340  ;;  %v862_v8 = vand.u32 2147483647, %v831_v39  ;;  %v864_v56 = vand.u32 2147483648, %v831_v39  ;;  %vm858_vm3 = vweird.f32 %v831_v39 }
 0x171   : > { %v1343_v43 = vpop.eup %1342  ;;  %v841_v44 = vmul.f32 %v1337_v35, %v840_v41  ;;  %v833_v45 = vadd.f32 1.0, %v1341_v42 }
 0x172   : > { %v869_v46 = vmul.f32 %v1343_v43, %v832_v34  ;;  %vm874_vm15 = vweird.f32 %v1343_v43  ;;  %vm863_vm4 = vcmp.eq.f32.partialorder %v862_v8, 8.507059e+37  ;;  %v865_v17 = vor.u32 1.1754944e-38, %v864_v56 }
 0x173   : > { %1346 = vrcp.f32 %v833_v45  ;;  %v842_v33 = vadd.f32 %v1337_v35, %v841_v44  ;;  %vm1872_vm2 = vmor %vm873_vm1, %vm874_vm15  ;;  %v892_v19 = vand.u32 2147483647, %v833_v45  ;;  %v894_v21 = vand.u32 2147483648, %v833_v45 }
 0x174   : > { %v870_v26 = vsub.f32 1.0, %v869_v46  ;;  %vm888_vm8 = vweird.f32 %v833_v45 }
 0x175   : > { %v846_v53 = vsel %vm1862_vm13, %v1337_v35, %v842_v33  ;;  %v895_v60 = vor.u32 1.1754944e-38, %v894_v21  ;;  %vm893_vm10 = vcmp.eq.f32.partialorder %v892_v19, 8.507059e+37 }
 0x176   : > { %v1345_v13 = vpop.eup %1344  ;;  %v871_v48 = vmul.f32 %v1343_v43, %v870_v26  ;;  %v851_v16 = vsel %vm1868_vm14, %v850_v61, %v846_v53 }
 0x177   : > { %v854_v49 = vmul.f32 %v1345_v13, %v831_v39  ;;  %vm859_vm0 = vweird.f32 %v1345_v13  ;;  %v958_v11 = vmul.f32 %v851_v16, %v1784_v38 }
 0x178   : > { %v872_v57 = vadd.f32 %v1343_v43, %v871_v48  ;;  %vm860_vm5 = vmor %vm858_vm3, %vm859_vm0 }
 0x179   : > { %v855_v52 = vsub.f32 1.0, %v854_v49  ;;  %v1347_v3 = vpop.eup %1346 }
 0x17a   : > { %v884_v59 = vmul.f32 %v1347_v3, %v833_v45  ;;  %v876_v22 = vsel %vm1872_vm2, %v1343_v43, %v872_v57  ;;  %vm889_vm6 = vweird.f32 %v1347_v3 }
 0x17b   : > { %v856_v58 = vmul.f32 %v1345_v13, %v855_v52  ;;  %v881_v32 = vsel %vm878_vm7, %v880_v47, %v876_v22  ;;  %vm890_vm9 = vmor %vm888_vm8, %vm889_vm6 }
 0x17c   : > { %v885_v5 = vsub.f32 1.0, %v884_v59  ;;  %v960_v27 = vmul.f32 %v881_v32, %v1805_v54 }
 0x17d   : > { %v857_v10 = vadd.f32 %v1345_v13, %v856_v58 }
 0x17e   : > { %v886_v25 = vmul.f32 %v1347_v3, %v885_v5 }
 0x17f   : > { %v861_v24 = vsel %vm860_vm5, %v1345_v13, %v857_v10 }
 0x180   : > { %v866_v9 = vsel %vm863_vm4, %v865_v17, %v861_v24  ;;  %v887_v31 = vadd.f32 %v1347_v3, %v886_v25 }
 0x181   : > { %v959_v30 = vmul.f32 %v866_v9, %v1818_v14 }
 0x182   : > { %v891_v1 = vsel %vm890_vm9, %v1347_v3, %v887_v31 }
 0x183   : > { %v1112_v7 = vpack.c.bf16 %v959_v30, %v958_v11  ;;  %v896_v23 = vsel %vm893_vm10, %v895_v60, %v891_v1 }
 0x184   : > { %v961_v18 = vmul.f32 %v896_v23, %v1849_v2 }
 0x185   : > { %1113 = vst [vmem:[%s1845_s30] sm:$0xff] %v1112_v7  }
 0x186   : > { %v1117_v4 = vpack.c.bf16 %v961_v18, %v960_v27 }
 0x188   : > { %1129 = vst [vmem:[%s1845_s30 + $0x8] sm:$0xff] %v1117_v4  }
 0x189 PF: > { %s16_s21 = sadd.s32 1, %s1354_s21  }
 0x18a   : > { %p13_p4 = scmp.ge.s32.totalorder %s16_s21, 4  }
 0x18c   :  { %15 = sbr.rel (!%p13_p4) target bundleno = 1 (0x1), region = 83 }

// kernel: _lambda_.3
= control target key start
LH: loop header
LB: loop body
LE: loop exit
PB: predicated region body
PF: predicated region fallthrough
CT: control target
= control target key end

     0   :  { %s3337_s0 = inlined_call_operand.vmem [shape: bf16[2,8,8,128], index: 0, kind: input, shape index: {}]   ;;  %s3338_s1 = inlined_call_operand.vmem [shape: bf16[128,128], index: 1, kind: input, shape index: {}]   ;;  %s3339_s2 = inlined_call_operand.vmem [shape: f32[1,128], index: 2, kind: input, shape index: {}]   ;;  %s3340_s3 = inlined_call_operand.vmem [shape: f32[3,3,128], index: 3, kind: input, shape index: {}]   ;;  %s3341_s4 = inlined_call_operand.vmem [shape: f32[1,128], index: 4, kind: input, shape index: {}]   ;;  %s3342_s5 = inlined_call_operand.vmem [shape: f32[128,128], index: 5, kind: input, shape index: {}]   ;;  %s3343_s6 = inlined_call_operand.vmem [shape: f32[1,128], index: 6, kind: input, shape index: {}]   ;;  %s3344_s7 = inlined_call_operand.vmem [shape: f32[128,128], index: 7, kind: input, shape index: {}]   ;;  %s3345_s8 = inlined_call_operand.vmem [shape: f32[1,128], index: 8, kind: input, shape index: {}]   ;;  %s3346_s9 = inlined_call_operand.vmem [shape: bf16[128,128], index: 9, kind: input, shape index: {}]   ;;  %s3347_s10 = inlined_call_operand.vmem [shape: f32[1,128], index: 10, kind: input, shape index: {}, may-alias: {10,12,14}]   ;;  %s3348_s11 = inlined_call_operand.vmem [shape: bf16[128,128], index: 11, kind: input, shape index: {}]   ;;  %s3349_s12 = inlined_call_operand.vmem [shape: f32[1,128], index: 12, kind: input, shape index: {}, may-alias: {10,12,14}]   ;;  %s3350_s13 = inlined_call_operand.vmem [shape: f32[128,128], index: 13, kind: input, shape index: {}]   ;;  %s3351_s14 = inlined_call_operand.vmem [shape: f32[1,128], index: 14, kind: input, shape index: {}, may-alias: {10,12,14}]   ;;  %s3352_s15 = inlined_call_operand.hbm [shape: f32[2,1,128], index: 15, kind: output, shape index: {}]  }
   0x1   :  { %3358 = sst [smem:[#allocation10_spill]] %s3337_s0 }
   0x2   :  { %20 = vsyncpa [#allocation3], 0 }
   0x3   :  { %22 = vsyncpa [#allocation3 + $0x1], 0  ;;  %s2258_s18 = smov 0   ;;  %s2260_s19 = smov 0  }
   0x4   :  { %s2262_s20 = smov 0   ;;  %s2264_s21 = smov 0  }
   0x5 LB: > { %3359 = sst [smem:[#allocation5_spill]] %s2163_s18  ;;  %s2279_s22 = sadd.s32 4294967295, %s2175_s21   ;;  %s2175_s21 = sphi %s2264_s21, %s3405_s21   ;;  %s2171_s20 = sphi %s2262_s20, %s3407_s20   ;;  %s2167_s19 = sphi %s2260_s19, %s3409_s19   ;;  %s2163_s18 = sphi %s2258_s18, %s3408_s18  }
   0x6   : > { %3360 = sst [smem:[#allocation6_spill]] %s2171_s20  ;;  %s1788_s23 = sadd.s32 4294967294, %s2175_s21  }
   0x7   : > { %s2283_s24 = sadd.s32 1, %s2175_s21   ;;  %s355_s25 = sadd.s32 1, %s2171_s20 }
   0x8   : > { %3361 = sst [smem:[#allocation7_spill]] %s2283_s24  ;;  %s352_s26 = ssub.s32 %s2175_s21, %s2283_s24 }
   0x9   : > { %p365_p0 = scmp.ne.s32.totalorder %s2171_s20, %s2167_s19  ;;  %p353_p1 = scmp.eq.s32.totalorder %s352_s26, 0 }
   0xa   : > { %p366_p2 = scmp.eq.s32.totalorder %s2279_s22, 1  ;;  %p371_p3 = scmp.ne.s32.totalorder %s2167_s19, %s2163_s18 }
   0xb   : > { %p372_p4 = scmp.eq.s32.totalorder %s1788_s23, 1  ;;  %p1791_p7 = scmp.ge.s32.totalorder %s2175_s21, 1 }
   0xc   : > { %s2294_s27 = scalar_select %p353_p1, %s2171_s20, %s355_s25  }
   0xd   : > { %p2296_p5 = por %p366_p2, %p365_p0  ;;  %p2300_p6 = por %p372_p4, %p371_p3 }
   0xe   : > { %3362 = sst [smem:[#allocation8_spill]] %s2294_s27  ;;  %p440_p8 = scmp.lt.s32.totalorder %s2175_s21, 3 }
   0xf   : > { %s3364_s29 = scalar_select %p2300_p6, 1, 0 }
  0x10   : > { %p441_p9 = pnand %p1791_p7, %p440_p8 }
  0x11   : > { %3365 = sst [smem:[#allocation9_spill]] %s3364_s29  ;;  %p487_p10 = scmp.lt.s32.totalorder (!%p441_p9), %s2279_s22, 1 }
  0x12   : > { %444 = sbr.rel (%p441_p9) target bundleno = 1196 (0x4ac), region = 80  ;;  %s3366_s0 = sld [smem:[#allocation10_spill]] (!%p441_p9) }
  0x13   : > { %s1729_s26 = scalar_lea.hbm (!%p441_p9), %s3352_s15, %s2279_s22  ;;  %s2133_s25 = scalar_lea.hbm (!%p441_p9), %s3352_s15, 2 }
  0x14   : > { %s1733_s24 = sshll.u32 (!%p441_p9), %s1729_s26, 4  ;;  %s1734_s24 = int_to_ptr.hbm [resolvable:$true] %s1733_s24 }
  0x17   : > { %v1946_v0 = vld [vmem:[%s3338_s1 + $0x38] sm:$0xff]  ;;  %v1945_v1 = vld [vmem:[%s3338_s1 + $0x30] sm:$0xff]  ;;  %v1944_v2 = vld [vmem:[%s3338_s1 + $0x28] sm:$0xff]  ;;  %s488_s23 = scalar_select %p487_p10, %s2279_s22, 1  ;;  %v781_v54 = vlaneseq }
  0x18   : > { %592 = vmatpush.bf16.msra.mxu0 %v1946_v0  ;;  %v1943_v3 = vld [vmem:[%s3338_s1 + $0x20] sm:$0xff]  ;;  %v1942_v4 = vld [vmem:[%s3338_s1 + $0x18] sm:$0xff]  ;;  %v1941_v5 = vld [vmem:[%s3338_s1 + $0x10] sm:$0xff] }
  0x19   : > { %v1940_v6 = vld [vmem:[%s3338_s1 + $0x8] sm:$0xff]  ;;  %s1934_s29 = sshll.u32 %s488_s23, 5  ;;  %v1939_v7 = vld [vmem:[%s3338_s1] sm:$0xff]  ;;  %v2397_v0 = vshrl.u32 %v781_v54, 7  ;;  %s485_s23 = sand.u32 1, %s2167_s19  }
  0x1a   : > { %s2335_s18 = scalar_lea.vmem %s3366_s0, %s1934_s29  ;;  %v2344_v12 = vld [vmem:[%s3339_s2] ss:$0 sm:$0xff]  ;;  %s486_s30 = scalar_lea.vmem [#allocation2], %s485_s23 }
  0x1b   : > { %v1935_v8 = vld [vmem:[%s2335_s18] sm:$0xff]  ;;  %v1936_v9 = vld [vmem:[%s2335_s18 + $0x8] sm:$0xff]  ;;  %v1937_v10 = vld [vmem:[%s2335_s18 + $0x10] sm:$0xff]  ;;  %vm801_vm8 = vcmp.eq.s32.totalorder %v2397_v0, 0  ;;  %vm783_vm14 = vcmp.eq.s32.totalorder %v2397_v0, 7  ;;  %s1731_s16 = sshll.u32 %s486_s30, 4  ;;  %s1732_s16 = int_to_ptr.vmem [resolvable:$true] %s1731_s16 }
  0x1c   : > { %593 = vmatpush.bf16.msra.mxu0 %v1945_v1  ;;  %v1938_v11 = vld [vmem:[%s2335_s18 + $0x18] sm:$0xff]  ;;  %v819_v49 = vld [vmem:[%s3340_s3] sm:$0x7]  ;;  %s1721_s17 = scalar_lea.sflag [#allocation3], %s485_s23  ;;  %s2127_s29 = sshra.s32 %s1734_s24, 4  ;;  %s2128_s29 = int_to_ptr.hbm [resolvable:$true] %s2127_s29 }
  0x1d   : > { %v2383_v56 = vperm.slane %v819_v49, 0  ;;  %v2388_v58 = vperm.slane %v819_v49, 1  ;;  %s2129_s0 = scalar_lea.hbm %s2128_s29, 1  ;;  %p2134_p0 = scmp.lt.s32.totalorder %s2128_s29, %s3352_s15 }
  0x1e   : > { %p2130_p11 = scmp.ne.s32.totalorder %s2128_s29, %s2129_s0  ;;  %p2135_p1 = scmp.lt.s32.totalorder %s2133_s25, %s2129_s0 }
  0x20   : > { %594 = vmatpush.bf16.msra.mxu0 %v1944_v2  ;;  %p2131_p12 = pnand %p2130_p11, %p2296_p5  ;;  %p2136_p2 = por %p2135_p1, %p2134_p0 }
  0x22   : > { %p2132_p13 = pneg %p2131_p12 }
  0x24   : > { %595 = vmatpush.bf16.msra.mxu0 %v1943_v3  ;;  %v823_v3 = vmul.f32 0.0, %v2383_v56  ;;  %p2137_p3 = pnand %p2136_p2, %p2132_p13 }
  0x28   : > { %596 = vmatpush.bf16.msra.mxu0 %v1942_v4 }
  0x2c   : > { %597 = vmatpush.bf16.msra.mxu0 %v1941_v5 }
  0x30   : > { %598 = vmatpush.bf16.msra.mxu0 %v1940_v6 }
  0x34   : > { %599 = vmatpush.bf16.msra.mxu0 %v1939_v7  ;;  %v840_v7 = vmul.f32 0.0, %v2388_v58 }
  0x37   : > { %600 = vmatmul.bf16.vlgmr.msra.gmra.mxu0 %v1935_v8  ;;  %v2410_v8 = vperm.slane %v819_v49, 2 }
  0x47   : > { %605 = vmatmul.bf16.gmra.mxu0 %v1936_v9 }
  0x57   : > { %610 = vmatmul.bf16.gmra.mxu0 %v1937_v10 }
  0x67   : > { %615 = vmatmul.bf16.gmra.mxu0 %v1938_v11 }
  0xb4   : > { %v601_v13 = vpop.f32.mrf.mxu0 }
  0xb5   : > { %v2347_v14 = vadd.f32 %v2344_v12, %v601_v13 }
  0xb7   : > { %v1842_v15 = vmul.f32 -1.442695, %v2347_v14 }
  0xb9   : > { %2007 = vpow2.f32 %v1842_v15 }
  0xbc   : > { %v603_v16 = vpop.f32.mrf.mxu0 }
  0xbd   : > { %v2351_v17 = vadd.f32 %v2344_v12, %v603_v16 }
  0xbf   : > { %v2008_v18 = vpop.eup %2007  ;;  %v1843_v19 = vmul.f32 -1.442695, %v2351_v17 }
  0xc0   : > { %v645_v20 = vadd.f32 1.0, %v2008_v18 }
  0xc1   : > { %2009 = vpow2.f32 %v1843_v19 }
  0xc2   : > { %2011 = vrcp.f32 %v645_v20  ;;  %v664_v43 = vand.u32 2147483648, %v645_v20  ;;  %vm658_vm1 = vweird.f32 %v645_v20  ;;  %v662_v46 = vand.u32 2147483647, %v645_v20 }
  0xc4   : > { %v606_v21 = vpop.f32.mrf.mxu0  ;;  %v665_v52 = vor.u32 1.1754944e-38, %v664_v43  ;;  %vm663_vm3 = vcmp.eq.f32.partialorder %v662_v46, 8.507059e+37 }
  0xc5   : > { %v2355_v22 = vadd.f32 %v2344_v12, %v606_v21  ;;  %v848_v21 = vadd.f32 %v840_v7, %v823_v3 }
  0xc7   : > { %v2010_v23 = vpop.eup %2009  ;;  %v1844_v24 = vmul.f32 -1.442695, %v2355_v22 }
  0xc8   : > { %v2358_v25 = vadd.f32 1.0, %v2010_v23  ;;  %v2012_v26 = vpop.eup %2011 }
  0xc9   : > { %2013 = vpow2.f32 %v1844_v24  ;;  %v654_v27 = vmul.f32 %v2012_v26, %v645_v20  ;;  %vm659_vm0 = vweird.f32 %v2012_v26  ;;  %v820_v20 = vld [vmem:[%s3340_s3 + $0x4] sm:$0x7]  ;;  %v857_v24 = vmul.f32 0.0, %v2410_v8 }
  0xca   : > { %2015 = vrcp.f32 %v2358_v25  ;;  %vm660_vm2 = vmor %vm658_vm1, %vm659_vm0  ;;  %v679_v60 = vand.u32 2147483648, %v2358_v25  ;;  %vm673_vm5 = vweird.f32 %v2358_v25  ;;  %v677_v1 = vand.u32 2147483647, %v2358_v25 }
  0xcb   : > { %v655_v32 = vsub.f32 1.0, %v654_v27  ;;  %v2451_v43 = vperm.slane %v820_v20, 2 }
  0xcc   : > { %v608_v28 = vpop.f32.mrf.mxu0  ;;  %v680_v10 = vor.u32 1.1754944e-38, %v679_v60  ;;  %vm678_vm9 = vcmp.eq.f32.partialorder %v677_v1, 8.507059e+37 }
  0xcd   : > { %v2362_v29 = vadd.f32 %v2344_v12, %v608_v28  ;;  %v656_v35 = vmul.f32 %v2012_v26, %v655_v32 }
  0xcf   : > { %v2014_v30 = vpop.eup %2013  ;;  %v1845_v31 = vmul.f32 -1.442695, %v2362_v29  ;;  %v657_v41 = vadd.f32 %v2012_v26, %v656_v35  ;;  %v865_v35 = vadd.f32 %v857_v24, %v848_v21 }
  0xd0   : > { %v2365_v33 = vadd.f32 1.0, %v2014_v30  ;;  %v2016_v34 = vpop.eup %2015 }
  0xd1   : > { %2017 = vpow2.f32 %v1845_v31  ;;  %v669_v36 = vmul.f32 %v2016_v34, %v2358_v25  ;;  %v661_v48 = vsel %vm660_vm2, %v2012_v26, %v657_v41  ;;  %vm674_vm4 = vweird.f32 %v2016_v34  ;;  %v821_v31 = vld [vmem:[%s3340_s3 + $0x8] sm:$0x7] }
  0xd2   : > { %2019 = vrcp.f32 %v2365_v33  ;;  %v666_v55 = vsel %vm663_vm3, %v665_v52, %v661_v48  ;;  %vm2402_vm6 = vmor %vm673_vm5, %vm674_vm4  ;;  %v694_v16 = vand.u32 2147483648, %v2365_v33  ;;  %vm688_vm10 = vweird.f32 %v2365_v33 }
  0xd3   : > { %v670_v42 = vsub.f32 1.0, %v669_v36  ;;  %v2395_v63 = vmul.f32 %v666_v55, %v2347_v14  ;;  %v692_v19 = vand.u32 2147483647, %v2365_v33  ;;  %v2428_v25 = vperm.slane %v820_v20, 0 }
  0xd4   : > { %v611_v37 = vpop.f32.mrf.mxu0  ;;  %v695_v30 = vor.u32 1.1754944e-38, %v694_v16  ;;  %v2473_v52 = vperm.slane %v821_v31, 0  ;;  %v2480_v60 = vperm.slane %v821_v31, 2 }
  0xd5   : > { %v2370_v38 = vadd.f32 %v2344_v12, %v611_v37  ;;  %v671_v50 = vmul.f32 %v2016_v34, %v670_v42  ;;  %v802_v15 = vrot.slane %v2395_v63, 7  ;;  %vm693_vm12 = vcmp.eq.f32.partialorder %v692_v19, 8.507059e+37 }
  0xd6   : > { %v2443_v37 = vperm.slane %v820_v20, 1  ;;  %v784_v42 = vrot.slane %v2395_v63, 1  ;;  %v932_v0 = vmul.f32 0.0, %v2473_v52 }
  0xd7   : > { %v2018_v39 = vpop.eup %2017  ;;  %v1846_v47 = vmul.f32 -1.442695, %v2370_v38  ;;  %v672_v59 = vadd.f32 %v2016_v34, %v671_v50  ;;  %v811_v27 = vsel %vm801_vm8, 0.0, %v802_v15 }
  0xd8   : > { %v2372_v40 = vpop.eup %2019  ;;  %v2376_v45 = vadd.f32 1.0, %v2018_v39  ;;  %v874_v36 = vmul.f32 %v2428_v25, %v811_v27  ;;  %v824_v48 = vmul.f32 %v2383_v56, %v811_v27 }
  0xd9   : > { %v684_v44 = vmul.f32 %v2372_v40, %v2365_v33  ;;  %v676_v9 = vsel %vm2402_vm6, %v2016_v34, %v672_v59  ;;  %vm689_vm7 = vweird.f32 %v2372_v40  ;;  %v793_v59 = vsel %vm783_vm14, 0.0, %v784_v42 }
  0xda   : > { %2021 = vrcp.f32 %v2376_v45  ;;  %v681_v18 = vsel %vm678_vm9, %v680_v10, %v676_v9  ;;  %vm690_vm11 = vmor %vm688_vm10, %vm689_vm7  ;;  %vm703_vm15 = vweird.f32 %v2376_v45  ;;  %v858_v9 = vmul.f32 %v2410_v8, %v793_v59 }
  0xdb   : > { %v685_v53 = vsub.f32 1.0, %v684_v44  ;;  %2023 = vpow2.f32 %v1846_v47  ;;  %v2435_v28 = vmul.f32 %v681_v18, %v2351_v17  ;;  %v709_v17 = vand.u32 2147483648, %v2376_v45 }
  0xdc   : > { %v613_v51 = vpop.f32.mrf.mxu0  ;;  %v2453_v44 = vperm.slane %v821_v31, 1 }
  0xdd   : > { %v2386_v57 = vadd.f32 %v2344_v12, %v613_v51  ;;  %v686_v62 = vmul.f32 %v2372_v40, %v685_v53  ;;  %v803_v39 = vrot.slane %v2435_v28, 7  ;;  %v882_v51 = vadd.f32 %v874_v36, %v865_v35 }
  0xde   : > { %v710_v53 = vor.u32 1.1754944e-38, %v709_v17  ;;  %v785_v3 = vrot.slane %v2435_v28, 1 }
  0xdf   : > { %v1847_v6 = vmul.f32 -1.442695, %v2386_v57  ;;  %v687_v11 = vadd.f32 %v2372_v40, %v686_v62  ;;  %v812_v54 = vsel %vm801_vm8, 0.0, %v803_v39 }
  0xe0   : > { %v2391_v61 = vpop.eup %2021  ;;  %v794_v20 = vsel %vm783_vm14, 0.0, %v785_v3  ;;  %v875_v21 = vmul.f32 %v2428_v25, %v812_v54  ;;  %v925_v35 = vmul.f32 %v2473_v52, %v812_v54 }
  0xe1   : > { %v2024_v2 = vpop.eup %2023  ;;  %v699_v5 = vmul.f32 %v2391_v61, %v2376_v45  ;;  %2025 = vpow2.f32 %v1847_v6  ;;  %v691_v26 = vsel %vm690_vm11, %v2372_v40, %v687_v11  ;;  %vm704_vm13 = vweird.f32 %v2391_v61 }
  0xe2   : > { %v2416_v14 = vadd.f32 1.0, %v2024_v2  ;;  %v696_v32 = vsel %vm693_vm12, %v695_v30, %v691_v26  ;;  %v707_v40 = vand.u32 2147483647, %v2376_v45  ;;  %vm2460_vm0 = vmor %vm703_vm15, %vm704_vm13  ;;  %v891_v2 = vmul.f32 %v2443_v37, %v2395_v63 }
  0xe3   : > { %v700_v13 = vsub.f32 1.0, %v699_v5  ;;  %v2456_v46 = vmul.f32 %v696_v32, %v2355_v22  ;;  %v841_v22 = vmul.f32 %v2388_v58, %v2395_v63  ;;  %v825_v5 = vmul.f32 %v2383_v56, %v812_v54 }
  0xe4   : > { %2027 = vrcp.f32 %v2416_v14  ;;  %vm708_vm1 = vcmp.eq.f32.partialorder %v707_v40, 8.507059e+37  ;;  %v724_v4 = vand.u32 2147483648, %v2416_v14  ;;  %v722_v7 = vand.u32 2147483647, %v2416_v14  ;;  %v616_v27 = vpop.f32.mrf.mxu0 }
  0xe5   : > { %v701_v23 = vmul.f32 %v2391_v61, %v700_v13  ;;  %v849_v1 = vadd.f32 %v841_v22, %v824_v48  ;;  %v899_v10 = vadd.f32 %v891_v2, %v882_v51  ;;  %v908_v11 = vmul.f32 %v2451_v43, %v793_v59 }
  0xe6   : > { %v842_v63 = vmul.f32 %v2388_v58, %v2435_v28  ;;  %vm718_vm3 = vweird.f32 %v2416_v14  ;;  %v786_v24 = vrot.slane %v2456_v46, 1  ;;  %vm723_vm5 = vcmp.eq.f32.partialorder %v722_v7, 8.507059e+37 }
  0xe7   : > { %v702_v33 = vadd.f32 %v2391_v61, %v701_v23  ;;  %v2026_v34 = vpop.eup %2025  ;;  %v866_v19 = vadd.f32 %v858_v9, %v849_v1  ;;  %v843_v17 = vmul.f32 %v2388_v58, %v2456_v46  ;;  %v892_v48 = vmul.f32 %v2443_v37, %v2435_v28 }
  0xe8   : > { %v2469_v50 = vadd.f32 1.0, %v2026_v34  ;;  %v850_v23 = vadd.f32 %v842_v63, %v825_v5  ;;  %v859_v34 = vmul.f32 %v2410_v8, %v794_v20  ;;  %v942_v22 = vmul.f32 %v2453_v44, %v2435_v28 }
  0xe9   : > { %v706_v45 = vsel %vm2460_vm0, %v2391_v61, %v702_v33  ;;  %v804_v61 = vrot.slane %v2456_v46, 7  ;;  %v916_v33 = vadd.f32 %v908_v11, %v899_v10  ;;  %v883_v47 = vadd.f32 %v875_v21, %v866_v19 }
  0xea   : > { %v2028_v41 = vpop.eup %2027  ;;  %2029 = vrcp.f32 %v2469_v50  ;;  %v711_v62 = vsel %vm708_vm1, %v710_v53, %v706_v45  ;;  %v867_v42 = vadd.f32 %v859_v34, %v850_v23  ;;  %v2524_v45 = vsel %vm783_vm14, 0.0, %v786_v24 }
  0xeb   : > { %v714_v49 = vmul.f32 %v2028_v41, %v2416_v14  ;;  %vm719_vm2 = vweird.f32 %v2028_v41  ;;  %v2492_v13 = vmul.f32 %v711_v62, %v2362_v29  ;;  %v813_v15 = vsel %vm801_vm8, 0.0, %v804_v61 }
  0xec   : > { %vm720_vm4 = vmor %vm718_vm3, %vm719_vm2  ;;  %v725_v29 = vor.u32 1.1754944e-38, %v724_v4  ;;  %v826_v30 = vmul.f32 %v2383_v56, %v813_v15  ;;  %v876_v36 = vmul.f32 %v2428_v25, %v813_v15  ;;  %v933_v53 = vadd.f32 %v925_v35, %v916_v33 }
  0xed   : > { %v715_v55 = vsub.f32 1.0, %v714_v49  ;;  %v805_v14 = vrot.slane %v2492_v13, 7  ;;  %v909_v49 = vmul.f32 %v2451_v43, %v794_v20  ;;  %v959_v54 = vmul.f32 %v2480_v60, %v794_v20 }
  0xee   : > { %v787_v59 = vrot.slane %v2492_v13, 1  ;;  %v860_v61 = vmul.f32 %v2410_v8, %v2524_v45  ;;  %v900_v28 = vadd.f32 %v892_v48, %v883_v47  ;;  %v893_v3 = vmul.f32 %v2443_v37, %v2456_v46 }
  0xef   : > { %v716_v6 = vmul.f32 %v2028_v41, %v715_v55  ;;  %v814_v51 = vsel %vm801_vm8, 0.0, %v805_v14  ;;  %v884_v55 = vadd.f32 %v876_v36, %v867_v42  ;;  %v926_v4 = vmul.f32 %v2473_v52, %v813_v15 }
  0xf0   : > { %v2499_v18 = vpop.eup %2029  ;;  %v827_v5 = vmul.f32 %v2383_v56, %v814_v51  ;;  %v877_v7 = vmul.f32 %v2428_v25, %v814_v51  ;;  %v739_v9 = vand.u32 2147483648, %v2469_v50  ;;  %v796_v11 = vsel %vm783_vm14, 0.0, %v787_v59 }
  0xf1   : > { %v717_v16 = vadd.f32 %v2028_v41, %v716_v6  ;;  %v729_v32 = vmul.f32 %v2499_v18, %v2469_v50  ;;  %vm734_vm6 = vweird.f32 %v2499_v18  ;;  %v901_v10 = vadd.f32 %v893_v3, %v884_v55 }
  0xf2   : > { %v844_v63 = vmul.f32 %v2388_v58, %v2492_v13  ;;  %vm733_vm7 = vweird.f32 %v2469_v50  ;;  %v950_v20 = vadd.f32 %v942_v22, %v933_v53  ;;  %v910_v21 = vmul.f32 %v2451_v43, %v2524_v45 }
  0xf3   : > { %v721_v26 = vsel %vm720_vm4, %v2028_v41, %v717_v16  ;;  %v730_v40 = vsub.f32 1.0, %v729_v32  ;;  %v2518_v41 = vadd.f32 %v2344_v12, %v616_v27  ;;  %v737_v16 = vand.u32 2147483647, %v2469_v50  ;;  %vm735_vm9 = vmor %vm733_vm7, %vm734_vm6  ;;  %v618_v50 = vpop.f32.mrf.mxu0 }
  0xf4   : > { %v726_v31 = vsel %vm723_vm5, %v725_v29, %v721_v26  ;;  %v852_v29 = vadd.f32 %v844_v63, %v827_v5  ;;  %v927_v23 = vmul.f32 %v2473_v52, %v814_v51  ;;  %v917_v24 = vadd.f32 %v909_v49, %v900_v28 }
  0xf5   : > { %v2515_v39 = vmul.f32 %v726_v31, %v2370_v38  ;;  %v851_v38 = vadd.f32 %v843_v17, %v826_v30  ;;  %v731_v1 = vmul.f32 %v2499_v18, %v730_v40  ;;  %v1848_v2 = vmul.f32 -1.442695, %v2518_v41  ;;  %v2565_v17 = vld [vmem:[%s3341_s4] ss:$0 sm:$0xff] }
  0xf6   : > { %v740_v30 = vor.u32 1.1754944e-38, %v739_v9  ;;  %v918_v14 = vadd.f32 %v910_v21, %v901_v10  ;;  %v861_v31 = vmul.f32 %v2410_v8, %v796_v11  ;;  %vm738_vm10 = vcmp.eq.f32.partialorder %v737_v16, 8.507059e+37 }
  0xf7   : > { %v806_v62 = vrot.slane %v2515_v39, 7  ;;  %v868_v6 = vadd.f32 %v860_v61, %v851_v38  ;;  %v732_v19 = vadd.f32 %v2499_v18, %v731_v1  ;;  %2031 = vpow2.f32 %v1848_v2 }
  0xf8   : > { %v934_v33 = vadd.f32 %v926_v4, %v917_v24  ;;  %v894_v34 = vmul.f32 %v2443_v37, %v2492_v13  ;;  %v967_v36 = vadd.f32 %v959_v54, %v950_v20  ;;  %v935_v40 = vadd.f32 %v927_v23, %v918_v14 }
  0xf9   : > { %v815_v15 = vsel %vm801_vm8, 0.0, %v806_v62  ;;  %v885_v26 = vadd.f32 %v877_v7, %v868_v6  ;;  %v736_v27 = vsel %vm735_vm9, %v2499_v18, %v732_v19  ;;  %v869_v18 = vadd.f32 %v861_v31, %v852_v29 }
  0xfa   : > { %v878_v32 = vmul.f32 %v2428_v25, %v815_v15  ;;  %v741_v35 = vsel %vm738_vm10, %v740_v30, %v736_v27  ;;  %v943_v48 = vmul.f32 %v2453_v44, %v2456_v46  ;;  %v788_v22 = vrot.slane %v2515_v39, 1 }
  0xfb   : > { %v2568_v42 = vmul.f32 %v741_v35, %v2386_v57  ;;  %v902_v49 = vadd.f32 %v894_v34, %v885_v26  ;;  %v2574_v38 = vadd.f32 %v2344_v12, %v618_v50  ;;  %v944_v51 = vmul.f32 %v2453_v44, %v2492_v13 }
  0xfc   : > { %v886_v53 = vadd.f32 %v878_v32, %v869_v18  ;;  %v951_v55 = vadd.f32 %v943_v48, %v934_v33  ;;  %v911_v57 = vmul.f32 %v2451_v43, %v796_v11  ;;  %v928_v59 = vmul.f32 %v2473_v52, %v815_v15 }
  0xfd   : > { %v2032_v47 = vpop.eup %2031  ;;  %v807_v54 = vrot.slane %v2568_v42, 7  ;;  %v2584_v46 = vadd.f32 %v2565_v17, %v967_v36  ;;  %v960_v12 = vmul.f32 %v2480_v60, %v2524_v45  ;;  %v952_v62 = vadd.f32 %v944_v51, %v935_v40  ;;  %v1182_v51 = vld [vmem:[%s3342_s5 + $0x70] sm:$0xff] }
  0xfe   : > { %v2581_v61 = vadd.f32 1.0, %v2032_v47  ;;  %v895_v13 = vmul.f32 %v2443_v37, %v2515_v39  ;;  %v919_v1 = vadd.f32 %v911_v57, %v902_v49  ;;  %v797_v2 = vsel %vm783_vm14, 0.0, %v788_v22  ;;  %v1183_v22 = vld [vmem:[%s3342_s5 + $0x78] sm:$0xff] }
  0xff   : > { %v2594_v28 = vsel %vm801_vm8, 0.0, %v807_v54  ;;  %v1849_v3 = vmul.f32 -1.442695, %v2574_v38  ;;  %v961_v4 = vmul.f32 %v2480_v60, %v796_v11  ;;  %v968_v6 = vadd.f32 %v960_v12, %v951_v55  ;;  %1185 = vmatpush.msra.mxu2 %v1183_v22  ;;  %v1181_v12 = vld [vmem:[%s3342_s5 + $0x68] sm:$0xff] }
 0x100   : > { %v903_v5 = vadd.f32 %v895_v13, %v886_v53  ;;  %v936_v7 = vadd.f32 %v928_v59, %v919_v1  ;;  %2033 = vrcp.f32 %v2581_v61  ;;  %v912_v9 = vmul.f32 %v2451_v43, %v797_v2 }
 0x101   : > { %v969_v45 = vadd.f32 %v961_v4, %v952_v62  ;;  %v929_v10 = vmul.f32 %v2473_v52, %v2594_v28  ;;  %v1850_v63 = vmul.f32 -1.442695, %v2584_v46  ;;  %v945_v16 = vmul.f32 %v2453_v44, %v2515_v39  ;;  %1186 = vmatpush.msra.mxu2 %v1182_v51 }
 0x102   : > { %2035 = vpow2.f32 %v1849_v3  ;;  %v920_v19 = vadd.f32 %v912_v9, %v903_v5  ;;  %v789_v11 = vrot.slane %v2568_v42, 1  ;;  %v2607_v20 = vadd.f32 %v2565_v17, %v968_v6  ;;  %v1180_v3 = vld [vmem:[%s3342_s5 + $0x60] sm:$0xff]  ;;  %v1179_v9 = vld [vmem:[%s3342_s5 + $0x58] sm:$0xff] }
 0x103   : > { %v828_v21 = vmul.f32 %v2383_v56, %v815_v15  ;;  %v953_v29 = vadd.f32 %v945_v16, %v936_v7  ;;  %v2611_v23 = vadd.f32 %v2565_v17, %v969_v45  ;;  %2037 = vpow2.f32 %v1850_v63  ;;  %1187 = vmatpush.msra.mxu2 %v1181_v12 }
 0x104   : > { %v937_v24 = vadd.f32 %v929_v10, %v920_v19  ;;  %v845_v27 = vmul.f32 %v2388_v58, %v2515_v39  ;;  %v962_v30 = vmul.f32 %v2480_v60, %v797_v2  ;;  %v2618_v14 = vsel %vm783_vm14, 0.0, %v789_v11 }
 0x105   : > { %v946_v31 = vmul.f32 %v2453_v44, %v2568_v42  ;;  %v1851_v50 = vmul.f32 -1.442695, %v2607_v20  ;;  %v1852_v35 = vmul.f32 -1.442695, %v2611_v23  ;;  %v862_v40 = vmul.f32 %v2410_v8, %v797_v2  ;;  %1188 = vmatpush.msra.mxu2 %v1180_v3 }
 0x106   : > { %v2034_v26 = vpop.eup %2033  ;;  %v853_v33 = vadd.f32 %v845_v27, %v828_v21  ;;  %v970_v34 = vadd.f32 %v962_v30, %v953_v29  ;;  %v879_v47 = vmul.f32 %v2428_v25, %v2594_v28  ;;  %v963_v48 = vmul.f32 %v2480_v60, %v2618_v14  ;;  %v1178_v29 = vld [vmem:[%s3342_s5 + $0x50] sm:$0xff] }
 0x107   : > { %v744_v15 = vmul.f32 %v2034_v26, %v2581_v61  ;;  %v954_v36 = vadd.f32 %v946_v31, %v937_v24  ;;  %v754_v49 = vand.u32 2147483648, %v2581_v61  ;;  %vm749_vm11 = vweird.f32 %v2034_v26  ;;  %1189 = vmatpush.msra.mxu2 %v1179_v9 }
 0x108   : > { %v2036_v32 = vpop.eup %2035  ;;  %v752_v54 = vand.u32 2147483647, %v2581_v61  ;;  %v870_v57 = vadd.f32 %v862_v40, %v853_v33  ;;  %v2642_v59 = vadd.f32 %v2565_v17, %v970_v34  ;;  %vm748_vm12 = vweird.f32 %v2581_v61  ;;  %v1176_v40 = vld [vmem:[%s3342_s5 + $0x40] sm:$0xff] }
 0x109   : > { %v745_v39 = vsub.f32 1.0, %v744_v15  ;;  %v2625_v18 = vadd.f32 1.0, %v2036_v32  ;;  %v2038_v55 = vpop.eup %2037  ;;  %v971_v62 = vadd.f32 %v963_v48, %v954_v36  ;;  %vm750_vm13 = vmor %vm748_vm12, %vm749_vm11  ;;  %v755_v2 = vor.u32 1.1754944e-38, %v754_v49  ;;  %1190 = vmatpush.msra.mxu2 %v1178_v29 }
 0x10a   : > { %v887_v1 = vadd.f32 %v879_v47, %v870_v57  ;;  %v2651_v4 = vadd.f32 1.0, %v2038_v55  ;;  %vm753_vm15 = vcmp.eq.f32.partialorder %v752_v54, 8.507059e+37  ;;  %v1853_v6 = vmul.f32 -1.442695, %v2642_v59  ;;  %v1175_v54 = vld [vmem:[%s3342_s5 + $0x38] sm:$0xff] }
 0x10b   : > { %v746_v53 = vmul.f32 %v2034_v26, %v745_v39  ;;  %2039 = vrcp.f32 %v2625_v18  ;;  %v829_v7 = vmul.f32 %v2383_v56, %v2594_v28  ;;  %v896_v61 = vmul.f32 %v2443_v37, %v2568_v42 }
 0x10c   : > { %2041 = vpow2.f32 %v1851_v50  ;;  %v2663_v16 = vadd.f32 %v2565_v17, %v971_v62  ;;  %v846_v11 = vmul.f32 %v2388_v58, %v2568_v42  ;;  %v913_v27 = vmul.f32 %v2451_v43, %v2618_v14  ;;  %v1177_v42 = vld [vmem:[%s3342_s5 + $0x48] sm:$0xff] }
 0x10d   : > { %v747_v13 = vadd.f32 %v2034_v26, %v746_v53  ;;  %2043 = vpow2.f32 %v1852_v35  ;;  %v904_v28 = vadd.f32 %v896_v61, %v887_v1  ;;  %v769_v50 = vand.u32 2147483648, %v2625_v18  ;;  %1191 = vmatpush.msra.mxu2 %v1177_v42 }
 0x10e   : > { %2045 = vrcp.f32 %v2651_v4  ;;  %v1854_v33 = vmul.f32 -1.442695, %v2663_v16  ;;  %v863_v34 = vmul.f32 %v2410_v8, %v2618_v14  ;;  %v767_v49 = vand.u32 2147483647, %v2625_v18 }
 0x10f   : > { %v751_v5 = vsel %vm750_vm13, %v2034_v26, %v747_v13  ;;  %2047 = vpow2.f32 %v1853_v6  ;;  %v921_v35 = vadd.f32 %v913_v27, %v904_v28  ;;  %vm763_vm1 = vweird.f32 %v2625_v18  ;;  %1192 = vmatpush.msra.mxu2 %v1176_v40 }
 0x110   : > { %v756_v45 = vsel %vm753_vm15, %v755_v2, %v751_v5  ;;  %v770_v12 = vor.u32 1.1754944e-38, %v769_v50  ;;  %2049 = vpow2.f32 %v1854_v33  ;;  %v1174_v5 = vld [vmem:[%s3342_s5 + $0x30] sm:$0xff]  ;;  %vm768_vm3 = vcmp.eq.f32.partialorder %v767_v49, 8.507059e+37 }
 0x111   : > { %v2040_v10 = vpop.eup %2039  ;;  %v779_v63 = vmul.f32 %v756_v45, %v2518_v41  ;;  %v854_v41 = vadd.f32 %v846_v11, %v829_v7  ;;  %1193 = vmatpush.msra.mxu2 %v1175_v54  ;;  %v1170_v50 = vld [vmem:[%s3342_s5 + $0x10] sm:$0xff] }
 0x112   : > { %v2042_v19 = vpop.eup %2041  ;;  %v759_v21 = vmul.f32 %v2040_v10, %v2625_v18  ;;  %vm764_vm0 = vweird.f32 %v2040_v10 }
 0x113   : > { %v790_v24 = vrot.slane %v779_v63, 1  ;;  %v808_v26 = vrot.slane %v779_v63, 7  ;;  %v2044_v31 = vpop.eup %2043  ;;  %v2677_v15 = vadd.f32 1.0, %v2042_v19  ;;  %v871_v14 = vadd.f32 %v863_v34, %v854_v41  ;;  %vm765_vm2 = vmor %vm763_vm1, %vm764_vm0  ;;  %1194 = vmatpush.msra.mxu2 %v1174_v5 }
 0x114   : > { %v760_v30 = vsub.f32 1.0, %v759_v21  ;;  %v2693_v22 = vadd.f32 1.0, %v2044_v31  ;;  %v947_v53 = vmul.f32 %v2453_v44, %v779_v63  ;;  %v2699_v55 = vpop.eup %2045  ;;  %v847_v18 = vmul.f32 %v2388_v58, %v779_v63  ;;  %v1172_v58 = vld [vmem:[%s3342_s5 + $0x20] sm:$0xff] }
 0x115   : > { %v817_v32 = vsel %vm801_vm8, 0.0, %v808_v26  ;;  %v799_v47 = vsel %vm783_vm14, 0.0, %v790_v24  ;;  %v2048_v62 = vpop.eup %2047  ;;  %v897_v7 = vmul.f32 %v2443_v37, %v779_v63  ;;  %2051 = vrcp.f32 %v2677_v15  ;;  %v1171_v26 = vld [vmem:[%s3342_s5 + $0x18] sm:$0xff] }
 0x116   : > { %v880_v36 = vmul.f32 %v2428_v25, %v817_v32  ;;  %v930_v39 = vmul.f32 %v2473_v52, %v817_v32  ;;  %v761_v48 = vmul.f32 %v2040_v10, %v760_v30  ;;  %v830_v13 = vmul.f32 %v2383_v56, %v817_v32  ;;  %v1173_v56 = vld [vmem:[%s3342_s5 + $0x28] sm:$0xff]  ;;  %v2050_v28 = vpop.eup %2049 }
 0x117   : > { %v964_v3 = vmul.f32 %v2480_v60, %v799_v47  ;;  %v2714_v9 = vadd.f32 1.0, %v2048_v62  ;;  %2053 = vrcp.f32 %v2693_v22  ;;  %1195 = vmatpush.msra.mxu2 %v1173_v56  ;;  %v864_v24 = vmul.f32 %v2410_v8, %v799_v47 }
 0x118   : > { %v938_v51 = vadd.f32 %v930_v39, %v921_v35  ;;  %v762_v57 = vadd.f32 %v2040_v10, %v761_v48  ;;  %v888_v1 = vadd.f32 %v880_v36, %v871_v14  ;;  %v1020_v27 = vmul.f32 %v2699_v55, %v2651_v4  ;;  %v1169_v48 = vld [vmem:[%s3342_s5 + $0x8] sm:$0xff] }
 0x119   : > { %2055 = vrcp.f32 %v2714_v9  ;;  %1196 = vmatpush.msra.mxu2 %v1172_v58  ;;  %v2744_v35 = vadd.f32 1.0, %v2050_v28  ;;  %v966_v5 = vmul.f32 0.0, %v2480_v60  ;;  %vm1039_vm6 = vweird.f32 %v2677_v15 }
 0x11a   : > { %v955_v2 = vadd.f32 %v947_v53, %v938_v51  ;;  %v766_v6 = vsel %vm765_vm2, %v2040_v10, %v762_v57  ;;  %v855_v10 = vadd.f32 %v847_v18, %v830_v13  ;;  %v905_v11 = vadd.f32 %v897_v7, %v888_v1 }
 0x11b   : > { %v771_v45 = vsel %vm768_vm3, %v770_v12, %v766_v6  ;;  %v2740_v33 = vpop.eup %2051  ;;  %1197 = vmatpush.msra.mxu2 %v1171_v26  ;;  %v1021_v49 = vsub.f32 1.0, %v1020_v27  ;;  %v949_v13 = vmul.f32 0.0, %v2453_v44  ;;  %vm1054_vm11 = vweird.f32 %v2693_v22 }
 0x11c   : > { %v972_v61 = vadd.f32 %v964_v3, %v955_v2  ;;  %v780_v19 = vmul.f32 %v771_v45, %v2574_v38  ;;  %v914_v38 = vmul.f32 %v2451_v43, %v799_v47  ;;  %v872_v42 = vadd.f32 %v864_v24, %v855_v10 }
 0x11d   : > { %v2746_v36 = vpop.eup %2053  ;;  %1198 = vmatpush.msra.mxu2 %v1170_v50  ;;  %v1035_v12 = vmul.f32 %v2740_v33, %v2677_v15  ;;  %v1022_v2 = vmul.f32 %v2699_v55, %v1021_v49  ;;  %v1028_v10 = vand.u32 2147483647, %v2651_v4  ;;  %vm1040_vm7 = vweird.f32 %v2740_v33 }
 0x11e   : > { %v2722_v63 = vadd.f32 %v2565_v17, %v972_v61  ;;  %v791_v21 = vrot.slane %v780_v19, 1  ;;  %v809_v29 = vrot.slane %v780_v19, 7  ;;  %v922_v31 = vadd.f32 %v914_v38, %v905_v11  ;;  %vm2823_vm10 = vmor %vm1039_vm6, %vm1040_vm7 }
 0x11f   : > { %v948_v47 = vmul.f32 %v2453_v44, %v780_v19  ;;  %v2759_v57 = vpop.eup %2055  ;;  %1199 = vmatpush.msra.mxu2 %v1169_v48  ;;  %v1036_v7 = vsub.f32 1.0, %v1035_v12  ;;  %v1023_v11 = vadd.f32 %v2699_v55, %v1022_v2  ;;  %vm2796_vm5 = vcmp.eq.f32.partialorder %v1028_v10, 8.507059e+37  ;;  %v1233_v10 = vld [vmem:[%s3344_s7 + $0x40] sm:$0xff] }
 0x120   : > { %v1855_v41 = vmul.f32 -1.442695, %v2722_v63  ;;  %v818_v30 = vsel %vm801_vm8, 0.0, %v809_v29  ;;  %v800_v34 = vsel %vm783_vm14, 0.0, %v791_v21  ;;  %v1065_v44 = vmul.f32 %v2759_v57, %v2714_v9 }
 0x121   : > { %v881_v8 = vmul.f32 %v2428_v25, %v818_v30  ;;  %v931_v32 = vmul.f32 %v2473_v52, %v818_v30  ;;  %v898_v25 = vmul.f32 %v2443_v37, %v780_v19  ;;  %v915_v51 = vmul.f32 %v2451_v43, %v800_v34  ;;  %v1168_v37 = vld [vmem:[%s3342_s5] sm:$0xff] }
 0x122   : > { %2057 = vpow2.f32 %v1855_v41  ;;  %v965_v54 = vmul.f32 %v2480_v60, %v800_v34  ;;  %v1050_v52 = vmul.f32 %v2746_v36, %v2693_v22  ;;  %1200 = vmatpush.msra.mxu2 %v1168_v37  ;;  %v1030_v60 = vand.u32 2147483648, %v2651_v4 }
 0x123   : > { %v889_v39 = vadd.f32 %v881_v8, %v872_v42  ;;  %v939_v40 = vadd.f32 %v931_v32, %v922_v31  ;;  %2059 = vrcp.f32 %v2744_v35  ;;  %vm1025_vm8 = vweird.f32 %v2699_v55 }
 0x124   : > { %v1051_v61 = vsub.f32 1.0, %v1050_v52  ;;  %vm1024_vm14 = vweird.f32 %v2651_v4  ;;  %v1037_v28 = vmul.f32 %v2740_v33, %v1036_v7  ;;  %v1066_v24 = vsub.f32 1.0, %v1065_v44 }
 0x125   : > { %v906_v14 = vadd.f32 %v898_v25, %v889_v39  ;;  %v956_v53 = vadd.f32 %v948_v47, %v939_v40  ;;  %vm2792_vm4 = vmor %vm1024_vm14, %vm1025_vm8  ;;  %v1031_v27 = vor.u32 1.1754944e-38, %v1030_v60  ;;  %vm1055_vm9 = vweird.f32 %v2746_v36 }
 0x126   : > { %v1052_v29 = vmul.f32 %v2746_v36, %v1051_v61  ;;  %v1038_v42 = vadd.f32 %v2740_v33, %v1037_v28  ;;  %v1043_v34 = vand.u32 2147483647, %v2677_v15  ;;  %v1045_v39 = vand.u32 2147483648, %v2677_v15  ;;  %vm2834_vm12 = vmor %vm1054_vm11, %vm1055_vm9 }
 0x127   : > { %v923_v62 = vadd.f32 %v915_v51, %v906_v14  ;;  %v973_v43 = vadd.f32 %v965_v54, %v956_v53  ;;  %v1060_v40 = vand.u32 2147483648, %v2693_v22  ;;  %v1058_v49 = vand.u32 2147483647, %v2693_v22 }
 0x128   : > { %v2058_v1 = vpop.eup %2057  ;;  %v1053_v32 = vadd.f32 %v2746_v36, %v1052_v29  ;;  %v1042_v14 = vsel %vm2823_vm10, %v2740_v33, %v1038_v42  ;;  %v1073_v15 = vand.u32 2147483647, %v2714_v9  ;;  %v1075_v53 = vand.u32 2147483648, %v2714_v9  ;;  %v1227_v29 = vld [vmem:[%s3344_s7 + $0x10] sm:$0xff] }
 0x129   : > { %v940_v3 = vadd.f32 %v932_v0, %v923_v62  ;;  %v2770_v6 = vadd.f32 %v2565_v17, %v973_v43  ;;  %v2772_v18 = vadd.f32 1.0, %v2058_v1  ;;  %v2778_v19 = vpop.eup %2059  ;;  %vm1070_vm13 = vweird.f32 %v2759_v57 }
 0x12a   : > { %v1080_v38 = vmul.f32 %v2778_v19, %v2744_v35  ;;  %v1057_v22 = vsel %vm2834_vm12, %v2746_v36, %v1053_v32  ;;  %vm1044_vm15 = vcmp.eq.f32.partialorder %v1043_v34, 8.507059e+37  ;;  %v1046_v37 = vor.u32 1.1754944e-38, %v1045_v39 }
 0x12b   : > { %v957_v45 = vadd.f32 %v949_v13, %v940_v3  ;;  %v1856_v56 = vmul.f32 -1.442695, %v2770_v6  ;;  %2061 = vrcp.f32 %v2772_v18  ;;  %v1061_v12 = vor.u32 1.1754944e-38, %v1060_v40 }
 0x12c   : > { %v1081_v50 = vsub.f32 1.0, %v1080_v38  ;;  %vm1059_vm0 = vcmp.eq.f32.partialorder %v1058_v49, 8.507059e+37  ;;  %vm1069_vm1 = vweird.f32 %v2714_v9  ;;  %v1047_v13 = vsel %vm1044_vm15, %v1046_v37, %v1042_v14 }
 0x12d   : > { %v974_v58 = vadd.f32 %v966_v5, %v957_v45  ;;  %2063 = vpow2.f32 %v1856_v56  ;;  %v1062_v1 = vsel %vm1059_vm0, %v1061_v12, %v1057_v22  ;;  %vm2854_vm2 = vmor %vm1069_vm1, %vm1070_vm13  ;;  %vm1074_vm3 = vcmp.eq.f32.partialorder %v1073_v15, 8.507059e+37 }
 0x12e   : > { %v1082_v33 = vmul.f32 %v2778_v19, %v1081_v50  ;;  %vm1085_vm8 = vweird.f32 %v2778_v19  ;;  %vm1084_vm14 = vweird.f32 %v2744_v35  ;;  %v1088_v7 = vand.u32 2147483647, %v2744_v35 }
 0x12f   : > { %v2787_v21 = vadd.f32 %v2565_v17, %v974_v58  ;;  %v1027_v17 = vsel %vm2792_vm4, %v2699_v55, %v1023_v11  ;;  %v1067_v55 = vmul.f32 %v2759_v57, %v1066_v24  ;;  %v1090_v61 = vand.u32 2147483648, %v2744_v35 }
 0x130   : > { %v1032_v47 = vsel %vm2796_vm5, %v1031_v27, %v1027_v17  ;;  %v1083_v5 = vadd.f32 %v2778_v19, %v1082_v33  ;;  %v2871_v56 = vmul.f32 %v1047_v13, %v2607_v20  ;;  %vm2873_vm5 = vmor %vm1084_vm14, %vm1085_vm8  ;;  %v1105_v60 = vand.u32 2147483648, %v2772_v18 }
 0x131   : > { %v2800_v4 = vpop.eup %2061  ;;  %v1857_v30 = vmul.f32 -1.442695, %v2787_v21  ;;  %v1068_v54 = vadd.f32 %v2759_v57, %v1067_v55  ;;  %v2848_v62 = vmul.f32 %v1032_v47, %v2584_v46  ;;  %v1076_v46 = vor.u32 1.1754944e-38, %v1075_v53 }
 0x132   : > { %v1095_v8 = vmul.f32 %v2800_v4, %v2772_v18  ;;  %vm1100_vm4 = vweird.f32 %v2800_v4  ;;  %v2879_v35 = vmul.f32 %v1062_v1, %v2611_v23  ;;  %v1087_v11 = vsel %vm2873_vm5, %v2778_v19, %v1083_v5 }
 0x133   : > { %v2064_v31 = vpop.eup %2063  ;;  %2065 = vpow2.f32 %v1857_v30  ;;  %v1072_v3 = vsel %vm2854_vm2, %v2759_v57, %v1068_v54  ;;  %vm1099_vm6 = vweird.f32 %v2772_v18  ;;  %v1103_v58 = vand.u32 2147483647, %v2772_v18 }
 0x134   : > { %v2816_v25 = vadd.f32 1.0, %v2064_v31  ;;  %v1096_v0 = vsub.f32 1.0, %v1095_v8  ;;  %v1077_v44 = vsel %vm1074_vm3, %v1076_v46, %v1072_v3  ;;  %vm1089_vm7 = vcmp.eq.f32.partialorder %v1088_v7, 8.507059e+37  ;;  %vm2886_vm9 = vmor %vm1099_vm6, %vm1100_vm4  ;;  %v1238_v7 = vld [vmem:[%s3344_s7 + $0x68] sm:$0xff] }
 0x135   : > { %v1091_v28 = vor.u32 1.1754944e-38, %v1090_v61  ;;  %v2177_v38 = vmov 64.0   ;;  %v1106_v17 = vor.u32 1.1754944e-38, %v1105_v60  ;;  %v2896_v27 = vmul.f32 %v1077_v44, %v2642_v59  ;;  %v1237_v61 = vld [vmem:[%s3344_s7 + $0x60] sm:$0xff]  ;;  %v1234_v44 = vld [vmem:[%s3344_s7 + $0x48] sm:$0xff]  ;;  %v1232_v60 = vld [vmem:[%s3344_s7 + $0x38] sm:$0xff] }
 0x136   : > { %2067 = vrcp.f32 %v2816_v25  ;;  %v1097_v43 = vmul.f32 %v2800_v4, %v1096_v0  ;;  %v1120_v24 = vand.u32 2147483648, %v2816_v25  ;;  %v1118_v26 = vand.u32 2147483647, %v2816_v25 }
 0x137   : > { %v1092_v41 = vsel %vm1089_vm7, %v1091_v28, %v1087_v11  ;;  %v1147_v30 = vadd.f32 %v2871_v56, %v2848_v62  ;;  %vm1104_vm11 = vcmp.eq.f32.partialorder %v1103_v58, 8.507059e+37  ;;  %vm1114_vm12 = vweird.f32 %v2816_v25  ;;  %v1231_v11 = vld [vmem:[%s3344_s7 + $0x30] sm:$0xff]  ;;  %v1230_v58 = vld [vmem:[%s3344_s7 + $0x28] sm:$0xff]  ;;  %v1228_v28 = vld [vmem:[%s3344_s7 + $0x18] sm:$0xff] }
 0x138   : > { %v1098_v45 = vadd.f32 %v2800_v4, %v1097_v43  ;;  %v1121_v31 = vor.u32 1.1754944e-38, %v1120_v24  ;;  %vm1119_vm15 = vcmp.eq.f32.partialorder %v1118_v26, 8.507059e+37  ;;  %v2904_v59 = vmul.f32 %v1092_v41, %v2663_v16  ;;  %v1184_v24 = vld [vmem:[%s3343_s6] sm:$0x1] }
 0x139   : > { %v2066_v52 = vpop.eup %2065  ;;  %v1148_v32 = vadd.f32 %v1147_v30, %v2879_v35 }
 0x13a   : > { %v2852_v36 = vadd.f32 1.0, %v2066_v52  ;;  %v1102_v23 = vsel %vm2886_vm9, %v2800_v4, %v1098_v45  ;;  %v1236_v45 = vld [vmem:[%s3344_s7 + $0x58] sm:$0xff] }
 0x13b   : > { %v1107_v4 = vsel %vm1104_vm11, %v1106_v17, %v1102_v23  ;;  %v1149_v47 = vadd.f32 %v1148_v32, %v2896_v27  ;;  %v1225_v23 = vld [vmem:[%s3344_s7] sm:$0xff] }
 0x13c   : > { %v2068_v9 = vpop.eup %2067  ;;  %2069 = vrcp.f32 %v2852_v36  ;;  %v1135_v40 = vand.u32 2147483648, %v2852_v36  ;;  %v1133_v48 = vand.u32 2147483647, %v2852_v36  ;;  %v2910_v49 = vmul.f32 %v1107_v4, %v2722_v63 }
 0x13d   : > { %v1110_v57 = vmul.f32 %v2068_v9, %v2816_v25  ;;  %2071 = vrcp.f32 %v2177_v38  ;;  %vm1115_vm10 = vweird.f32 %v2068_v9  ;;  %vm1129_vm1 = vweird.f32 %v2852_v36  ;;  %v1226_v38 = vld [vmem:[%s3344_s7 + $0x8] sm:$0xff] }
 0x13e   : > { %vm1116_vm13 = vmor %vm1114_vm12, %vm1115_vm10  ;;  %v1150_v16 = vadd.f32 %v1149_v47, %v2904_v59  ;;  %v1136_v51 = vor.u32 1.1754944e-38, %v1135_v40  ;;  %vm1134_vm3 = vcmp.eq.f32.partialorder %v1133_v48, 8.507059e+37  ;;  %v1954_v47 = vld [vmem:[%s3346_s9 + $0x38] sm:$0xff]  ;;  %v1952_v48 = vld [vmem:[%s3346_s9 + $0x28] sm:$0xff] }
 0x13f   : > { %v1111_v20 = vsub.f32 1.0, %v1110_v57  ;;  %v1235_v57 = vld [vmem:[%s3344_s7 + $0x50] sm:$0xff]  ;;  %1362 = vmatpush.bf16.msra.mxu3 %v1954_v47 }
 0x140   : > { %v1151_v22 = vadd.f32 %v1150_v16, %v2910_v49  ;;  %v1950_v16 = vld [vmem:[%s3346_s9 + $0x18] sm:$0xff] }
 0x141   : > { %v1112_v19 = vmul.f32 %v2068_v9, %v1111_v20  ;;  %v1229_v20 = vld [vmem:[%s3344_s7 + $0x20] sm:$0xff] }
 0x142   : > { %v2070_v18 = vpop.eup %2069 }
 0x143   : > { %v1113_v42 = vadd.f32 %v2068_v9, %v1112_v19  ;;  %v1125_v8 = vmul.f32 %v2070_v18, %v2852_v36  ;;  %v2072_v34 = vpop.eup %2071  ;;  %vm1130_vm0 = vweird.f32 %v2070_v18 }
 0x144   : > { %vm1131_vm2 = vmor %vm1129_vm1, %vm1130_vm0  ;;  %v1161_v15 = vmul.f32 64.0, %v2072_v34  ;;  %vm1165_vm8 = vweird.f32 %v2072_v34 }
 0x145   : > { %v1117_v55 = vsel %vm1116_vm13, %v2068_v9, %v1113_v42  ;;  %v1126_v50 = vsub.f32 1.0, %v1125_v8  ;;  %v1239_v9 = vld [vmem:[%s3344_s7 + $0x70] sm:$0xff] }
 0x146   : > { %v1122_v39 = vsel %vm1119_vm15, %v1121_v31, %v1117_v55  ;;  %v1162_v37 = vsub.f32 1.0, %v1161_v15  ;;  %v1948_v15 = vld [vmem:[%s3346_s9 + $0x8] sm:$0xff] }
 0x147   : > { %v1127_v25 = vmul.f32 %v2070_v18, %v1126_v50  ;;  %v2914_v14 = vmul.f32 %v1122_v39, %v2770_v6 }
 0x148   : > { %v1163_v52 = vmul.f32 %v2072_v34, %v1162_v37 }
 0x149   : > { %v1128_v0 = vadd.f32 %v2070_v18, %v1127_v25  ;;  %v1152_v63 = vadd.f32 %v1151_v22, %v2914_v14  ;;  %v1953_v25 = vld [vmem:[%s3346_s9 + $0x30] sm:$0xff]  ;;  %v1947_v22 = vld [vmem:[%s3346_s9] sm:$0xff] }
 0x14a   : > { %v1164_v36 = vadd.f32 %v2072_v34, %v1163_v52  ;;  %1363 = vmatpush.bf16.msra.mxu3 %v1953_v25 }
 0x14b   : > { %v1132_v53 = vsel %vm1131_vm2, %v2070_v18, %v1128_v0  ;;  %v1951_v0 = vld [vmem:[%s3346_s9 + $0x20] sm:$0xff] }
 0x14c   : > { %v1137_v54 = vsel %vm1134_vm3, %v1136_v51, %v1132_v53  ;;  %v2923_v3 = vsel %vm1165_vm8, %v2072_v34, %v1164_v36  ;;  %v1949_v51 = vld [vmem:[%s3346_s9 + $0x10] sm:$0xff]  ;;  %v1241_v53 = vld [vmem:[%s3345_s8] sm:$0x1] }
 0x14d   : > { %v2919_v33 = vmul.f32 %v1137_v54, %v2787_v21  ;;  %v1240_v21 = vld [vmem:[%s3344_s7 + $0x78] sm:$0xff] }
 0x14e   : > { %1242 = vmatpush.msrb.mxu2 %v1240_v21  ;;  %1364 = vmatpush.bf16.msra.mxu3 %v1952_v48 }
 0x14f   : > { %v1153_v12 = vadd.f32 %v1152_v63, %v2919_v33 }
 0x150   : > { %1243 = vmatpush.msrb.mxu2 %v1239_v9 }
 0x151   : > { %v1154_v6 = vrot.slane %v1153_v12, 4 }
 0x152   : > { %1244 = vmatpush.msrb.mxu2 %v1238_v7  ;;  %1365 = vmatpush.bf16.msra.mxu3 %v1951_v0 }
 0x153   : > { %v1155_v43 = vadd.f32 %v1154_v6, %v1153_v12 }
 0x154   : > { %1245 = vmatpush.msrb.mxu2 %v1237_v61 }
 0x155   : > { %v1156_v13 = vrot.slane %v1155_v43, 2 }
 0x156   : > { %1246 = vmatpush.msrb.mxu2 %v1236_v45  ;;  %1366 = vmatpush.bf16.msra.mxu3 %v1950_v16  ;;  %v496_v16 = vld [vmem:[%s2335_s18 + $0x10] sm:$0xff]  }
 0x157   : > { %v1157_v1 = vadd.f32 %v1156_v13, %v1155_v43 }
 0x158   : > { %1247 = vmatpush.msrb.mxu2 %v1235_v57 }
 0x159   : > { %v1158_v2 = vrot.slane %v1157_v1, 1 }
 0x15a   : > { %1248 = vmatpush.msrb.mxu2 %v1234_v44  ;;  %1367 = vmatpush.bf16.msra.mxu3 %v1949_v51 }
 0x15b   : > { %v1159_v46 = vadd.f32 %v1158_v2, %v1157_v1 }
 0x15c   : > { %1249 = vmatpush.msrb.mxu2 %v1233_v10 }
 0x15d   : > { %v1167_v5 = vmul.f32 %v2923_v3, %v1159_v46 }
 0x15e   : > { %1250 = vmatpush.msrb.mxu2 %v1232_v60  ;;  %1368 = vmatpush.bf16.msra.mxu3 %v1948_v15  ;;  %v1395_v15 = vunpack.c.l.bf16 %v496_v16 }
 0x15f   : > { %1201 = vmatmul.f32.vlgmr.msra.gmra.mxu2 %v1167_v5 }
 0x160   : > { %1251 = vmatpush.msrb.mxu2 %v1231_v11  ;;  %v1962_v11 = vld [vmem:[%s3348_s11 + $0x38] sm:$0xff] }
 0x161   : > { %1479 = vmatpush.bf16.msra.mxu1 %v1962_v11 }
 0x162   : > { %1252 = vmatpush.msrb.mxu2 %v1230_v58  ;;  %1369 = vmatpush.bf16.msra.mxu3 %v1947_v22  ;;  %v1961_v58 = vld [vmem:[%s3348_s11 + $0x30] sm:$0xff] }
 0x164   : > { %1253 = vmatpush.msrb.mxu2 %v1229_v20 }
 0x165   : > { %1480 = vmatpush.bf16.msra.mxu1 %v1961_v58 }
 0x166   : > { %1254 = vmatpush.msrb.mxu2 %v1228_v28 }
 0x168   : > { %1255 = vmatpush.msrb.mxu2 %v1227_v29 }
 0x16a   : > { %1256 = vmatpush.msrb.mxu2 %v1226_v38  ;;  %v1956_v38 = vld [vmem:[%s3348_s11 + $0x8] sm:$0xff] }
 0x16c   : > { %1257 = vmatpush.msrb.mxu2 %v1225_v23  ;;  %v2005_v23 = vld [vmem:[%s3347_s10] ss:$0 sm:$0xff] }
 0x1e2   : > { %v1202_v19 = vpop.f32.mrf.mxu2 }
 0x1e3   : > { %v1203_v26 = vadd.f32 %v1202_v19, %v1184_v24  ;;  %v492_v19 = vld [vmem:[%s2335_s18] sm:$0xff]  }
 0x1e5   : > { %v1858_v18 = vmul.f32 -1.442695, %v1203_v26 }
 0x1e7   : > { %2073 = vpow2.f32 %v1858_v18  ;;  %v1391_v18 = vunpack.c.l.bf16 %v492_v19 }
 0x1ed   : > { %v2074_v41 = vpop.eup %2073 }
 0x1ee   : > { %v1208_v17 = vadd.f32 1.0, %v2074_v41  ;;  %v1392_v41 = vunpack.c.h.bf16 %v492_v19 }
 0x1f0   : > { %2075 = vrcp.f32 %v1208_v17  ;;  %v1220_v4 = vand.u32 2147483648, %v1208_v17  ;;  %v1218_v32 = vand.u32 2147483647, %v1208_v17  ;;  %vm1214_vm4 = vweird.f32 %v1208_v17 }
 0x1f2   : > { %v1221_v50 = vor.u32 1.1754944e-38, %v1220_v4  ;;  %vm1219_vm6 = vcmp.eq.f32.partialorder %v1218_v32, 8.507059e+37  ;;  %v494_v32 = vld [vmem:[%s2335_s18 + $0x8] sm:$0xff]  }
 0x1f6   : > { %v2076_v30 = vpop.eup %2075 }
 0x1f7   : > { %v1210_v42 = vmul.f32 %v2076_v30, %v1208_v17  ;;  %vm1215_vm14 = vweird.f32 %v2076_v30 }
 0x1f8   : > { %vm1216_vm5 = vmor %vm1214_vm4, %vm1215_vm14 }
 0x1f9   : > { %v1211_v8 = vsub.f32 1.0, %v1210_v42 }
 0x1fb   : > { %v1212_v31 = vmul.f32 %v2076_v30, %v1211_v8 }
 0x1fd   : > { %v1213_v55 = vadd.f32 %v2076_v30, %v1212_v31 }
 0x1ff   : > { %v1217_v34 = vsel %vm1216_vm5, %v2076_v30, %v1213_v55 }
 0x200   : > { %v1222_v39 = vsel %vm1219_vm6, %v1221_v50, %v1217_v34  ;;  %v1393_v50 = vunpack.c.l.bf16 %v494_v32  ;;  %v1394_v34 = vunpack.c.h.bf16 %v494_v32  ;;  %v1695_v32 = vld [vmem:[%s3350_s13 + $0x68] sm:$0xff] }
 0x201   : > { %v1224_v40 = vmul.f32 %v1222_v39, %v1203_v26 }
 0x203   : > { %1258 = vmatmul.f32.vlgmr.msrb.gmra.mxu2 %v1224_v40 }
 0x286   : > { %v1259_v54 = vpop.f32.mrf.mxu2 }
 0x287   : > { %v1260_v63 = vadd.f32 %v1259_v54, %v1241_v53  ;;  %v1396_v53 = vunpack.c.h.bf16 %v496_v16 }
 0x289   : > { %v1859_v37 = vmul.f32 -1.442695, %v1260_v63 }
 0x28b   : > { %2077 = vpow2.f32 %v1859_v37 }
 0x291   : > { %v2078_v12 = vpop.eup %2077 }
 0x292   : > { %v1265_v6 = vadd.f32 1.0, %v2078_v12 }
 0x294   : > { %2079 = vrcp.f32 %v1265_v6  ;;  %v1277_v36 = vand.u32 2147483648, %v1265_v6  ;;  %v1275_v2 = vand.u32 2147483647, %v1265_v6  ;;  %vm1271_vm9 = vweird.f32 %v1265_v6 }
 0x296   : > { %v1278_v5 = vor.u32 1.1754944e-38, %v1277_v36  ;;  %vm1276_vm11 = vcmp.eq.f32.partialorder %v1275_v2, 8.507059e+37 }
 0x29a   : > { %v2080_v52 = vpop.eup %2079 }
 0x29b   : > { %v1267_v43 = vmul.f32 %v2080_v52, %v1265_v6  ;;  %vm1272_vm7 = vweird.f32 %v2080_v52 }
 0x29c   : > { %vm1273_vm10 = vmor %vm1271_vm9, %vm1272_vm7 }
 0x29d   : > { %v1268_v13 = vsub.f32 1.0, %v1267_v43 }
 0x29f   : > { %v1269_v1 = vmul.f32 %v2080_v52, %v1268_v13 }
 0x2a1   : > { %v1270_v46 = vadd.f32 %v2080_v52, %v1269_v1 }
 0x2a3   : > { %v1274_v21 = vsel %vm1273_vm10, %v2080_v52, %v1270_v46  ;;  %v498_v52 = vld [vmem:[%s2335_s18 + $0x18] sm:$0xff]  }
 0x2a4   : > { %v1279_v9 = vsel %vm1276_vm11, %v1278_v5, %v1274_v21  ;;  %v1397_v13 = vunpack.c.l.bf16 %v498_v52  ;;  %v1398_v36 = vunpack.c.h.bf16 %v498_v52  ;;  %v1691_v52 = vld [vmem:[%s3350_s13 + $0x48] sm:$0xff] }
 0x2a5   : > { %v1281_v7 = vperm.slane %v1279_v9, 0 }
 0x2a7   : > { %v1282_v61 = vmul.f32 %v1281_v7, %v2848_v62  ;;  %v1283_v45 = vmul.f32 %v1281_v7, %v2871_v56  ;;  %v1284_v44 = vmul.f32 %v1281_v7, %v2879_v35  ;;  %v1285_v10 = vmul.f32 %v1281_v7, %v2896_v27  ;;  %v1960_v62 = vld [vmem:[%s3348_s11 + $0x28] sm:$0xff]  ;;  %v1959_v27 = vld [vmem:[%s3348_s11 + $0x20] sm:$0xff] }
 0x2a8   : > { %v1286_v56 = vmul.f32 %v1281_v7, %v2904_v59  ;;  %v1287_v35 = vmul.f32 %v1281_v7, %v2910_v49  ;;  %1481 = vmatpush.bf16.msra.mxu1 %v1960_v62  ;;  %v1288_v28 = vmul.f32 %v1281_v7, %v2914_v14  ;;  %v1289_v29 = vmul.f32 %v1281_v7, %v2919_v33  ;;  %v1958_v59 = vld [vmem:[%s3348_s11 + $0x18] sm:$0xff]  ;;  %v1957_v49 = vld [vmem:[%s3348_s11 + $0x10] sm:$0xff]  ;;  %v1955_v14 = vld [vmem:[%s3348_s11] sm:$0xff] }
 0x2a9   : > { %v1290_v57 = vpack.c.bf16 %v1283_v45, %v1282_v61  ;;  %v1291_v60 = vpack.c.bf16 %v1285_v10, %v1284_v44  ;;  %v3046_v61 = vld [vmem:[%s3349_s12] ss:$0 sm:$0xff] }
 0x2aa   : > { %v1292_v20 = vpack.c.bf16 %v1287_v35, %v1286_v56  ;;  %v1293_v24 = vpack.c.bf16 %v1289_v29, %v1288_v28 }
 0x2ab   : > { %1370 = vmatmul.bf16.vlgmr.msra.gmra.mxu3 %v1290_v57 }
 0x2ac   : > { %1482 = vmatpush.bf16.msra.mxu1 %v1959_v27 }
 0x2b0   : > { %1483 = vmatpush.bf16.msra.mxu1 %v1958_v59 }
 0x2b4   : > { %1484 = vmatpush.bf16.msra.mxu1 %v1957_v49 }
 0x2b8   : > { %1485 = vmatpush.bf16.msra.mxu1 %v1956_v38 }
 0x2bb   : > { %1375 = vmatmul.bf16.gmra.mxu3 %v1291_v60 }
 0x2bc   : > { %1486 = vmatpush.bf16.msra.mxu1 %v1955_v14 }
 0x2cb   : > { %1380 = vmatmul.bf16.gmra.mxu3 %v1292_v20 }
 0x2db   : > { %1385 = vmatmul.bf16.gmra.mxu3 %v1293_v24 }
 0x32e   : > { %v1371_v33 = vpop.f32.mrf.mxu3 }
 0x32f   : > { %v1372_v26 = vadd.f32 %v2005_v23, %v1371_v33 }
 0x331   : > { %v1399_v42 = vadd.f32 %v1391_v18, %v1372_v26 }
 0x336   : > { %v1373_v17 = vpop.f32.mrf.mxu3 }
 0x337   : > { %v1374_v30 = vadd.f32 %v2005_v23, %v1373_v17 }
 0x339   : > { %v1400_v8 = vadd.f32 %v1392_v41, %v1374_v30  ;;  %v1697_v41 = vld [vmem:[%s3350_s13 + $0x78] sm:$0xff] }
 0x33a   : > { %1699 = vmatpush.msra.mxu2 %v1697_v41 }
 0x33b   : > { %v1407_v4 = vpack.c.bf16 %v1400_v8, %v1399_v42 }
 0x33d   : > { %1487 = vmatmul.bf16.vlgmr.msra.gmra.mxu1 %v1407_v4  ;;  %v1696_v4 = vld [vmem:[%s3350_s13 + $0x70] sm:$0xff] }
 0x33e   : > { %v1376_v31 = vpop.f32.mrf.mxu3  ;;  %1700 = vmatpush.msra.mxu2 %v1696_v4 }
 0x33f   : > { %v1377_v55 = vadd.f32 %v2005_v23, %v1376_v31 }
 0x340   : > { %1701 = vmatpush.msra.mxu2 %v1695_v32 }
 0x341   : > { %v1401_v47 = vadd.f32 %v1393_v50, %v1377_v55 }
 0x346   : > { %v1378_v39 = vpop.f32.mrf.mxu3 }
 0x347   : > { %v1379_v40 = vadd.f32 %v2005_v23, %v1378_v39 }
 0x349   : > { %v1402_v25 = vadd.f32 %v1394_v34, %v1379_v40  ;;  %v1694_v40 = vld [vmem:[%s3350_s13 + $0x60] sm:$0xff] }
 0x34a   : > { %1702 = vmatpush.msra.mxu2 %v1694_v40 }
 0x34b   : > { %v1408_v48 = vpack.c.bf16 %v1402_v25, %v1401_v47 }
 0x34d   : > { %1492 = vmatmul.bf16.gmra.mxu1 %v1408_v48  ;;  %v1693_v48 = vld [vmem:[%s3350_s13 + $0x58] sm:$0xff] }
 0x34e   : > { %v1381_v0 = vpop.f32.mrf.mxu3  ;;  %1703 = vmatpush.msra.mxu2 %v1693_v48 }
 0x34f   : > { %v1382_v51 = vadd.f32 %v2005_v23, %v1381_v0 }
 0x351   : > { %v1403_v63 = vadd.f32 %v1395_v15, %v1382_v51 }
 0x356   : > { %v1383_v22 = vpop.f32.mrf.mxu3 }
 0x357   : > { %v1384_v54 = vadd.f32 %v2005_v23, %v1383_v22 }
 0x359   : > { %v1404_v37 = vadd.f32 %v1396_v53, %v1384_v54  ;;  %v1692_v54 = vld [vmem:[%s3350_s13 + $0x50] sm:$0xff] }
 0x35a   : > { %1704 = vmatpush.msra.mxu2 %v1692_v54 }
 0x35b   : > { %v1409_v12 = vpack.c.bf16 %v1404_v37, %v1403_v63 }
 0x35c   : > { %1705 = vmatpush.msra.mxu2 %v1691_v52 }
 0x35d   : > { %1497 = vmatmul.bf16.gmra.mxu1 %v1409_v12 }
 0x35e   : > { %v1386_v6 = vpop.f32.mrf.mxu3 }
 0x35f   : > { %v1387_v43 = vadd.f32 %v2005_v23, %v1386_v6 }
 0x361   : > { %v1405_v46 = vadd.f32 %v1397_v13, %v1387_v43 }
 0x366   : > { %v1388_v1 = vpop.f32.mrf.mxu3 }
 0x367   : > { %v1389_v2 = vadd.f32 %v2005_v23, %v1388_v1 }
 0x369   : > { %v1406_v5 = vadd.f32 %v1398_v36, %v1389_v2  ;;  %v1690_v2 = vld [vmem:[%s3350_s13 + $0x40] sm:$0xff] }
 0x36a   : > { %1706 = vmatpush.msra.mxu2 %v1690_v2 }
 0x36b   : > { %v1410_v21 = vpack.c.bf16 %v1406_v5, %v1405_v46 }
 0x36d   : > { %1502 = vmatmul.bf16.gmra.mxu1 %v1410_v21 }
 0x3ba   : > { %v1488_v9 = vpop.f32.mrf.mxu1 }
 0x3bb   : > { %v3049_v45 = vadd.f32 %v3046_v61, %v1488_v9 }
 0x3bd   : > { %v1924_v44 = vmul.f32 -1.442695, %v3049_v45 }
 0x3bf   : > { %2081 = vpow2.f32 %v1924_v44  ;;  %v1689_v44 = vld [vmem:[%s3350_s13 + $0x38] sm:$0xff] }
 0x3c0   : > { %1707 = vmatpush.msra.mxu2 %v1689_v44 }
 0x3c2   : > { %v1490_v7 = vpop.f32.mrf.mxu1 }
 0x3c3   : > { %v3053_v10 = vadd.f32 %v3046_v61, %v1490_v7 }
 0x3c5   : > { %v1925_v11 = vmul.f32 -1.442695, %v3053_v10  ;;  %v2082_v35 = vpop.eup %2081 }
 0x3c6   : > { %v3064_v20 = vadd.f32 1.0, %v2082_v35 }
 0x3c7   : > { %2083 = vpow2.f32 %v1925_v11 }
 0x3c8   : > { %v1549_v12 = vand.u32 2147483647, %v3064_v20  ;;  %v1551_v6 = vand.u32 2147483648, %v3064_v20  ;;  %vm1545_vm13 = vweird.f32 %v3064_v20 }
 0x3ca   : > { %v1493_v57 = vpop.f32.mrf.mxu1  ;;  %vm3152_vm0 = vcmp.eq.f32.partialorder %v1549_v12, 8.507059e+37 }
 0x3cb   : > { %v3056_v60 = vadd.f32 %v3046_v61, %v1493_v57  ;;  %v1552_v57 = vor.u32 1.1754944e-38, %v1551_v6 }
 0x3cd   : > { %v1926_v62 = vmul.f32 -1.442695, %v3056_v60  ;;  %v2084_v28 = vpop.eup %2083 }
 0x3ce   : > { %v3070_v49 = vadd.f32 1.0, %v2084_v28 }
 0x3cf   : > { %2085 = vpow2.f32 %v1926_v62 }
 0x3d0   : > { %vm1560_vm1 = vweird.f32 %v3070_v49 }
 0x3d2   : > { %v1495_v58 = vpop.f32.mrf.mxu1 }
 0x3d3   : > { %v3061_v56 = vadd.f32 %v3046_v61, %v1495_v58 }
 0x3d5   : > { %v1927_v27 = vmul.f32 -1.442695, %v3061_v56  ;;  %v2086_v59 = vpop.eup %2085 }
 0x3d6   : > { %v3073_v33 = vadd.f32 1.0, %v2086_v59 }
 0x3d7   : > { %2087 = vpow2.f32 %v1927_v27 }
 0x3d8   : > { %2089 = vrcp.f32 %v3064_v20  ;;  %v1579_v41 = vand.u32 2147483647, %v3073_v33  ;;  %vm1575_vm14 = vweird.f32 %v3073_v33 }
 0x3da   : > { %v1498_v29 = vpop.f32.mrf.mxu1  ;;  %vm3216_vm7 = vcmp.eq.f32.partialorder %v1579_v41, 8.507059e+37 }
 0x3db   : > { %v3067_v24 = vadd.f32 %v3046_v61, %v1498_v29  ;;  %v1688_v29 = vld [vmem:[%s3350_s13 + $0x30] sm:$0xff] }
 0x3dc   : > { %1708 = vmatpush.msra.mxu2 %v1688_v29 }
 0x3dd   : > { %v1928_v38 = vmul.f32 -1.442695, %v3067_v24  ;;  %v2088_v14 = vpop.eup %2087 }
 0x3de   : > { %v3076_v23 = vpop.eup %2089  ;;  %v3078_v19 = vadd.f32 1.0, %v2088_v14 }
 0x3df   : > { %2091 = vpow2.f32 %v1928_v38  ;;  %v1541_v30 = vmul.f32 %v3076_v23, %v3064_v20  ;;  %vm1546_vm12 = vweird.f32 %v3076_v23  ;;  %v1564_v20 = vand.u32 2147483647, %v3070_v49 }
 0x3e0   : > { %2093 = vrcp.f32 %v3070_v49  ;;  %vm3148_vm15 = vmor %vm1545_vm13, %vm1546_vm12  ;;  %vm1590_vm9 = vweird.f32 %v3078_v19 }
 0x3e1   : > { %2095 = vrcp.f32 %v3073_v33  ;;  %v1542_v55 = vsub.f32 1.0, %v1541_v30  ;;  %vm1565_vm5 = vcmp.eq.f32.partialorder %v1564_v20, 8.507059e+37 }
 0x3e2   : > { %v1500_v26 = vpop.f32.mrf.mxu1  ;;  %2097 = vrcp.f32 %v3078_v19 }
 0x3e3   : > { %v3081_v18 = vadd.f32 %v3046_v61, %v1500_v26  ;;  %v1543_v16 = vmul.f32 %v3076_v23, %v1542_v55  ;;  %v1566_v26 = vand.u32 2147483648, %v3070_v49  ;;  %v1594_v55 = vand.u32 2147483647, %v3078_v19 }
 0x3e5   : > { %v2092_v17 = vpop.eup %2091  ;;  %v1929_v42 = vmul.f32 -1.442695, %v3081_v18  ;;  %v1544_v43 = vadd.f32 %v3076_v23, %v1543_v16  ;;  %vm3237_vm11 = vcmp.eq.f32.partialorder %v1594_v55, 8.507059e+37 }
 0x3e6   : > { %v3091_v8 = vadd.f32 1.0, %v2092_v17  ;;  %v3096_v31 = vpop.eup %2093  ;;  %v1687_v17 = vld [vmem:[%s3350_s13 + $0x28] sm:$0xff] }
 0x3e7   : > { %2099 = vpow2.f32 %v1929_v42  ;;  %v3101_v50 = vpop.eup %2095  ;;  %v1556_v34 = vmul.f32 %v3096_v31, %v3070_v49  ;;  %vm1561_vm2 = vweird.f32 %v3096_v31  ;;  %v1581_v42 = vand.u32 2147483648, %v3073_v33  ;;  %1709 = vmatpush.msra.mxu2 %v1687_v17 }
 0x3e8   : > { %2101 = vrcp.f32 %v3091_v8  ;;  %v3112_v25 = vpop.eup %2097  ;;  %v1571_v51 = vmul.f32 %v3101_v50, %v3073_v33  ;;  %vm1576_vm3 = vweird.f32 %v3101_v50  ;;  %vm3193_vm8 = vmor %vm1560_vm1, %vm1561_vm2  ;;  %v1611_v9 = vand.u32 2147483648, %v3091_v8 }
 0x3e9   : > { %v1557_v53 = vsub.f32 1.0, %v1556_v34  ;;  %v1586_v63 = vmul.f32 %v3112_v25, %v3078_v19  ;;  %v1596_v34 = vand.u32 2147483648, %v3078_v19  ;;  %vm1591_vm4 = vweird.f32 %v3112_v25  ;;  %vm3212_vm6 = vmor %vm1575_vm14, %vm1576_vm3 }
 0x3ea   : > { %v1503_v39 = vpop.f32.mrf.mxu1  ;;  %v1572_v13 = vsub.f32 1.0, %v1571_v51  ;;  %vm3233_vm10 = vmor %vm1590_vm9, %vm1591_vm4  ;;  %vm1605_vm13 = vweird.f32 %v3091_v8  ;;  %v1612_v20 = vor.u32 1.1754944e-38, %v1611_v9 }
 0x3eb   : > { %v3110_v47 = vadd.f32 %v3046_v61, %v1503_v39  ;;  %v1558_v36 = vmul.f32 %v3096_v31, %v1557_v53  ;;  %v1587_v46 = vsub.f32 1.0, %v1586_v63  ;;  %v1686_v39 = vld [vmem:[%s3350_s13 + $0x20] sm:$0xff]  ;;  %v1582_v53 = vor.u32 1.1754944e-38, %v1581_v42  ;;  %v1684_v63 = vld [vmem:[%s3350_s13 + $0x10] sm:$0xff] }
 0x3ec   : > { %v1573_v58 = vmul.f32 %v3101_v50, %v1572_v13  ;;  %1710 = vmatpush.msra.mxu2 %v1686_v39  ;;  %v1597_v19 = vor.u32 1.1754944e-38, %v1596_v34  ;;  %v1683_v13 = vld [vmem:[%s3350_s13 + $0x8] sm:$0xff] }
 0x3ed   : > { %v2100_v0 = vpop.eup %2099  ;;  %v1930_v15 = vmul.f32 -1.442695, %v3110_v47  ;;  %v1559_v27 = vadd.f32 %v3096_v31, %v1558_v36  ;;  %v1588_v59 = vmul.f32 %v3112_v25, %v1587_v46 }
 0x3ee   : > { %v3121_v22 = vadd.f32 1.0, %v2100_v0  ;;  %v3128_v37 = vpop.eup %2101  ;;  %v1574_v30 = vadd.f32 %v3101_v50, %v1573_v58  ;;  %v1567_v0 = vor.u32 1.1754944e-38, %v1566_v26 }
 0x3ef   : > { %2103 = vpow2.f32 %v1930_v15  ;;  %v1601_v5 = vmul.f32 %v3128_v37, %v3091_v8  ;;  %v1563_v40 = vsel %vm3193_vm8, %v3096_v31, %v1559_v27  ;;  %v1589_v49 = vadd.f32 %v3112_v25, %v1588_v59  ;;  %v1685_v31 = vld [vmem:[%s3350_s13 + $0x18] sm:$0xff] }
 0x3f0   : > { %2105 = vrcp.f32 %v3121_v22  ;;  %1711 = vmatpush.msra.mxu2 %v1685_v31  ;;  %v1568_v6 = vsel %vm1565_vm5, %v1567_v0, %v1563_v40  ;;  %vm1606_vm12 = vweird.f32 %v3128_v37  ;;  %vm1620_vm1 = vweird.f32 %v3121_v22 }
 0x3f1   : > { %v1602_v38 = vsub.f32 1.0, %v1601_v5  ;;  %v1593_v36 = vsel %vm3233_vm10, %v3112_v25, %v1589_v49  ;;  %v1609_v5 = vand.u32 2147483647, %v3091_v8  ;;  %v1682_v25 = vld [vmem:[%s3350_s13] sm:$0xff]  ;;  %v1661_v44 = vmul.f32 %v1568_v6, %v3053_v10 }
 0x3f2   : > { %v1505_v1 = vpop.f32.mrf.mxu1  ;;  %1712 = vmatpush.msra.mxu2 %v1684_v63  ;;  %v1626_v8 = vand.u32 2147483648, %v3121_v22 }
 0x3f3   : > { %v3146_v21 = vadd.f32 %v3046_v61, %v1505_v1  ;;  %v1548_v61 = vsel %vm3148_vm15, %v3076_v23, %v1544_v43  ;;  %v1603_v48 = vmul.f32 %v3128_v37, %v1602_v38  ;;  %vm1610_vm3 = vcmp.eq.f32.partialorder %v1609_v5, 8.507059e+37 }
 0x3f4   : > { %v1553_v23 = vsel %vm3152_vm0, %v1552_v57, %v1548_v61  ;;  %1713 = vmatpush.msra.mxu2 %v1683_v13  ;;  %vm3268_vm0 = vmor %vm1605_vm13, %vm1606_vm12  ;;  %v1627_v41 = vor.u32 1.1754944e-38, %v1626_v8 }
 0x3f5   : > { %v2104_v11 = vpop.eup %2103  ;;  %v1931_v62 = vmul.f32 -1.442695, %v3146_v21  ;;  %v1660_v33 = vmul.f32 %v1553_v23, %v3049_v45  ;;  %v1578_v45 = vsel %vm3212_vm6, %v3101_v50, %v1574_v30  ;;  %v1604_v1 = vadd.f32 %v3128_v37, %v1603_v48 }
 0x3f6   : > { %v3165_v35 = vpop.eup %2105  ;;  %v3170_v28 = vadd.f32 1.0, %v2104_v11  ;;  %v1583_v46 = vsel %vm3216_vm7, %v1582_v53, %v1578_v45  ;;  %v1598_v11 = vsel %vm3237_vm11, %v1597_v19, %v1593_v36  ;;  %1714 = vmatpush.msra.mxu2 %v1682_v25 }
 0x3f7   : > { %v1616_v14 = vmul.f32 %v3165_v35, %v3121_v22  ;;  %2107 = vpow2.f32 %v1931_v62  ;;  %vm1621_vm15 = vweird.f32 %v3165_v35  ;;  %v1608_v58 = vsel %vm3268_vm0, %v3128_v37, %v1604_v1 }
 0x3f8   : > { %2109 = vrcp.f32 %v3170_v28  ;;  %v1624_v62 = vand.u32 2147483647, %v3121_v22  ;;  %v1662_v27 = vmul.f32 %v1583_v46, %v3056_v60  ;;  %vm3281_vm8 = vmor %vm1620_vm1, %vm1621_vm15  ;;  %v1641_v59 = vand.u32 2147483648, %v3170_v28 }
 0x3f9   : > { %v1617_v4 = vsub.f32 1.0, %v1616_v14  ;;  %vm1635_vm14 = vweird.f32 %v3170_v28  ;;  %v1639_v38 = vand.u32 2147483647, %v3170_v28  ;;  %v1668_v14 = vadd.f32 %v1661_v44, %v1660_v33 }
 0x3fa   : > { %v1663_v23 = vmul.f32 %v1598_v11, %v3061_v56  ;;  %v1613_v26 = vsel %vm1610_vm3, %v1612_v20, %v1608_v58  ;;  %vm1625_vm5 = vcmp.eq.f32.partialorder %v1624_v62, 8.507059e+37 }
 0x3fb   : > { %v1618_v54 = vmul.f32 %v3165_v35, %v1617_v4  ;;  %v1669_v42 = vadd.f32 %v1668_v14, %v1662_v27  ;;  %v1664_v32 = vmul.f32 %v1613_v26, %v3067_v24  ;;  %vm1640_vm6 = vcmp.eq.f32.partialorder %v1639_v38, 8.507059e+37 }
 0x3fd   : > { %v2108_v15 = vpop.eup %2107  ;;  %v1619_v7 = vadd.f32 %v3165_v35, %v1618_v54 }
 0x3fe   : > { %v2110_v12 = vpop.eup %2109  ;;  %v3241_v43 = vadd.f32 1.0, %v2108_v15 }
 0x3ff   : > { %v1631_v2 = vmul.f32 %v2110_v12, %v3170_v28  ;;  %vm1636_vm2 = vweird.f32 %v2110_v12  ;;  %v1623_v37 = vsel %vm3281_vm8, %v3165_v35, %v1619_v7  ;;  %v1642_v35 = vor.u32 1.1754944e-38, %v1641_v59 }
 0x400   : > { %2111 = vrcp.f32 %v3241_v43  ;;  %vm1637_vm4 = vmor %vm1635_vm14, %vm1636_vm2  ;;  %v1628_v4 = vsel %vm1625_vm5, %v1627_v41, %v1623_v37  ;;  %v1670_v28 = vadd.f32 %v1669_v42, %v1663_v23  ;;  %v1656_v39 = vand.u32 2147483648, %v3241_v43 }
 0x401   : > { %v1632_v57 = vsub.f32 1.0, %v1631_v2  ;;  %v1665_v56 = vmul.f32 %v1628_v4, %v3081_v18  ;;  %v1654_v49 = vand.u32 2147483647, %v3241_v43  ;;  %vm1650_vm9 = vweird.f32 %v3241_v43 }
 0x402   : > { %v1671_v48 = vadd.f32 %v1670_v28, %v1664_v32  ;;  %v1657_v24 = vor.u32 1.1754944e-38, %v1656_v39 }
 0x403   : > { %v1633_v10 = vmul.f32 %v2110_v12, %v1632_v57  ;;  %vm1655_vm11 = vcmp.eq.f32.partialorder %v1654_v49, 8.507059e+37 }
 0x404   : > { %v1672_v16 = vadd.f32 %v1671_v48, %v1665_v56 }
 0x405   : > { %v1634_v22 = vadd.f32 %v2110_v12, %v1633_v10 }
 0x406   : > { %v2112_v60 = vpop.eup %2111 }
 0x407   : > { %v1638_v17 = vsel %vm1637_vm4, %v2110_v12, %v1634_v22  ;;  %v1646_v30 = vmul.f32 %v2112_v60, %v3241_v43  ;;  %vm1651_vm7 = vweird.f32 %v2112_v60 }
 0x408   : > { %v1643_v34 = vsel %vm1640_vm6, %v1642_v35, %v1638_v17  ;;  %vm1652_vm10 = vmor %vm1650_vm9, %vm1651_vm7 }
 0x409   : > { %v1647_v55 = vsub.f32 1.0, %v1646_v30  ;;  %v1666_v33 = vmul.f32 %v1643_v34, %v3110_v47 }
 0x40b   : > { %v1648_v40 = vmul.f32 %v2112_v60, %v1647_v55  ;;  %v1673_v15 = vadd.f32 %v1672_v16, %v1666_v33 }
 0x40d   : > { %v1649_v0 = vadd.f32 %v2112_v60, %v1648_v40 }
 0x40f   : > { %v1653_v51 = vsel %vm1652_vm10, %v2112_v60, %v1649_v0 }
 0x410   : > { %v1658_v31 = vsel %vm1655_vm11, %v1657_v24, %v1653_v51 }
 0x411   : > { %v1667_v18 = vmul.f32 %v1658_v31, %v3146_v21  ;;  %v1698_v21 = vld [vmem:[%s3351_s14] sm:$0x1] }
 0x413   : > { %v1674_v45 = vadd.f32 %v1673_v15, %v1667_v18 }
 0x415   : > { %v1675_v53 = vrot.slane %v1674_v45, 4 }
 0x417   : > { %v1676_v54 = vadd.f32 %v1675_v53, %v1674_v45 }
 0x419   : > { %v1677_v63 = vrot.slane %v1676_v54, 2 }
 0x41b   : > { %v1678_v12 = vadd.f32 %v1677_v63, %v1676_v54 }
 0x41d   : > { %v1679_v47 = vrot.slane %v1678_v12, 1 }
 0x41f   : > { %v1680_v6 = vadd.f32 %v1679_v47, %v1678_v12 }
 0x421   : > { %v1681_v52 = vmul.f32 %v1680_v6, %v2923_v3 }
 0x423   : > { %1715 = vmatmul.f32.vlgmr.msra.gmra.mxu2 %v1681_v52 }
 0x4a6   : > { %v1716_v50 = vpop.f32.mrf.mxu2 }
 0x4a7   : > { %v1717_v19 = vadd.f32 %v1716_v50, %v1698_v21 }
 0x4a9   : > { %1719 = vst [vmem:[%s486_s30] sm:$0x1] %v1717_v19 }
 0x4aa   : > { %2140 = shalt.err (!%p2137_p3)
}
 0x4ab   : > { %1963 = dma.vmem_to_hbm [thread:$0]  (%p2296_p5), %s1732_s16, 16, %s1734_s24, %s1721_s17  }
 0x4ac PF: > { %s3403_s23 = sld [smem:[#allocation5_spill]]  ;;  %p1969_p4 = scmp.ge.s32.totalorder %s2175_s21, 2 }
 0x4ae   : > { %p1966_p7 = pnand %p1969_p4, %p2300_p6 }
 0x4b0   : > { %p1967_p8 = pneg %p1966_p7 }
 0x4b2   : > { %s1745_s30 = sand.u32 1, %s3403_s23  }
 0x4b3   : > { %s1746_s22 = scalar_lea.sflag [#allocation3], %s1745_s30 }
 0x4b4   : > { %2158 = dma.done.wait (%p1967_p8), %s1746_s22, 16  }
 0x4b5   : > { %2160 = vsyncadd (%p1967_p8), %s1746_s22, 4294967280  ;;  %s3405_s21 = sld [smem:[#allocation7_spill]]  ;;  %s3408_s18 = smov %s2167_s19 }
 0x4b6   : > { %s3406_s0 = sld [smem:[#allocation6_spill]] }
 0x4b7   : > { %s3407_s20 = sld [smem:[#allocation8_spill]] }
 0x4bb   : > { %p25_p9 = scmp.ge.s32.totalorder %s3405_s21, 4  }
 0x4bc   : > { %s3409_s19 = smov %s3406_s0 }
 0x4bd   :  { %27 = sbr.rel (!%p25_p9) target bundleno = 5 (0x5), region = 115 }
 0x4c2   :  { %1751 = vsyncpa [#allocation3], 1 }
 0x4c3   :  { %1753 = vsyncpa [#allocation3 + $0x1], 1 }

</bundles_post_ra>
